<compile_context>
chip_gen: v6e
topology: v6e:2x2x1
jax: 0.10.0
libtpu: 0.0.40
codegen_flags: <defaults>
</compile_context>

<pallas_src>
import functools
import math

import jax
import jax.numpy as jnp
from jax.experimental import pallas as pl
from jax.experimental.pallas import tpu as pltpu


# ----------------------------- helpers ---------------------------------------

def _layer_norm(x, gamma, beta, eps=1e-5):
    # PyTorch nn.LayerNorm: biased variance over last dim, eps=1e-5.
    mu = jnp.mean(x, axis=-1, keepdims=True)
    var = jnp.mean((x - mu) ** 2, axis=-1, keepdims=True)
    return (x - mu) * jax.lax.rsqrt(var + eps) * gamma + beta


# ----------------------------- Pallas kernel ----------------------------------

def transformer_kernel(
    x_ref, pe_ref, pool_ref, mask_ref,
    wqkv_ref, bqkv_ref, woh_ref, bo_ref,
    w1_ref, b1_ref, w2_ref, b2_ref,
    g1_ref, be1_ref, g2_ref, be2_ref,
    gdec_ref, bdec_ref, wdec_ref, bldec_ref,
    out_ref,
    *, nlayers, nhead,
):
    f32 = jnp.float32
    bf16 = jnp.bfloat16
    M, D = x_ref.shape                      # M = b_tile * seq_len (lane/sublane-dense slab)
    hd = D // nhead
    scale = 1.0 / math.sqrt(hd)

    # Additive block-diagonal mask (0 within a sequence, -1e9 across sequences), built once
    # in the wrapper and hoisted out of the layer/head loops here.
    mask = mask_ref[...]                                                      # (M, M) f32

    # Positional encoding (+ dropout == identity in eval mode).
    x = x_ref[...] + pe_ref[...]                                              # (M, D) f32

    # nlayers == 2: static unroll is fine.  TODO(synk): move to lax.fori_loop over a stacked
    # weight axis if nlayers grows past ~2.
    for l in range(nlayers):
        # ---- fused QKV projection: one [M, D] @ [D, 3D] (bf16 MXU operands, f32 acc) ----
        qkv = jnp.dot(x.astype(bf16), wqkv_ref[l],
                      preferred_element_type=f32) + bqkv_ref[l]               # (M, 3D) f32
        qkv = qkv.astype(bf16)                                                # MXU operands bf16

        # ---- block-diagonal batched attention over all b_tile sequences, per head ----
        attn = jnp.zeros((M, D), f32)
        for h in range(nhead):
            c0 = h * hd
            q = qkv[:, c0:c0 + hd]                                            # (M, hd) bf16
            k = qkv[:, D + c0:D + c0 + hd]
            v = qkv[:, 2 * D + c0:2 * D + c0 + hd]
            s = jnp.einsum('qe,ke->qk', q, k,
                           preferred_element_type=f32) * scale + mask         # (M, M) f32
            s = s - jnp.max(s, axis=-1, keepdims=True)
            p = jnp.exp(s)
            p = p * pl.reciprocal(jnp.sum(p, axis=-1, keepdims=True), approx=True)
            ctx = jnp.dot(p.astype(bf16), v, preferred_element_type=f32)      # (M, hd) f32
            # Fold the per-head output projection directly (Wo stored (L, nhead, hd, D)):
            attn = attn + jnp.dot(ctx.astype(bf16), woh_ref[l, h],
                                  preferred_element_type=f32)                 # (M, D) f32
        attn = attn + bo_ref[l]
        x = _layer_norm(x + attn, g1_ref[l], be1_ref[l])

        # ---- feed forward (full-width bf16 matmuls, f32 acc) ----
        h1 = jnp.dot(x.astype(bf16), w1_ref[l],
                     preferred_element_type=f32) + b1_ref[l]                  # (M, d_hid)
        h1 = jnp.maximum(h1, 0.0)                                             # relu
        ff = jnp.dot(h1.astype(bf16), w2_ref[l],
                     preferred_element_type=f32) + b2_ref[l]                  # (M, D)
        x = _layer_norm(x + ff, g2_ref[l], be2_ref[l])

    # ---- mean over sequence (tiny pooling matmul) + decoder (LayerNorm -> Linear) ----
    pooled = jnp.dot(pool_ref[...], x.astype(bf16), preferred_element_type=f32)   # (BT, D)
    pooled = _layer_norm(pooled, gdec_ref[...], bdec_ref[...])
    logits = jnp.dot(pooled.astype(bf16), wdec_ref[...],
                     preferred_element_type=f32) + bldec_ref[...]             # (BT, C_pad)
    out_ref[...] = logits.astype(out_ref.dtype)                               # lane-dense store


# ----------------------------- wrapper ----------------------------------------

def transformer_forward(src, kern_params, *, nlayers, nhead, b_tile=None):
    B, S, D = src.shape
    C = kern_params['wdec'].shape[-1]
    bf16 = jnp.bfloat16

    # Grid sizing: grid=2 "parallel" keeps both v7x TensorCores busy; on single-TC v5e / v6e
    # pass b_tile=B (grid=1) to drop the per-step overhead entirely.
    if b_tile is None:
        b_tile = B // 2 if (B % 2 == 0 and B >= 2) else B
    assert B % b_tile == 0, "batch must be divisible by b_tile"
    M = b_tile * S
    assert (M % 8 == 0) or (b_tile == B), "tile rows must be sublane aligned"

    # Flatten (batch, seq) in the wrapper so the kernel sees lane/sublane-dense [M, D] slabs.
    src2 = src.reshape(B * S, D)
    pe = kern_params['pe'][:S]                                       # slice PE buffer to seq len
    pe_tiled = jnp.tile(pe, (b_tile, 1)).astype(jnp.float32)         # (M, D)

    # Mean-pool over sequence expressed as a tiny matmul (bf16 MXU operand).
    pool = (jnp.repeat(jnp.eye(b_tile, dtype=jnp.float32), S, axis=1) / float(S)).astype(bf16)

    # Additive block-diagonal attention mask: 0 within a sequence, -1e9 across sequences.
    seq_id = jnp.repeat(jnp.arange(b_tile, dtype=jnp.int32), S)      # (M,)
    attn_mask = jnp.where(seq_id[:, None] == seq_id[None, :],
                          0.0, -1e9).astype(jnp.float32)             # (M, M)

    # Pad decoder to a lane-dense output width; slice back to C after the call.
    C_PAD = max(128, -(-C // 128) * 128)
    wdec_pad = jnp.zeros((D, C_PAD), bf16).at[:, :C].set(kern_params['wdec'])
    bldec_pad = jnp.zeros((1, C_PAD), jnp.float32).at[:, :C].set(kern_params['bldec'])

    order = ('wqkv', 'bqkv', 'woh', 'bo', 'w1', 'b1', 'w2', 'b2',
             'g1', 'be1', 'g2', 'be2', 'gdec', 'bdec')
    params = ([pe_tiled, pool, attn_mask]
              + [kern_params[k] for k in order]
              + [wdec_pad, bldec_pad])

    def replicated_spec(a):
        nd = a.ndim
        return pl.BlockSpec(a.shape, lambda b, _nd=nd: (0,) * _nd)

    in_specs = [pl.BlockSpec((M, D), lambda b: (b, 0))]              # b_tile sequences per step
    in_specs += [replicated_spec(a) for a in params]                 # params: full arrays
    out_spec = pl.BlockSpec((b_tile, C_PAD), lambda b: (b, 0))

    kernel = functools.partial(transformer_kernel, nlayers=nlayers, nhead=nhead)

    out = pl.pallas_call(
        kernel,
        out_shape=jax.ShapeDtypeStruct((B, C_PAD), jnp.float32),
        grid=(B // b_tile,),
        in_specs=in_specs,
        out_specs=out_spec,
        compiler_params=pltpu.CompilerParams(
            dimension_semantics=("parallel",),                       # batch axis: shard across TCs
            vmem_limit_bytes=32 * 1024 * 1024),
    )(src2, *params)
    return out[:, :C]


# ----------------------------- parameter init ---------------------------------

def init_params(key, *, d_model, nhead, d_hid, nlayers, num_classes, max_len):
    D, H, L, C = d_model, d_hid, nlayers, num_classes
    hd = D // nhead
    ks = jax.random.split(key, 16)

    def nrm(k, shape, scale=0.05):
        return scale * jax.random.normal(k, shape, dtype=jnp.float32)

    # Sinusoidal positional-encoding buffer, identical to the PyTorch module (max_len x D).
    position = jnp.arange(max_len, dtype=jnp.float32)[:, None]
    div_term = jnp.exp(jnp.arange(0, D, 2, dtype=jnp.float32) * (-math.log(10000.0) / D))
    pe = jnp.zeros((max_len, D), dtype=jnp.float32)
    pe = pe.at[:, 0::2].set(jnp.sin(position * div_term))
    pe = pe.at[:, 1::2].set(jnp.cos(position * div_term))

    # Parameters in their native PyTorch shapes (per encoder layer, stacked along L).
    std = dict(
        pe=pe,
        in_proj_w=nrm(ks[0], (L, 3 * D, D)),          # MultiheadAttention.in_proj_weight
        in_proj_b=nrm(ks[1], (L, 3 * D)),
        out_proj_w=nrm(ks[2], (L, D, D)),             # MultiheadAttention.out_proj
        out_proj_b=nrm(ks[3], (L, D)),
        lin1_w=nrm(ks[4], (L, H, D)),                 # TransformerEncoderLayer.linear1
        lin1_b=nrm(ks[5], (L, H)),
        lin2_w=nrm(ks[6], (L, D, H)),                 # TransformerEncoderLayer.linear2
        lin2_b=nrm(ks[7], (L, D)),
        norm1_w=1.0 + nrm(ks[8], (L, D), 0.1),
        norm1_b=nrm(ks[9], (L, D), 0.1),
        norm2_w=1.0 + nrm(ks[10], (L, D), 0.1),
        norm2_b=nrm(ks[11], (L, D), 0.1),
        dec_ln_w=1.0 + nrm(ks[12], (D,), 0.1),        # decoder LayerNorm
        dec_ln_b=nrm(ks[13], (D,), 0.1),
        dec_w=nrm(ks[14], (C, D)),                    # decoder Linear
        dec_b=nrm(ks[15], (C,)),
    )

    # Kernel layout: fused, pre-transposed, lane-dense, bf16 for MXU operands.
    bf16 = jnp.bfloat16
    kern = dict(
        pe=pe,
        wqkv=std['in_proj_w'].transpose(0, 2, 1).astype(bf16),               # [L, D, 3D]
        bqkv=std['in_proj_b'].reshape(L, 1, 3 * D),
        # Output projection split per head on a leading axis: [L, nhead, hd, D].
        woh=std['out_proj_w'].transpose(0, 2, 1).reshape(L, nhead, hd, D).astype(bf16),
        bo=std['out_proj_b'].reshape(L, 1, D),
        w1=std['lin1_w'].transpose(0, 2, 1).astype(bf16),                    # [L, D, H]
        b1=std['lin1_b'].reshape(L, 1, H),
        w2=std['lin2_w'].transpose(0, 2, 1).astype(bf16),                    # [L, H, D]
        b2=std['lin2_b'].reshape(L, 1, D),
        g1=std['norm1_w'].reshape(L, 1, D),
        be1=std['norm1_b'].reshape(L, 1, D),
        g2=std['norm2_w'].reshape(L, 1, D),
        be2=std['norm2_b'].reshape(L, 1, D),
        gdec=std['dec_ln_w'].reshape(1, D),
        bdec=std['dec_ln_b'].reshape(1, D),
        wdec=std['dec_w'].T.astype(bf16),                                    # [D, C]
        bldec=std['dec_b'].reshape(1, C),
    )
    return std, kern


# ----------------------------- pure-JAX reference ------------------------------

def reference_forward(src, std, *, nlayers, nhead):
    B, S, D = src.shape
    hd = D // nhead
    x = src + std['pe'][None, :S]
    for l in range(nlayers):
        qkv = jnp.einsum('bsd,ed->bse', x, std['in_proj_w'][l]) + std['in_proj_b'][l]
        q, k, v = qkv[..., :D], qkv[..., D:2 * D], qkv[..., 2 * D:]
        q = q.reshape(B, S, nhead, hd)
        k = k.reshape(B, S, nhead, hd)
        v = v.reshape(B, S, nhead, hd)
        s = jnp.einsum('bqhe,bkhe->bhqk', q, k) / math.sqrt(hd)
        p = jax.nn.softmax(s, axis=-1)
        ctx = jnp.einsum('bhqk,bkhe->bqhe', p, v).reshape(B, S, D)
        attn = jnp.einsum('bsd,ed->bse', ctx, std['out_proj_w'][l]) + std['out_proj_b'][l]
        x = _layer_norm(x + attn, std['norm1_w'][l], std['norm1_b'][l])
        h1 = jax.nn.relu(jnp.einsum('bsd,hd->bsh', x, std['lin1_w'][l]) + std['lin1_b'][l])
        ff = jnp.einsum('bsh,dh->bsd', h1, std['lin2_w'][l]) + std['lin2_b'][l]
        x = _layer_norm(x + ff, std['norm2_w'][l], std['norm2_b'][l])
    pooled = x.mean(axis=1)
    pooled = _layer_norm(pooled, std['dec_ln_w'], std['dec_ln_b'])
    return jnp.einsum('bd,cd->bc', pooled, std['dec_w']) + std['dec_b']


# ----------------------------- main --------------------------------------------

if __name__ == "__main__":
    # seq must equal max_len=5 (the torch module adds the full pe buffer).
    B, S, D, NH, H, L, C = 16, 5, 32, 4, 64, 2, 8

    key = jax.random.PRNGKey(0)
    k_x, k_p = jax.random.split(key)
    src = jax.random.normal(k_x, (B, S, D), dtype=jnp.float32)

    std_params, kern_params = init_params(
        k_p, d_model=D, nhead=NH, d_hid=H, nlayers=L, num_classes=C, max_len=S)

    # b_tile=B//2 -> grid=2, "parallel": uses both v7x TensorCores.  On v5e/v6e use b_tile=B.
    out = transformer_forward(src, kern_params, nlayers=L, nhead=NH, b_tile=B // 2)
    out = jax.block_until_ready(out)

    ref = reference_forward(src, std_params, nlayers=L, nhead=NH)
    assert out.shape == (B, C), out.shape
    max_err = float(jnp.max(jnp.abs(out - ref)))
    # bf16 MXU operands + approx reciprocal vs. the f32 reference stay well inside this bound.
    assert max_err < 5e-2, f"mismatch vs reference: max abs err {max_err}"

    print("KERNEL_OK")
</pallas_src>

<mosaic_0001>
module attributes {stable_mosaic.version = 11 : i64} {
  func.func @transformer_kernel(%arg0: i32, %arg1: memref<40x32xf32, #tpu.memory_space<vmem>>, %arg2: memref<40x32xf32, #tpu.memory_space<vmem>>, %arg3: memref<8x40xbf16, #tpu.memory_space<vmem>>, %arg4: memref<40x40xf32, #tpu.memory_space<vmem>>, %arg5: memref<2x32x96xbf16, #tpu.memory_space<vmem>>, %arg6: memref<2x1x96xf32, #tpu.memory_space<vmem>>, %arg7: memref<2x4x8x32xbf16, #tpu.memory_space<vmem>>, %arg8: memref<2x1x32xf32, #tpu.memory_space<vmem>>, %arg9: memref<2x32x64xbf16, #tpu.memory_space<vmem>>, %arg10: memref<2x1x64xf32, #tpu.memory_space<vmem>>, %arg11: memref<2x64x32xbf16, #tpu.memory_space<vmem>>, %arg12: memref<2x1x32xf32, #tpu.memory_space<vmem>>, %arg13: memref<2x1x32xf32, #tpu.memory_space<vmem>>, %arg14: memref<2x1x32xf32, #tpu.memory_space<vmem>>, %arg15: memref<2x1x32xf32, #tpu.memory_space<vmem>>, %arg16: memref<2x1x32xf32, #tpu.memory_space<vmem>>, %arg17: memref<1x32xf32, #tpu.memory_space<vmem>>, %arg18: memref<1x32xf32, #tpu.memory_space<vmem>>, %arg19: memref<32x128xbf16, #tpu.memory_space<vmem>>, %arg20: memref<1x128xf32, #tpu.memory_space<vmem>>, %arg21: memref<8x128xf32, #tpu.memory_space<vmem>>) attributes {dimension_semantics = [#tpu.dimension_semantics<parallel>], iteration_bounds = array<i64: 2>, scalar_prefetch = 0 : i64, scratch_operands = 0 : i64, tpu.core_type = #tpu.core_type<tc>, window_params = [{transform_indices = @transform_0, window_bounds = array<i64: 40, 32>}, {pipeline_mode = #tpu.pipeline_mode<synchronous>, transform_indices = @transform_1, window_bounds = array<i64: 40, 32>}, {pipeline_mode = #tpu.pipeline_mode<synchronous>, transform_indices = @transform_2, window_bounds = array<i64: 8, 40>}, {pipeline_mode = #tpu.pipeline_mode<synchronous>, transform_indices = @transform_3, window_bounds = array<i64: 40, 40>}, {pipeline_mode = #tpu.pipeline_mode<synchronous>, transform_indices = @transform_4, window_bounds = array<i64: 2, 32, 96>}, {pipeline_mode = #tpu.pipeline_mode<synchronous>, transform_indices = @transform_5, window_bounds = array<i64: 2, 1, 96>}, {pipeline_mode = #tpu.pipeline_mode<synchronous>, transform_indices = @transform_6, window_bounds = array<i64: 2, 4, 8, 32>}, {pipeline_mode = #tpu.pipeline_mode<synchronous>, transform_indices = @transform_7, window_bounds = array<i64: 2, 1, 32>}, {pipeline_mode = #tpu.pipeline_mode<synchronous>, transform_indices = @transform_8, window_bounds = array<i64: 2, 32, 64>}, {pipeline_mode = #tpu.pipeline_mode<synchronous>, transform_indices = @transform_9, window_bounds = array<i64: 2, 1, 64>}, {pipeline_mode = #tpu.pipeline_mode<synchronous>, transform_indices = @transform_10, window_bounds = array<i64: 2, 64, 32>}, {pipeline_mode = #tpu.pipeline_mode<synchronous>, transform_indices = @transform_11, window_bounds = array<i64: 2, 1, 32>}, {pipeline_mode = #tpu.pipeline_mode<synchronous>, transform_indices = @transform_12, window_bounds = array<i64: 2, 1, 32>}, {pipeline_mode = #tpu.pipeline_mode<synchronous>, transform_indices = @transform_13, window_bounds = array<i64: 2, 1, 32>}, {pipeline_mode = #tpu.pipeline_mode<synchronous>, transform_indices = @transform_14, window_bounds = array<i64: 2, 1, 32>}, {pipeline_mode = #tpu.pipeline_mode<synchronous>, transform_indices = @transform_15, window_bounds = array<i64: 2, 1, 32>}, {pipeline_mode = #tpu.pipeline_mode<synchronous>, transform_indices = @transform_16, window_bounds = array<i64: 1, 32>}, {pipeline_mode = #tpu.pipeline_mode<synchronous>, transform_indices = @transform_17, window_bounds = array<i64: 1, 32>}, {pipeline_mode = #tpu.pipeline_mode<synchronous>, transform_indices = @transform_18, window_bounds = array<i64: 32, 128>}, {pipeline_mode = #tpu.pipeline_mode<synchronous>, transform_indices = @transform_19, window_bounds = array<i64: 1, 128>}, {transform_indices = @transform_20, window_bounds = array<i64: 8, 128>}]} {
    %c0 = arith.constant 0 : index
    %c0_0 = arith.constant 0 : index
    %0 = vector.load %arg4[%c0, %c0_0] : memref<40x40xf32, #tpu.memory_space<vmem>>, vector<40x40xf32>
    %c0_1 = arith.constant 0 : index
    %c0_2 = arith.constant 0 : index
    %1 = vector.load %arg1[%c0_1, %c0_2] : memref<40x32xf32, #tpu.memory_space<vmem>>, vector<40x32xf32>
    %c0_3 = arith.constant 0 : index
    %c0_4 = arith.constant 0 : index
    %2 = vector.load %arg2[%c0_3, %c0_4] : memref<40x32xf32, #tpu.memory_space<vmem>>, vector<40x32xf32>
    %3 = arith.addf %1, %2 : vector<40x32xf32>
    %4 = arith.truncf %3 : vector<40x32xf32> to vector<40x32xbf16>
    %c0_5 = arith.constant 0 : index
    %c0_6 = arith.constant 0 : index
    %c0_7 = arith.constant 0 : index
    %5 = vector.load %arg5[%c0_5, %c0_6, %c0_7] : memref<2x32x96xbf16, #tpu.memory_space<vmem>>, vector<1x32x96xbf16>
    %6 = vector.shape_cast %5 : vector<1x32x96xbf16> to vector<32x96xbf16>
    %cst = arith.constant dense<0.000000e+00> : vector<40x96xf32>
    %7 = tpu.matmul %4, %6, %cst {dimension_numbers = #tpu.dot_dimension_numbers<[1], [0], [0], [1], [0, 0, 1, 1], [], []>} : vector<40x32xbf16>, vector<32x96xbf16>, vector<40x96xf32> -> vector<40x96xf32>
    %c0_8 = arith.constant 0 : index
    %c0_9 = arith.constant 0 : index
    %c0_10 = arith.constant 0 : index
    %8 = vector.load %arg6[%c0_8, %c0_9, %c0_10] : memref<2x1x96xf32, #tpu.memory_space<vmem>>, vector<1x1x96xf32>
    %9 = vector.shape_cast %8 : vector<1x1x96xf32> to vector<1x96xf32>
    %10 = vector.broadcast %9 : vector<1x96xf32> to vector<40x96xf32>
    %11 = arith.addf %7, %10 : vector<40x96xf32>
    %12 = arith.truncf %11 : vector<40x96xf32> to vector<40x96xbf16>
    %cst_11 = arith.constant 0.000000e+00 : f32
    %13 = vector.broadcast %cst_11 : f32 to vector<40x32xf32>
    %14 = vector.extract_strided_slice %12 {offsets = [0, 0], sizes = [40, 8], strides = [1, 1]} : vector<40x96xbf16> to vector<40x8xbf16>
    %15 = vector.extract_strided_slice %12 {offsets = [0, 32], sizes = [40, 8], strides = [1, 1]} : vector<40x96xbf16> to vector<40x8xbf16>
    %16 = vector.extract_strided_slice %12 {offsets = [0, 64], sizes = [40, 8], strides = [1, 1]} : vector<40x96xbf16> to vector<40x8xbf16>
    "tpu.trace_start"() <{level = 10 : i32, message = "qe,ke->qk"}> : () -> ()
    %cst_12 = arith.constant dense<0.000000e+00> : vector<40x40xf32>
    %17 = tpu.matmul %14, %15, %cst_12 {dimension_numbers = #tpu.dot_dimension_numbers<[1], [1], [0], [0], [0, 0, 1, 0], [], []>} : vector<40x8xbf16>, vector<40x8xbf16>, vector<40x40xf32> -> vector<40x40xf32>
    "tpu.trace_stop"() : () -> ()
    %cst_13 = arith.constant 0.353553385 : f32
    %18 = vector.broadcast %cst_13 : f32 to vector<40x40xf32>
    %19 = arith.mulf %17, %18 : vector<40x40xf32>
    %20 = arith.addf %19, %0 : vector<40x40xf32>
    %cst_14 = arith.constant dense<0xFF800000> : vector<40xf32>
    %21 = vector.multi_reduction <maximumf>, %20, %cst_14 [1] : vector<40x40xf32> to vector<40xf32>
    %22 = vector.shape_cast %21 : vector<40xf32> to vector<40x1xf32>
    %23 = vector.broadcast %22 : vector<40x1xf32> to vector<40x40xf32>
    %24 = arith.subf %20, %23 : vector<40x40xf32>
    %25 = math.exp %24 : vector<40x40xf32>
    %cst_15 = arith.constant dense<0.000000e+00> : vector<40xf32>
    %26 = vector.multi_reduction <add>, %25, %cst_15 [1] : vector<40x40xf32> to vector<40xf32>
    %27 = vector.shape_cast %26 : vector<40xf32> to vector<40x1xf32>
    %28 = tpu.reciprocal %27 {approx = true} : vector<40x1xf32> -> vector<40x1xf32>
    %29 = vector.broadcast %28 : vector<40x1xf32> to vector<40x40xf32>
    %30 = arith.mulf %25, %29 : vector<40x40xf32>
    %31 = arith.truncf %30 : vector<40x40xf32> to vector<40x40xbf16>
    %cst_16 = arith.constant dense<0.000000e+00> : vector<40x8xf32>
    %32 = tpu.matmul %31, %16, %cst_16 {dimension_numbers = #tpu.dot_dimension_numbers<[1], [0], [0], [1], [0, 0, 1, 1], [], []>} : vector<40x40xbf16>, vector<40x8xbf16>, vector<40x8xf32> -> vector<40x8xf32>
    %33 = arith.truncf %32 : vector<40x8xf32> to vector<40x8xbf16>
    %c0_17 = arith.constant 0 : index
    %c0_18 = arith.constant 0 : index
    %c0_19 = arith.constant 0 : index
    %c0_20 = arith.constant 0 : index
    %34 = vector.load %arg7[%c0_17, %c0_18, %c0_19, %c0_20] : memref<2x4x8x32xbf16, #tpu.memory_space<vmem>>, vector<1x1x8x32xbf16>
    %35 = vector.shape_cast %34 : vector<1x1x8x32xbf16> to vector<8x32xbf16>
    %cst_21 = arith.constant dense<0.000000e+00> : vector<40x32xf32>
    %36 = tpu.matmul %33, %35, %cst_21 {dimension_numbers = #tpu.dot_dimension_numbers<[1], [0], [0], [1], [0, 0, 1, 1], [], []>} : vector<40x8xbf16>, vector<8x32xbf16>, vector<40x32xf32> -> vector<40x32xf32>
    %37 = arith.addf %13, %36 : vector<40x32xf32>
    %38 = vector.extract_strided_slice %12 {offsets = [0, 8], sizes = [40, 8], strides = [1, 1]} : vector<40x96xbf16> to vector<40x8xbf16>
    %39 = vector.extract_strided_slice %12 {offsets = [0, 40], sizes = [40, 8], strides = [1, 1]} : vector<40x96xbf16> to vector<40x8xbf16>
    %40 = vector.extract_strided_slice %12 {offsets = [0, 72], sizes = [40, 8], strides = [1, 1]} : vector<40x96xbf16> to vector<40x8xbf16>
    "tpu.trace_start"() <{level = 10 : i32, message = "qe,ke->qk"}> : () -> ()
    %cst_22 = arith.constant dense<0.000000e+00> : vector<40x40xf32>
    %41 = tpu.matmul %38, %39, %cst_22 {dimension_numbers = #tpu.dot_dimension_numbers<[1], [1], [0], [0], [0, 0, 1, 0], [], []>} : vector<40x8xbf16>, vector<40x8xbf16>, vector<40x40xf32> -> vector<40x40xf32>
    "tpu.trace_stop"() : () -> ()
    %cst_23 = arith.constant 0.353553385 : f32
    %42 = vector.broadcast %cst_23 : f32 to vector<40x40xf32>
    %43 = arith.mulf %41, %42 : vector<40x40xf32>
    %44 = arith.addf %43, %0 : vector<40x40xf32>
    %cst_24 = arith.constant dense<0xFF800000> : vector<40xf32>
    %45 = vector.multi_reduction <maximumf>, %44, %cst_24 [1] : vector<40x40xf32> to vector<40xf32>
    %46 = vector.shape_cast %45 : vector<40xf32> to vector<40x1xf32>
    %47 = vector.broadcast %46 : vector<40x1xf32> to vector<40x40xf32>
    %48 = arith.subf %44, %47 : vector<40x40xf32>
    %49 = math.exp %48 : vector<40x40xf32>
    %cst_25 = arith.constant dense<0.000000e+00> : vector<40xf32>
    %50 = vector.multi_reduction <add>, %49, %cst_25 [1] : vector<40x40xf32> to vector<40xf32>
    %51 = vector.shape_cast %50 : vector<40xf32> to vector<40x1xf32>
    %52 = tpu.reciprocal %51 {approx = true} : vector<40x1xf32> -> vector<40x1xf32>
    %53 = vector.broadcast %52 : vector<40x1xf32> to vector<40x40xf32>
    %54 = arith.mulf %49, %53 : vector<40x40xf32>
    %55 = arith.truncf %54 : vector<40x40xf32> to vector<40x40xbf16>
    %cst_26 = arith.constant dense<0.000000e+00> : vector<40x8xf32>
    %56 = tpu.matmul %55, %40, %cst_26 {dimension_numbers = #tpu.dot_dimension_numbers<[1], [0], [0], [1], [0, 0, 1, 1], [], []>} : vector<40x40xbf16>, vector<40x8xbf16>, vector<40x8xf32> -> vector<40x8xf32>
    %57 = arith.truncf %56 : vector<40x8xf32> to vector<40x8xbf16>
    %c0_27 = arith.constant 0 : index
    %c1 = arith.constant 1 : index
    %c0_28 = arith.constant 0 : index
    %c0_29 = arith.constant 0 : index
    %58 = vector.load %arg7[%c0_27, %c1, %c0_28, %c0_29] : memref<2x4x8x32xbf16, #tpu.memory_space<vmem>>, vector<1x1x8x32xbf16>
    %59 = vector.shape_cast %58 : vector<1x1x8x32xbf16> to vector<8x32xbf16>
    %cst_30 = arith.constant dense<0.000000e+00> : vector<40x32xf32>
    %60 = tpu.matmul %57, %59, %cst_30 {dimension_numbers = #tpu.dot_dimension_numbers<[1], [0], [0], [1], [0, 0, 1, 1], [], []>} : vector<40x8xbf16>, vector<8x32xbf16>, vector<40x32xf32> -> vector<40x32xf32>
    %61 = arith.addf %37, %60 : vector<40x32xf32>
    %62 = vector.extract_strided_slice %12 {offsets = [0, 16], sizes = [40, 8], strides = [1, 1]} : vector<40x96xbf16> to vector<40x8xbf16>
    %63 = vector.extract_strided_slice %12 {offsets = [0, 48], sizes = [40, 8], strides = [1, 1]} : vector<40x96xbf16> to vector<40x8xbf16>
    %64 = vector.extract_strided_slice %12 {offsets = [0, 80], sizes = [40, 8], strides = [1, 1]} : vector<40x96xbf16> to vector<40x8xbf16>
    "tpu.trace_start"() <{level = 10 : i32, message = "qe,ke->qk"}> : () -> ()
    %cst_31 = arith.constant dense<0.000000e+00> : vector<40x40xf32>
    %65 = tpu.matmul %62, %63, %cst_31 {dimension_numbers = #tpu.dot_dimension_numbers<[1], [1], [0], [0], [0, 0, 1, 0], [], []>} : vector<40x8xbf16>, vector<40x8xbf16>, vector<40x40xf32> -> vector<40x40xf32>
    "tpu.trace_stop"() : () -> ()
    %cst_32 = arith.constant 0.353553385 : f32
    %66 = vector.broadcast %cst_32 : f32 to vector<40x40xf32>
    %67 = arith.mulf %65, %66 : vector<40x40xf32>
    %68 = arith.addf %67, %0 : vector<40x40xf32>
    %cst_33 = arith.constant dense<0xFF800000> : vector<40xf32>
    %69 = vector.multi_reduction <maximumf>, %68, %cst_33 [1] : vector<40x40xf32> to vector<40xf32>
    %70 = vector.shape_cast %69 : vector<40xf32> to vector<40x1xf32>
    %71 = vector.broadcast %70 : vector<40x1xf32> to vector<40x40xf32>
    %72 = arith.subf %68, %71 : vector<40x40xf32>
    %73 = math.exp %72 : vector<40x40xf32>
    %cst_34 = arith.constant dense<0.000000e+00> : vector<40xf32>
    %74 = vector.multi_reduction <add>, %73, %cst_34 [1] : vector<40x40xf32> to vector<40xf32>
    %75 = vector.shape_cast %74 : vector<40xf32> to vector<40x1xf32>
    %76 = tpu.reciprocal %75 {approx = true} : vector<40x1xf32> -> vector<40x1xf32>
    %77 = vector.broadcast %76 : vector<40x1xf32> to vector<40x40xf32>
    %78 = arith.mulf %73, %77 : vector<40x40xf32>
    %79 = arith.truncf %78 : vector<40x40xf32> to vector<40x40xbf16>
    %cst_35 = arith.constant dense<0.000000e+00> : vector<40x8xf32>
    %80 = tpu.matmul %79, %64, %cst_35 {dimension_numbers = #tpu.dot_dimension_numbers<[1], [0], [0], [1], [0, 0, 1, 1], [], []>} : vector<40x40xbf16>, vector<40x8xbf16>, vector<40x8xf32> -> vector<40x8xf32>
    %81 = arith.truncf %80 : vector<40x8xf32> to vector<40x8xbf16>
    %c0_36 = arith.constant 0 : index
    %c2 = arith.constant 2 : index
    %c0_37 = arith.constant 0 : index
    %c0_38 = arith.constant 0 : index
    %82 = vector.load %arg7[%c0_36, %c2, %c0_37, %c0_38] : memref<2x4x8x32xbf16, #tpu.memory_space<vmem>>, vector<1x1x8x32xbf16>
    %83 = vector.shape_cast %82 : vector<1x1x8x32xbf16> to vector<8x32xbf16>
    %cst_39 = arith.constant dense<0.000000e+00> : vector<40x32xf32>
    %84 = tpu.matmul %81, %83, %cst_39 {dimension_numbers = #tpu.dot_dimension_numbers<[1], [0], [0], [1], [0, 0, 1, 1], [], []>} : vector<40x8xbf16>, vector<8x32xbf16>, vector<40x32xf32> -> vector<40x32xf32>
    %85 = arith.addf %61, %84 : vector<40x32xf32>
    %86 = vector.extract_strided_slice %12 {offsets = [0, 24], sizes = [40, 8], strides = [1, 1]} : vector<40x96xbf16> to vector<40x8xbf16>
    %87 = vector.extract_strided_slice %12 {offsets = [0, 56], sizes = [40, 8], strides = [1, 1]} : vector<40x96xbf16> to vector<40x8xbf16>
    %88 = vector.extract_strided_slice %12 {offsets = [0, 88], sizes = [40, 8], strides = [1, 1]} : vector<40x96xbf16> to vector<40x8xbf16>
    "tpu.trace_start"() <{level = 10 : i32, message = "qe,ke->qk"}> : () -> ()
    %cst_40 = arith.constant dense<0.000000e+00> : vector<40x40xf32>
    %89 = tpu.matmul %86, %87, %cst_40 {dimension_numbers = #tpu.dot_dimension_numbers<[1], [1], [0], [0], [0, 0, 1, 0], [], []>} : vector<40x8xbf16>, vector<40x8xbf16>, vector<40x40xf32> -> vector<40x40xf32>
    "tpu.trace_stop"() : () -> ()
    %cst_41 = arith.constant 0.353553385 : f32
    %90 = vector.broadcast %cst_41 : f32 to vector<40x40xf32>
    %91 = arith.mulf %89, %90 : vector<40x40xf32>
    %92 = arith.addf %91, %0 : vector<40x40xf32>
    %cst_42 = arith.constant dense<0xFF800000> : vector<40xf32>
    %93 = vector.multi_reduction <maximumf>, %92, %cst_42 [1] : vector<40x40xf32> to vector<40xf32>
    %94 = vector.shape_cast %93 : vector<40xf32> to vector<40x1xf32>
    %95 = vector.broadcast %94 : vector<40x1xf32> to vector<40x40xf32>
    %96 = arith.subf %92, %95 : vector<40x40xf32>
    %97 = math.exp %96 : vector<40x40xf32>
    %cst_43 = arith.constant dense<0.000000e+00> : vector<40xf32>
    %98 = vector.multi_reduction <add>, %97, %cst_43 [1] : vector<40x40xf32> to vector<40xf32>
    %99 = vector.shape_cast %98 : vector<40xf32> to vector<40x1xf32>
    %100 = tpu.reciprocal %99 {approx = true} : vector<40x1xf32> -> vector<40x1xf32>
    %101 = vector.broadcast %100 : vector<40x1xf32> to vector<40x40xf32>
    %102 = arith.mulf %97, %101 : vector<40x40xf32>
    %103 = arith.truncf %102 : vector<40x40xf32> to vector<40x40xbf16>
    %cst_44 = arith.constant dense<0.000000e+00> : vector<40x8xf32>
    %104 = tpu.matmul %103, %88, %cst_44 {dimension_numbers = #tpu.dot_dimension_numbers<[1], [0], [0], [1], [0, 0, 1, 1], [], []>} : vector<40x40xbf16>, vector<40x8xbf16>, vector<40x8xf32> -> vector<40x8xf32>
    %105 = arith.truncf %104 : vector<40x8xf32> to vector<40x8xbf16>
    %c0_45 = arith.constant 0 : index
    %c3 = arith.constant 3 : index
    %c0_46 = arith.constant 0 : index
    %c0_47 = arith.constant 0 : index
    %106 = vector.load %arg7[%c0_45, %c3, %c0_46, %c0_47] : memref<2x4x8x32xbf16, #tpu.memory_space<vmem>>, vector<1x1x8x32xbf16>
    %107 = vector.shape_cast %106 : vector<1x1x8x32xbf16> to vector<8x32xbf16>
    %cst_48 = arith.constant dense<0.000000e+00> : vector<40x32xf32>
    %108 = tpu.matmul %105, %107, %cst_48 {dimension_numbers = #tpu.dot_dimension_numbers<[1], [0], [0], [1], [0, 0, 1, 1], [], []>} : vector<40x8xbf16>, vector<8x32xbf16>, vector<40x32xf32> -> vector<40x32xf32>
    %109 = arith.addf %85, %108 : vector<40x32xf32>
    %c0_49 = arith.constant 0 : index
    %c0_50 = arith.constant 0 : index
    %c0_51 = arith.constant 0 : index
    %110 = vector.load %arg8[%c0_49, %c0_50, %c0_51] : memref<2x1x32xf32, #tpu.memory_space<vmem>>, vector<1x1x32xf32>
    %111 = vector.shape_cast %110 : vector<1x1x32xf32> to vector<1x32xf32>
    %112 = vector.broadcast %111 : vector<1x32xf32> to vector<40x32xf32>
    %113 = arith.addf %109, %112 : vector<40x32xf32>
    %114 = arith.addf %3, %113 : vector<40x32xf32>
    %c0_52 = arith.constant 0 : index
    %c0_53 = arith.constant 0 : index
    %c0_54 = arith.constant 0 : index
    %115 = vector.load %arg13[%c0_52, %c0_53, %c0_54] : memref<2x1x32xf32, #tpu.memory_space<vmem>>, vector<1x1x32xf32>
    %116 = vector.shape_cast %115 : vector<1x1x32xf32> to vector<1x32xf32>
    %c0_55 = arith.constant 0 : index
    %c0_56 = arith.constant 0 : index
    %c0_57 = arith.constant 0 : index
    %117 = vector.load %arg14[%c0_55, %c0_56, %c0_57] : memref<2x1x32xf32, #tpu.memory_space<vmem>>, vector<1x1x32xf32>
    %118 = vector.shape_cast %117 : vector<1x1x32xf32> to vector<1x32xf32>
    %cst_58 = arith.constant dense<0.000000e+00> : vector<40xf32>
    %119 = vector.multi_reduction <add>, %114, %cst_58 [1] : vector<40x32xf32> to vector<40xf32>
    %120 = vector.shape_cast %119 : vector<40xf32> to vector<40x1xf32>
    %cst_59 = arith.constant 3.200000e+01 : f32
    %121 = vector.broadcast %cst_59 : f32 to vector<40x1xf32>
    %122 = arith.divf %120, %121 : vector<40x1xf32>
    %123 = vector.broadcast %122 : vector<40x1xf32> to vector<40x32xf32>
    %124 = arith.subf %114, %123 : vector<40x32xf32>
    %125 = arith.mulf %124, %124 : vector<40x32xf32>
    %cst_60 = arith.constant dense<0.000000e+00> : vector<40xf32>
    %126 = vector.multi_reduction <add>, %125, %cst_60 [1] : vector<40x32xf32> to vector<40xf32>
    %127 = vector.shape_cast %126 : vector<40xf32> to vector<40x1xf32>
    %cst_61 = arith.constant 3.200000e+01 : f32
    %128 = vector.broadcast %cst_61 : f32 to vector<40x1xf32>
    %129 = arith.divf %127, %128 : vector<40x1xf32>
    %130 = vector.broadcast %122 : vector<40x1xf32> to vector<40x32xf32>
    %131 = arith.subf %114, %130 : vector<40x32xf32>
    %cst_62 = arith.constant 9.99999974E-6 : f32
    %132 = vector.broadcast %cst_62 : f32 to vector<40x1xf32>
    %133 = arith.addf %129, %132 : vector<40x1xf32>
    %134 = math.rsqrt %133 : vector<40x1xf32>
    %135 = vector.broadcast %134 : vector<40x1xf32> to vector<40x32xf32>
    %136 = arith.mulf %131, %135 : vector<40x32xf32>
    %137 = vector.broadcast %116 : vector<1x32xf32> to vector<40x32xf32>
    %138 = arith.mulf %136, %137 : vector<40x32xf32>
    %139 = vector.broadcast %118 : vector<1x32xf32> to vector<40x32xf32>
    %140 = arith.addf %138, %139 : vector<40x32xf32>
    %141 = arith.truncf %140 : vector<40x32xf32> to vector<40x32xbf16>
    %c0_63 = arith.constant 0 : index
    %c0_64 = arith.constant 0 : index
    %c0_65 = arith.constant 0 : index
    %142 = vector.load %arg9[%c0_63, %c0_64, %c0_65] : memref<2x32x64xbf16, #tpu.memory_space<vmem>>, vector<1x32x64xbf16>
    %143 = vector.shape_cast %142 : vector<1x32x64xbf16> to vector<32x64xbf16>
    %cst_66 = arith.constant dense<0.000000e+00> : vector<40x64xf32>
    %144 = tpu.matmul %141, %143, %cst_66 {dimension_numbers = #tpu.dot_dimension_numbers<[1], [0], [0], [1], [0, 0, 1, 1], [], []>} : vector<40x32xbf16>, vector<32x64xbf16>, vector<40x64xf32> -> vector<40x64xf32>
    %c0_67 = arith.constant 0 : index
    %c0_68 = arith.constant 0 : index
    %c0_69 = arith.constant 0 : index
    %145 = vector.load %arg10[%c0_67, %c0_68, %c0_69] : memref<2x1x64xf32, #tpu.memory_space<vmem>>, vector<1x1x64xf32>
    %146 = vector.shape_cast %145 : vector<1x1x64xf32> to vector<1x64xf32>
    %147 = vector.broadcast %146 : vector<1x64xf32> to vector<40x64xf32>
    %148 = arith.addf %144, %147 : vector<40x64xf32>
    %cst_70 = arith.constant 0.000000e+00 : f32
    %149 = vector.broadcast %cst_70 : f32 to vector<40x64xf32>
    %150 = arith.maximumf %148, %149 : vector<40x64xf32>
    %151 = arith.truncf %150 : vector<40x64xf32> to vector<40x64xbf16>
    %c0_71 = arith.constant 0 : index
    %c0_72 = arith.constant 0 : index
    %c0_73 = arith.constant 0 : index
    %152 = vector.load %arg11[%c0_71, %c0_72, %c0_73] : memref<2x64x32xbf16, #tpu.memory_space<vmem>>, vector<1x64x32xbf16>
    %153 = vector.shape_cast %152 : vector<1x64x32xbf16> to vector<64x32xbf16>
    %cst_74 = arith.constant dense<0.000000e+00> : vector<40x32xf32>
    %154 = tpu.matmul %151, %153, %cst_74 {dimension_numbers = #tpu.dot_dimension_numbers<[1], [0], [0], [1], [0, 0, 1, 1], [], []>} : vector<40x64xbf16>, vector<64x32xbf16>, vector<40x32xf32> -> vector<40x32xf32>
    %c0_75 = arith.constant 0 : index
    %c0_76 = arith.constant 0 : index
    %c0_77 = arith.constant 0 : index
    %155 = vector.load %arg12[%c0_75, %c0_76, %c0_77] : memref<2x1x32xf32, #tpu.memory_space<vmem>>, vector<1x1x32xf32>
    %156 = vector.shape_cast %155 : vector<1x1x32xf32> to vector<1x32xf32>
    %157 = vector.broadcast %156 : vector<1x32xf32> to vector<40x32xf32>
    %158 = arith.addf %154, %157 : vector<40x32xf32>
    %159 = arith.addf %140, %158 : vector<40x32xf32>
    %c0_78 = arith.constant 0 : index
    %c0_79 = arith.constant 0 : index
    %c0_80 = arith.constant 0 : index
    %160 = vector.load %arg15[%c0_78, %c0_79, %c0_80] : memref<2x1x32xf32, #tpu.memory_space<vmem>>, vector<1x1x32xf32>
    %161 = vector.shape_cast %160 : vector<1x1x32xf32> to vector<1x32xf32>
    %c0_81 = arith.constant 0 : index
    %c0_82 = arith.constant 0 : index
    %c0_83 = arith.constant 0 : index
    %162 = vector.load %arg16[%c0_81, %c0_82, %c0_83] : memref<2x1x32xf32, #tpu.memory_space<vmem>>, vector<1x1x32xf32>
    %163 = vector.shape_cast %162 : vector<1x1x32xf32> to vector<1x32xf32>
    %cst_84 = arith.constant dense<0.000000e+00> : vector<40xf32>
    %164 = vector.multi_reduction <add>, %159, %cst_84 [1] : vector<40x32xf32> to vector<40xf32>
    %165 = vector.shape_cast %164 : vector<40xf32> to vector<40x1xf32>
    %cst_85 = arith.constant 3.200000e+01 : f32
    %166 = vector.broadcast %cst_85 : f32 to vector<40x1xf32>
    %167 = arith.divf %165, %166 : vector<40x1xf32>
    %168 = vector.broadcast %167 : vector<40x1xf32> to vector<40x32xf32>
    %169 = arith.subf %159, %168 : vector<40x32xf32>
    %170 = arith.mulf %169, %169 : vector<40x32xf32>
    %cst_86 = arith.constant dense<0.000000e+00> : vector<40xf32>
    %171 = vector.multi_reduction <add>, %170, %cst_86 [1] : vector<40x32xf32> to vector<40xf32>
    %172 = vector.shape_cast %171 : vector<40xf32> to vector<40x1xf32>
    %cst_87 = arith.constant 3.200000e+01 : f32
    %173 = vector.broadcast %cst_87 : f32 to vector<40x1xf32>
    %174 = arith.divf %172, %173 : vector<40x1xf32>
    %175 = vector.broadcast %167 : vector<40x1xf32> to vector<40x32xf32>
    %176 = arith.subf %159, %175 : vector<40x32xf32>
    %cst_88 = arith.constant 9.99999974E-6 : f32
    %177 = vector.broadcast %cst_88 : f32 to vector<40x1xf32>
    %178 = arith.addf %174, %177 : vector<40x1xf32>
    %179 = math.rsqrt %178 : vector<40x1xf32>
    %180 = vector.broadcast %179 : vector<40x1xf32> to vector<40x32xf32>
    %181 = arith.mulf %176, %180 : vector<40x32xf32>
    %182 = vector.broadcast %161 : vector<1x32xf32> to vector<40x32xf32>
    %183 = arith.mulf %181, %182 : vector<40x32xf32>
    %184 = vector.broadcast %163 : vector<1x32xf32> to vector<40x32xf32>
    %185 = arith.addf %183, %184 : vector<40x32xf32>
    %186 = arith.truncf %185 : vector<40x32xf32> to vector<40x32xbf16>
    %c1_89 = arith.constant 1 : index
    %c0_90 = arith.constant 0 : index
    %c0_91 = arith.constant 0 : index
    %187 = vector.load %arg5[%c1_89, %c0_90, %c0_91] : memref<2x32x96xbf16, #tpu.memory_space<vmem>>, vector<1x32x96xbf16>
    %188 = vector.shape_cast %187 : vector<1x32x96xbf16> to vector<32x96xbf16>
    %cst_92 = arith.constant dense<0.000000e+00> : vector<40x96xf32>
    %189 = tpu.matmul %186, %188, %cst_92 {dimension_numbers = #tpu.dot_dimension_numbers<[1], [0], [0], [1], [0, 0, 1, 1], [], []>} : vector<40x32xbf16>, vector<32x96xbf16>, vector<40x96xf32> -> vector<40x96xf32>
    %c1_93 = arith.constant 1 : index
    %c0_94 = arith.constant 0 : index
    %c0_95 = arith.constant 0 : index
    %190 = vector.load %arg6[%c1_93, %c0_94, %c0_95] : memref<2x1x96xf32, #tpu.memory_space<vmem>>, vector<1x1x96xf32>
    %191 = vector.shape_cast %190 : vector<1x1x96xf32> to vector<1x96xf32>
    %192 = vector.broadcast %191 : vector<1x96xf32> to vector<40x96xf32>
    %193 = arith.addf %189, %192 : vector<40x96xf32>
    %194 = arith.truncf %193 : vector<40x96xf32> to vector<40x96xbf16>
    %cst_96 = arith.constant 0.000000e+00 : f32
    %195 = vector.broadcast %cst_96 : f32 to vector<40x32xf32>
    %196 = vector.extract_strided_slice %194 {offsets = [0, 0], sizes = [40, 8], strides = [1, 1]} : vector<40x96xbf16> to vector<40x8xbf16>
    %197 = vector.extract_strided_slice %194 {offsets = [0, 32], sizes = [40, 8], strides = [1, 1]} : vector<40x96xbf16> to vector<40x8xbf16>
    %198 = vector.extract_strided_slice %194 {offsets = [0, 64], sizes = [40, 8], strides = [1, 1]} : vector<40x96xbf16> to vector<40x8xbf16>
    "tpu.trace_start"() <{level = 10 : i32, message = "qe,ke->qk"}> : () -> ()
    %cst_97 = arith.constant dense<0.000000e+00> : vector<40x40xf32>
    %199 = tpu.matmul %196, %197, %cst_97 {dimension_numbers = #tpu.dot_dimension_numbers<[1], [1], [0], [0], [0, 0, 1, 0], [], []>} : vector<40x8xbf16>, vector<40x8xbf16>, vector<40x40xf32> -> vector<40x40xf32>
    "tpu.trace_stop"() : () -> ()
    %cst_98 = arith.constant 0.353553385 : f32
    %200 = vector.broadcast %cst_98 : f32 to vector<40x40xf32>
    %201 = arith.mulf %199, %200 : vector<40x40xf32>
    %202 = arith.addf %201, %0 : vector<40x40xf32>
    %cst_99 = arith.constant dense<0xFF800000> : vector<40xf32>
    %203 = vector.multi_reduction <maximumf>, %202, %cst_99 [1] : vector<40x40xf32> to vector<40xf32>
    %204 = vector.shape_cast %203 : vector<40xf32> to vector<40x1xf32>
    %205 = vector.broadcast %204 : vector<40x1xf32> to vector<40x40xf32>
    %206 = arith.subf %202, %205 : vector<40x40xf32>
    %207 = math.exp %206 : vector<40x40xf32>
    %cst_100 = arith.constant dense<0.000000e+00> : vector<40xf32>
    %208 = vector.multi_reduction <add>, %207, %cst_100 [1] : vector<40x40xf32> to vector<40xf32>
    %209 = vector.shape_cast %208 : vector<40xf32> to vector<40x1xf32>
    %210 = tpu.reciprocal %209 {approx = true} : vector<40x1xf32> -> vector<40x1xf32>
    %211 = vector.broadcast %210 : vector<40x1xf32> to vector<40x40xf32>
    %212 = arith.mulf %207, %211 : vector<40x40xf32>
    %213 = arith.truncf %212 : vector<40x40xf32> to vector<40x40xbf16>
    %cst_101 = arith.constant dense<0.000000e+00> : vector<40x8xf32>
    %214 = tpu.matmul %213, %198, %cst_101 {dimension_numbers = #tpu.dot_dimension_numbers<[1], [0], [0], [1], [0, 0, 1, 1], [], []>} : vector<40x40xbf16>, vector<40x8xbf16>, vector<40x8xf32> -> vector<40x8xf32>
    %215 = arith.truncf %214 : vector<40x8xf32> to vector<40x8xbf16>
    %c1_102 = arith.constant 1 : index
    %c0_103 = arith.constant 0 : index
    %c0_104 = arith.constant 0 : index
    %c0_105 = arith.constant 0 : index
    %216 = vector.load %arg7[%c1_102, %c0_103, %c0_104, %c0_105] : memref<2x4x8x32xbf16, #tpu.memory_space<vmem>>, vector<1x1x8x32xbf16>
    %217 = vector.shape_cast %216 : vector<1x1x8x32xbf16> to vector<8x32xbf16>
    %cst_106 = arith.constant dense<0.000000e+00> : vector<40x32xf32>
    %218 = tpu.matmul %215, %217, %cst_106 {dimension_numbers = #tpu.dot_dimension_numbers<[1], [0], [0], [1], [0, 0, 1, 1], [], []>} : vector<40x8xbf16>, vector<8x32xbf16>, vector<40x32xf32> -> vector<40x32xf32>
    %219 = arith.addf %195, %218 : vector<40x32xf32>
    %220 = vector.extract_strided_slice %194 {offsets = [0, 8], sizes = [40, 8], strides = [1, 1]} : vector<40x96xbf16> to vector<40x8xbf16>
    %221 = vector.extract_strided_slice %194 {offsets = [0, 40], sizes = [40, 8], strides = [1, 1]} : vector<40x96xbf16> to vector<40x8xbf16>
    %222 = vector.extract_strided_slice %194 {offsets = [0, 72], sizes = [40, 8], strides = [1, 1]} : vector<40x96xbf16> to vector<40x8xbf16>
    "tpu.trace_start"() <{level = 10 : i32, message = "qe,ke->qk"}> : () -> ()
    %cst_107 = arith.constant dense<0.000000e+00> : vector<40x40xf32>
    %223 = tpu.matmul %220, %221, %cst_107 {dimension_numbers = #tpu.dot_dimension_numbers<[1], [1], [0], [0], [0, 0, 1, 0], [], []>} : vector<40x8xbf16>, vector<40x8xbf16>, vector<40x40xf32> -> vector<40x40xf32>
    "tpu.trace_stop"() : () -> ()
    %cst_108 = arith.constant 0.353553385 : f32
    %224 = vector.broadcast %cst_108 : f32 to vector<40x40xf32>
    %225 = arith.mulf %223, %224 : vector<40x40xf32>
    %226 = arith.addf %225, %0 : vector<40x40xf32>
    %cst_109 = arith.constant dense<0xFF800000> : vector<40xf32>
    %227 = vector.multi_reduction <maximumf>, %226, %cst_109 [1] : vector<40x40xf32> to vector<40xf32>
    %228 = vector.shape_cast %227 : vector<40xf32> to vector<40x1xf32>
    %229 = vector.broadcast %228 : vector<40x1xf32> to vector<40x40xf32>
    %230 = arith.subf %226, %229 : vector<40x40xf32>
    %231 = math.exp %230 : vector<40x40xf32>
    %cst_110 = arith.constant dense<0.000000e+00> : vector<40xf32>
    %232 = vector.multi_reduction <add>, %231, %cst_110 [1] : vector<40x40xf32> to vector<40xf32>
    %233 = vector.shape_cast %232 : vector<40xf32> to vector<40x1xf32>
    %234 = tpu.reciprocal %233 {approx = true} : vector<40x1xf32> -> vector<40x1xf32>
    %235 = vector.broadcast %234 : vector<40x1xf32> to vector<40x40xf32>
    %236 = arith.mulf %231, %235 : vector<40x40xf32>
    %237 = arith.truncf %236 : vector<40x40xf32> to vector<40x40xbf16>
    %cst_111 = arith.constant dense<0.000000e+00> : vector<40x8xf32>
    %238 = tpu.matmul %237, %222, %cst_111 {dimension_numbers = #tpu.dot_dimension_numbers<[1], [0], [0], [1], [0, 0, 1, 1], [], []>} : vector<40x40xbf16>, vector<40x8xbf16>, vector<40x8xf32> -> vector<40x8xf32>
    %239 = arith.truncf %238 : vector<40x8xf32> to vector<40x8xbf16>
    %c1_112 = arith.constant 1 : index
    %c1_113 = arith.constant 1 : index
    %c0_114 = arith.constant 0 : index
    %c0_115 = arith.constant 0 : index
    %240 = vector.load %arg7[%c1_112, %c1_113, %c0_114, %c0_115] : memref<2x4x8x32xbf16, #tpu.memory_space<vmem>>, vector<1x1x8x32xbf16>
    %241 = vector.shape_cast %240 : vector<1x1x8x32xbf16> to vector<8x32xbf16>
    %cst_116 = arith.constant dense<0.000000e+00> : vector<40x32xf32>
    %242 = tpu.matmul %239, %241, %cst_116 {dimension_numbers = #tpu.dot_dimension_numbers<[1], [0], [0], [1], [0, 0, 1, 1], [], []>} : vector<40x8xbf16>, vector<8x32xbf16>, vector<40x32xf32> -> vector<40x32xf32>
    %243 = arith.addf %219, %242 : vector<40x32xf32>
    %244 = vector.extract_strided_slice %194 {offsets = [0, 16], sizes = [40, 8], strides = [1, 1]} : vector<40x96xbf16> to vector<40x8xbf16>
    %245 = vector.extract_strided_slice %194 {offsets = [0, 48], sizes = [40, 8], strides = [1, 1]} : vector<40x96xbf16> to vector<40x8xbf16>
    %246 = vector.extract_strided_slice %194 {offsets = [0, 80], sizes = [40, 8], strides = [1, 1]} : vector<40x96xbf16> to vector<40x8xbf16>
    "tpu.trace_start"() <{level = 10 : i32, message = "qe,ke->qk"}> : () -> ()
    %cst_117 = arith.constant dense<0.000000e+00> : vector<40x40xf32>
    %247 = tpu.matmul %244, %245, %cst_117 {dimension_numbers = #tpu.dot_dimension_numbers<[1], [1], [0], [0], [0, 0, 1, 0], [], []>} : vector<40x8xbf16>, vector<40x8xbf16>, vector<40x40xf32> -> vector<40x40xf32>
    "tpu.trace_stop"() : () -> ()
    %cst_118 = arith.constant 0.353553385 : f32
    %248 = vector.broadcast %cst_118 : f32 to vector<40x40xf32>
    %249 = arith.mulf %247, %248 : vector<40x40xf32>
    %250 = arith.addf %249, %0 : vector<40x40xf32>
    %cst_119 = arith.constant dense<0xFF800000> : vector<40xf32>
    %251 = vector.multi_reduction <maximumf>, %250, %cst_119 [1] : vector<40x40xf32> to vector<40xf32>
    %252 = vector.shape_cast %251 : vector<40xf32> to vector<40x1xf32>
    %253 = vector.broadcast %252 : vector<40x1xf32> to vector<40x40xf32>
    %254 = arith.subf %250, %253 : vector<40x40xf32>
    %255 = math.exp %254 : vector<40x40xf32>
    %cst_120 = arith.constant dense<0.000000e+00> : vector<40xf32>
    %256 = vector.multi_reduction <add>, %255, %cst_120 [1] : vector<40x40xf32> to vector<40xf32>
    %257 = vector.shape_cast %256 : vector<40xf32> to vector<40x1xf32>
    %258 = tpu.reciprocal %257 {approx = true} : vector<40x1xf32> -> vector<40x1xf32>
    %259 = vector.broadcast %258 : vector<40x1xf32> to vector<40x40xf32>
    %260 = arith.mulf %255, %259 : vector<40x40xf32>
    %261 = arith.truncf %260 : vector<40x40xf32> to vector<40x40xbf16>
    %cst_121 = arith.constant dense<0.000000e+00> : vector<40x8xf32>
    %262 = tpu.matmul %261, %246, %cst_121 {dimension_numbers = #tpu.dot_dimension_numbers<[1], [0], [0], [1], [0, 0, 1, 1], [], []>} : vector<40x40xbf16>, vector<40x8xbf16>, vector<40x8xf32> -> vector<40x8xf32>
    %263 = arith.truncf %262 : vector<40x8xf32> to vector<40x8xbf16>
    %c1_122 = arith.constant 1 : index
    %c2_123 = arith.constant 2 : index
    %c0_124 = arith.constant 0 : index
    %c0_125 = arith.constant 0 : index
    %264 = vector.load %arg7[%c1_122, %c2_123, %c0_124, %c0_125] : memref<2x4x8x32xbf16, #tpu.memory_space<vmem>>, vector<1x1x8x32xbf16>
    %265 = vector.shape_cast %264 : vector<1x1x8x32xbf16> to vector<8x32xbf16>
    %cst_126 = arith.constant dense<0.000000e+00> : vector<40x32xf32>
    %266 = tpu.matmul %263, %265, %cst_126 {dimension_numbers = #tpu.dot_dimension_numbers<[1], [0], [0], [1], [0, 0, 1, 1], [], []>} : vector<40x8xbf16>, vector<8x32xbf16>, vector<40x32xf32> -> vector<40x32xf32>
    %267 = arith.addf %243, %266 : vector<40x32xf32>
    %268 = vector.extract_strided_slice %194 {offsets = [0, 24], sizes = [40, 8], strides = [1, 1]} : vector<40x96xbf16> to vector<40x8xbf16>
    %269 = vector.extract_strided_slice %194 {offsets = [0, 56], sizes = [40, 8], strides = [1, 1]} : vector<40x96xbf16> to vector<40x8xbf16>
    %270 = vector.extract_strided_slice %194 {offsets = [0, 88], sizes = [40, 8], strides = [1, 1]} : vector<40x96xbf16> to vector<40x8xbf16>
    "tpu.trace_start"() <{level = 10 : i32, message = "qe,ke->qk"}> : () -> ()
    %cst_127 = arith.constant dense<0.000000e+00> : vector<40x40xf32>
    %271 = tpu.matmul %268, %269, %cst_127 {dimension_numbers = #tpu.dot_dimension_numbers<[1], [1], [0], [0], [0, 0, 1, 0], [], []>} : vector<40x8xbf16>, vector<40x8xbf16>, vector<40x40xf32> -> vector<40x40xf32>
    "tpu.trace_stop"() : () -> ()
    %cst_128 = arith.constant 0.353553385 : f32
    %272 = vector.broadcast %cst_128 : f32 to vector<40x40xf32>
    %273 = arith.mulf %271, %272 : vector<40x40xf32>
    %274 = arith.addf %273, %0 : vector<40x40xf32>
    %cst_129 = arith.constant dense<0xFF800000> : vector<40xf32>
    %275 = vector.multi_reduction <maximumf>, %274, %cst_129 [1] : vector<40x40xf32> to vector<40xf32>
    %276 = vector.shape_cast %275 : vector<40xf32> to vector<40x1xf32>
    %277 = vector.broadcast %276 : vector<40x1xf32> to vector<40x40xf32>
    %278 = arith.subf %274, %277 : vector<40x40xf32>
    %279 = math.exp %278 : vector<40x40xf32>
    %cst_130 = arith.constant dense<0.000000e+00> : vector<40xf32>
    %280 = vector.multi_reduction <add>, %279, %cst_130 [1] : vector<40x40xf32> to vector<40xf32>
    %281 = vector.shape_cast %280 : vector<40xf32> to vector<40x1xf32>
    %282 = tpu.reciprocal %281 {approx = true} : vector<40x1xf32> -> vector<40x1xf32>
    %283 = vector.broadcast %282 : vector<40x1xf32> to vector<40x40xf32>
    %284 = arith.mulf %279, %283 : vector<40x40xf32>
    %285 = arith.truncf %284 : vector<40x40xf32> to vector<40x40xbf16>
    %cst_131 = arith.constant dense<0.000000e+00> : vector<40x8xf32>
    %286 = tpu.matmul %285, %270, %cst_131 {dimension_numbers = #tpu.dot_dimension_numbers<[1], [0], [0], [1], [0, 0, 1, 1], [], []>} : vector<40x40xbf16>, vector<40x8xbf16>, vector<40x8xf32> -> vector<40x8xf32>
    %287 = arith.truncf %286 : vector<40x8xf32> to vector<40x8xbf16>
    %c1_132 = arith.constant 1 : index
    %c3_133 = arith.constant 3 : index
    %c0_134 = arith.constant 0 : index
    %c0_135 = arith.constant 0 : index
    %288 = vector.load %arg7[%c1_132, %c3_133, %c0_134, %c0_135] : memref<2x4x8x32xbf16, #tpu.memory_space<vmem>>, vector<1x1x8x32xbf16>
    %289 = vector.shape_cast %288 : vector<1x1x8x32xbf16> to vector<8x32xbf16>
    %cst_136 = arith.constant dense<0.000000e+00> : vector<40x32xf32>
    %290 = tpu.matmul %287, %289, %cst_136 {dimension_numbers = #tpu.dot_dimension_numbers<[1], [0], [0], [1], [0, 0, 1, 1], [], []>} : vector<40x8xbf16>, vector<8x32xbf16>, vector<40x32xf32> -> vector<40x32xf32>
    %291 = arith.addf %267, %290 : vector<40x32xf32>
    %c1_137 = arith.constant 1 : index
    %c0_138 = arith.constant 0 : index
    %c0_139 = arith.constant 0 : index
    %292 = vector.load %arg8[%c1_137, %c0_138, %c0_139] : memref<2x1x32xf32, #tpu.memory_space<vmem>>, vector<1x1x32xf32>
    %293 = vector.shape_cast %292 : vector<1x1x32xf32> to vector<1x32xf32>
    %294 = vector.broadcast %293 : vector<1x32xf32> to vector<40x32xf32>
    %295 = arith.addf %291, %294 : vector<40x32xf32>
    %296 = arith.addf %185, %295 : vector<40x32xf32>
    %c1_140 = arith.constant 1 : index
    %c0_141 = arith.constant 0 : index
    %c0_142 = arith.constant 0 : index
    %297 = vector.load %arg13[%c1_140, %c0_141, %c0_142] : memref<2x1x32xf32, #tpu.memory_space<vmem>>, vector<1x1x32xf32>
    %298 = vector.shape_cast %297 : vector<1x1x32xf32> to vector<1x32xf32>
    %c1_143 = arith.constant 1 : index
    %c0_144 = arith.constant 0 : index
    %c0_145 = arith.constant 0 : index
    %299 = vector.load %arg14[%c1_143, %c0_144, %c0_145] : memref<2x1x32xf32, #tpu.memory_space<vmem>>, vector<1x1x32xf32>
    %300 = vector.shape_cast %299 : vector<1x1x32xf32> to vector<1x32xf32>
    %cst_146 = arith.constant dense<0.000000e+00> : vector<40xf32>
    %301 = vector.multi_reduction <add>, %296, %cst_146 [1] : vector<40x32xf32> to vector<40xf32>
    %302 = vector.shape_cast %301 : vector<40xf32> to vector<40x1xf32>
    %cst_147 = arith.constant 3.200000e+01 : f32
    %303 = vector.broadcast %cst_147 : f32 to vector<40x1xf32>
    %304 = arith.divf %302, %303 : vector<40x1xf32>
    %305 = vector.broadcast %304 : vector<40x1xf32> to vector<40x32xf32>
    %306 = arith.subf %296, %305 : vector<40x32xf32>
    %307 = arith.mulf %306, %306 : vector<40x32xf32>
    %cst_148 = arith.constant dense<0.000000e+00> : vector<40xf32>
    %308 = vector.multi_reduction <add>, %307, %cst_148 [1] : vector<40x32xf32> to vector<40xf32>
    %309 = vector.shape_cast %308 : vector<40xf32> to vector<40x1xf32>
    %cst_149 = arith.constant 3.200000e+01 : f32
    %310 = vector.broadcast %cst_149 : f32 to vector<40x1xf32>
    %311 = arith.divf %309, %310 : vector<40x1xf32>
    %312 = vector.broadcast %304 : vector<40x1xf32> to vector<40x32xf32>
    %313 = arith.subf %296, %312 : vector<40x32xf32>
    %cst_150 = arith.constant 9.99999974E-6 : f32
    %314 = vector.broadcast %cst_150 : f32 to vector<40x1xf32>
    %315 = arith.addf %311, %314 : vector<40x1xf32>
    %316 = math.rsqrt %315 : vector<40x1xf32>
    %317 = vector.broadcast %316 : vector<40x1xf32> to vector<40x32xf32>
    %318 = arith.mulf %313, %317 : vector<40x32xf32>
    %319 = vector.broadcast %298 : vector<1x32xf32> to vector<40x32xf32>
    %320 = arith.mulf %318, %319 : vector<40x32xf32>
    %321 = vector.broadcast %300 : vector<1x32xf32> to vector<40x32xf32>
    %322 = arith.addf %320, %321 : vector<40x32xf32>
    %323 = arith.truncf %322 : vector<40x32xf32> to vector<40x32xbf16>
    %c1_151 = arith.constant 1 : index
    %c0_152 = arith.constant 0 : index
    %c0_153 = arith.constant 0 : index
    %324 = vector.load %arg9[%c1_151, %c0_152, %c0_153] : memref<2x32x64xbf16, #tpu.memory_space<vmem>>, vector<1x32x64xbf16>
    %325 = vector.shape_cast %324 : vector<1x32x64xbf16> to vector<32x64xbf16>
    %cst_154 = arith.constant dense<0.000000e+00> : vector<40x64xf32>
    %326 = tpu.matmul %323, %325, %cst_154 {dimension_numbers = #tpu.dot_dimension_numbers<[1], [0], [0], [1], [0, 0, 1, 1], [], []>} : vector<40x32xbf16>, vector<32x64xbf16>, vector<40x64xf32> -> vector<40x64xf32>
    %c1_155 = arith.constant 1 : index
    %c0_156 = arith.constant 0 : index
    %c0_157 = arith.constant 0 : index
    %327 = vector.load %arg10[%c1_155, %c0_156, %c0_157] : memref<2x1x64xf32, #tpu.memory_space<vmem>>, vector<1x1x64xf32>
    %328 = vector.shape_cast %327 : vector<1x1x64xf32> to vector<1x64xf32>
    %329 = vector.broadcast %328 : vector<1x64xf32> to vector<40x64xf32>
    %330 = arith.addf %326, %329 : vector<40x64xf32>
    %cst_158 = arith.constant 0.000000e+00 : f32
    %331 = vector.broadcast %cst_158 : f32 to vector<40x64xf32>
    %332 = arith.maximumf %330, %331 : vector<40x64xf32>
    %333 = arith.truncf %332 : vector<40x64xf32> to vector<40x64xbf16>
    %c1_159 = arith.constant 1 : index
    %c0_160 = arith.constant 0 : index
    %c0_161 = arith.constant 0 : index
    %334 = vector.load %arg11[%c1_159, %c0_160, %c0_161] : memref<2x64x32xbf16, #tpu.memory_space<vmem>>, vector<1x64x32xbf16>
    %335 = vector.shape_cast %334 : vector<1x64x32xbf16> to vector<64x32xbf16>
    %cst_162 = arith.constant dense<0.000000e+00> : vector<40x32xf32>
    %336 = tpu.matmul %333, %335, %cst_162 {dimension_numbers = #tpu.dot_dimension_numbers<[1], [0], [0], [1], [0, 0, 1, 1], [], []>} : vector<40x64xbf16>, vector<64x32xbf16>, vector<40x32xf32> -> vector<40x32xf32>
    %c1_163 = arith.constant 1 : index
    %c0_164 = arith.constant 0 : index
    %c0_165 = arith.constant 0 : index
    %337 = vector.load %arg12[%c1_163, %c0_164, %c0_165] : memref<2x1x32xf32, #tpu.memory_space<vmem>>, vector<1x1x32xf32>
    %338 = vector.shape_cast %337 : vector<1x1x32xf32> to vector<1x32xf32>
    %339 = vector.broadcast %338 : vector<1x32xf32> to vector<40x32xf32>
    %340 = arith.addf %336, %339 : vector<40x32xf32>
    %341 = arith.addf %322, %340 : vector<40x32xf32>
    %c1_166 = arith.constant 1 : index
    %c0_167 = arith.constant 0 : index
    %c0_168 = arith.constant 0 : index
    %342 = vector.load %arg15[%c1_166, %c0_167, %c0_168] : memref<2x1x32xf32, #tpu.memory_space<vmem>>, vector<1x1x32xf32>
    %343 = vector.shape_cast %342 : vector<1x1x32xf32> to vector<1x32xf32>
    %c1_169 = arith.constant 1 : index
    %c0_170 = arith.constant 0 : index
    %c0_171 = arith.constant 0 : index
    %344 = vector.load %arg16[%c1_169, %c0_170, %c0_171] : memref<2x1x32xf32, #tpu.memory_space<vmem>>, vector<1x1x32xf32>
    %345 = vector.shape_cast %344 : vector<1x1x32xf32> to vector<1x32xf32>
    %cst_172 = arith.constant dense<0.000000e+00> : vector<40xf32>
    %346 = vector.multi_reduction <add>, %341, %cst_172 [1] : vector<40x32xf32> to vector<40xf32>
    %347 = vector.shape_cast %346 : vector<40xf32> to vector<40x1xf32>
    %cst_173 = arith.constant 3.200000e+01 : f32
    %348 = vector.broadcast %cst_173 : f32 to vector<40x1xf32>
    %349 = arith.divf %347, %348 : vector<40x1xf32>
    %350 = vector.broadcast %349 : vector<40x1xf32> to vector<40x32xf32>
    %351 = arith.subf %341, %350 : vector<40x32xf32>
    %352 = arith.mulf %351, %351 : vector<40x32xf32>
    %cst_174 = arith.constant dense<0.000000e+00> : vector<40xf32>
    %353 = vector.multi_reduction <add>, %352, %cst_174 [1] : vector<40x32xf32> to vector<40xf32>
    %354 = vector.shape_cast %353 : vector<40xf32> to vector<40x1xf32>
    %cst_175 = arith.constant 3.200000e+01 : f32
    %355 = vector.broadcast %cst_175 : f32 to vector<40x1xf32>
    %356 = arith.divf %354, %355 : vector<40x1xf32>
    %357 = vector.broadcast %349 : vector<40x1xf32> to vector<40x32xf32>
    %358 = arith.subf %341, %357 : vector<40x32xf32>
    %cst_176 = arith.constant 9.99999974E-6 : f32
    %359 = vector.broadcast %cst_176 : f32 to vector<40x1xf32>
    %360 = arith.addf %356, %359 : vector<40x1xf32>
    %361 = math.rsqrt %360 : vector<40x1xf32>
    %362 = vector.broadcast %361 : vector<40x1xf32> to vector<40x32xf32>
    %363 = arith.mulf %358, %362 : vector<40x32xf32>
    %364 = vector.broadcast %343 : vector<1x32xf32> to vector<40x32xf32>
    %365 = arith.mulf %363, %364 : vector<40x32xf32>
    %366 = vector.broadcast %345 : vector<1x32xf32> to vector<40x32xf32>
    %367 = arith.addf %365, %366 : vector<40x32xf32>
    %c0_177 = arith.constant 0 : index
    %c0_178 = arith.constant 0 : index
    %368 = vector.load %arg3[%c0_177, %c0_178] : memref<8x40xbf16, #tpu.memory_space<vmem>>, vector<8x40xbf16>
    %369 = arith.truncf %367 : vector<40x32xf32> to vector<40x32xbf16>
    %cst_179 = arith.constant dense<0.000000e+00> : vector<8x32xf32>
    %370 = tpu.matmul %368, %369, %cst_179 {dimension_numbers = #tpu.dot_dimension_numbers<[1], [0], [0], [1], [0, 0, 1, 1], [], []>} : vector<8x40xbf16>, vector<40x32xbf16>, vector<8x32xf32> -> vector<8x32xf32>
    %c0_180 = arith.constant 0 : index
    %c0_181 = arith.constant 0 : index
    %371 = vector.load %arg17[%c0_180, %c0_181] : memref<1x32xf32, #tpu.memory_space<vmem>>, vector<1x32xf32>
    %c0_182 = arith.constant 0 : index
    %c0_183 = arith.constant 0 : index
    %372 = vector.load %arg18[%c0_182, %c0_183] : memref<1x32xf32, #tpu.memory_space<vmem>>, vector<1x32xf32>
    %cst_184 = arith.constant dense<0.000000e+00> : vector<8xf32>
    %373 = vector.multi_reduction <add>, %370, %cst_184 [1] : vector<8x32xf32> to vector<8xf32>
    %374 = vector.shape_cast %373 : vector<8xf32> to vector<8x1xf32>
    %cst_185 = arith.constant 3.200000e+01 : f32
    %375 = vector.broadcast %cst_185 : f32 to vector<8x1xf32>
    %376 = arith.divf %374, %375 : vector<8x1xf32>
    %377 = vector.broadcast %376 : vector<8x1xf32> to vector<8x32xf32>
    %378 = arith.subf %370, %377 : vector<8x32xf32>
    %379 = arith.mulf %378, %378 : vector<8x32xf32>
    %cst_186 = arith.constant dense<0.000000e+00> : vector<8xf32>
    %380 = vector.multi_reduction <add>, %379, %cst_186 [1] : vector<8x32xf32> to vector<8xf32>
    %381 = vector.shape_cast %380 : vector<8xf32> to vector<8x1xf32>
    %cst_187 = arith.constant 3.200000e+01 : f32
    %382 = vector.broadcast %cst_187 : f32 to vector<8x1xf32>
    %383 = arith.divf %381, %382 : vector<8x1xf32>
    %384 = vector.broadcast %376 : vector<8x1xf32> to vector<8x32xf32>
    %385 = arith.subf %370, %384 : vector<8x32xf32>
    %cst_188 = arith.constant 9.99999974E-6 : f32
    %386 = vector.broadcast %cst_188 : f32 to vector<8x1xf32>
    %387 = arith.addf %383, %386 : vector<8x1xf32>
    %388 = math.rsqrt %387 : vector<8x1xf32>
    %389 = vector.broadcast %388 : vector<8x1xf32> to vector<8x32xf32>
    %390 = arith.mulf %385, %389 : vector<8x32xf32>
    %391 = vector.broadcast %371 : vector<1x32xf32> to vector<8x32xf32>
    %392 = arith.mulf %390, %391 : vector<8x32xf32>
    %393 = vector.broadcast %372 : vector<1x32xf32> to vector<8x32xf32>
    %394 = arith.addf %392, %393 : vector<8x32xf32>
    %395 = arith.truncf %394 : vector<8x32xf32> to vector<8x32xbf16>
    %c0_189 = arith.constant 0 : index
    %c0_190 = arith.constant 0 : index
    %396 = vector.load %arg19[%c0_189, %c0_190] : memref<32x128xbf16, #tpu.memory_space<vmem>>, vector<32x128xbf16>
    %cst_191 = arith.constant dense<0.000000e+00> : vector<8x128xf32>
    %397 = tpu.matmul %395, %396, %cst_191 {dimension_numbers = #tpu.dot_dimension_numbers<[1], [0], [0], [1], [0, 0, 1, 1], [], []>} : vector<8x32xbf16>, vector<32x128xbf16>, vector<8x128xf32> -> vector<8x128xf32>
    %c0_192 = arith.constant 0 : index
    %c0_193 = arith.constant 0 : index
    %398 = vector.load %arg20[%c0_192, %c0_193] : memref<1x128xf32, #tpu.memory_space<vmem>>, vector<1x128xf32>
    %399 = vector.broadcast %398 : vector<1x128xf32> to vector<8x128xf32>
    %400 = arith.addf %397, %399 : vector<8x128xf32>
    %c0_194 = arith.constant 0 : index
    %c0_195 = arith.constant 0 : index
    %401 = vector.load %arg21[%c0_194, %c0_195] : memref<8x128xf32, #tpu.memory_space<vmem>>, vector<8x128xf32>
    tpu.vector_store %arg21[%c0_194, %c0_195], %400 {strides = array<i32>} : memref<8x128xf32, #tpu.memory_space<vmem>>, vector<8x128xf32>,
    return
  }
  func.func @transform_0(%arg0: i32) -> (i32, i32) {
    %c0_i32 = arith.constant 0 : i32
    %c0_i32_0 = arith.constant 0 : i32
    return %arg0, %c0_i32 : i32, i32
  }
  func.func @transform_1(%arg0: i32) -> (i32, i32) {
    %c0_i32 = arith.constant 0 : i32
    %c0_i32_0 = arith.constant 0 : i32
    %c0_i32_1 = arith.constant 0 : i32
    return %c0_i32, %c0_i32_0 : i32, i32
  }
  func.func @transform_2(%arg0: i32) -> (i32, i32) {
    %c0_i32 = arith.constant 0 : i32
    %c0_i32_0 = arith.constant 0 : i32
    %c0_i32_1 = arith.constant 0 : i32
    return %c0_i32, %c0_i32_0 : i32, i32
  }
  func.func @transform_3(%arg0: i32) -> (i32, i32) {
    %c0_i32 = arith.constant 0 : i32
    %c0_i32_0 = arith.constant 0 : i32
    %c0_i32_1 = arith.constant 0 : i32
    return %c0_i32, %c0_i32_0 : i32, i32
  }
  func.func @transform_4(%arg0: i32) -> (i32, i32, i32) {
    %c0_i32 = arith.constant 0 : i32
    %c0_i32_0 = arith.constant 0 : i32
    %c0_i32_1 = arith.constant 0 : i32
    %c0_i32_2 = arith.constant 0 : i32
    return %c0_i32, %c0_i32_0, %c0_i32_1 : i32, i32, i32
  }
  func.func @transform_5(%arg0: i32) -> (i32, i32, i32) {
    %c0_i32 = arith.constant 0 : i32
    %c0_i32_0 = arith.constant 0 : i32
    %c0_i32_1 = arith.constant 0 : i32
    %c0_i32_2 = arith.constant 0 : i32
    return %c0_i32, %c0_i32_0, %c0_i32_1 : i32, i32, i32
  }
  func.func @transform_6(%arg0: i32) -> (i32, i32, i32, i32) {
    %c0_i32 = arith.constant 0 : i32
    %c0_i32_0 = arith.constant 0 : i32
    %c0_i32_1 = arith.constant 0 : i32
    %c0_i32_2 = arith.constant 0 : i32
    %c0_i32_3 = arith.constant 0 : i32
    return %c0_i32, %c0_i32_0, %c0_i32_1, %c0_i32_2 : i32, i32, i32, i32
  }
  func.func @transform_7(%arg0: i32) -> (i32, i32, i32) {
    %c0_i32 = arith.constant 0 : i32
    %c0_i32_0 = arith.constant 0 : i32
    %c0_i32_1 = arith.constant 0 : i32
    %c0_i32_2 = arith.constant 0 : i32
    return %c0_i32, %c0_i32_0, %c0_i32_1 : i32, i32, i32
  }
  func.func @transform_8(%arg0: i32) -> (i32, i32, i32) {
    %c0_i32 = arith.constant 0 : i32
    %c0_i32_0 = arith.constant 0 : i32
    %c0_i32_1 = arith.constant 0 : i32
    %c0_i32_2 = arith.constant 0 : i32
    return %c0_i32, %c0_i32_0, %c0_i32_1 : i32, i32, i32
  }
  func.func @transform_9(%arg0: i32) -> (i32, i32, i32) {
    %c0_i32 = arith.constant 0 : i32
    %c0_i32_0 = arith.constant 0 : i32
    %c0_i32_1 = arith.constant 0 : i32
    %c0_i32_2 = arith.constant 0 : i32
    return %c0_i32, %c0_i32_0, %c0_i32_1 : i32, i32, i32
  }
  func.func @transform_10(%arg0: i32) -> (i32, i32, i32) {
    %c0_i32 = arith.constant 0 : i32
    %c0_i32_0 = arith.constant 0 : i32
    %c0_i32_1 = arith.constant 0 : i32
    %c0_i32_2 = arith.constant 0 : i32
    return %c0_i32, %c0_i32_0, %c0_i32_1 : i32, i32, i32
  }
  func.func @transform_11(%arg0: i32) -> (i32, i32, i32) {
    %c0_i32 = arith.constant 0 : i32
    %c0_i32_0 = arith.constant 0 : i32
    %c0_i32_1 = arith.constant 0 : i32
    %c0_i32_2 = arith.constant 0 : i32
    return %c0_i32, %c0_i32_0, %c0_i32_1 : i32, i32, i32
  }
  func.func @transform_12(%arg0: i32) -> (i32, i32, i32) {
    %c0_i32 = arith.constant 0 : i32
    %c0_i32_0 = arith.constant 0 : i32
    %c0_i32_1 = arith.constant 0 : i32
    %c0_i32_2 = arith.constant 0 : i32
    return %c0_i32, %c0_i32_0, %c0_i32_1 : i32, i32, i32
  }
  func.func @transform_13(%arg0: i32) -> (i32, i32, i32) {
    %c0_i32 = arith.constant 0 : i32
    %c0_i32_0 = arith.constant 0 : i32
    %c0_i32_1 = arith.constant 0 : i32
    %c0_i32_2 = arith.constant 0 : i32
    return %c0_i32, %c0_i32_0, %c0_i32_1 : i32, i32, i32
  }
  func.func @transform_14(%arg0: i32) -> (i32, i32, i32) {
    %c0_i32 = arith.constant 0 : i32
    %c0_i32_0 = arith.constant 0 : i32
    %c0_i32_1 = arith.constant 0 : i32
    %c0_i32_2 = arith.constant 0 : i32
    return %c0_i32, %c0_i32_0, %c0_i32_1 : i32, i32, i32
  }
  func.func @transform_15(%arg0: i32) -> (i32, i32, i32) {
    %c0_i32 = arith.constant 0 : i32
    %c0_i32_0 = arith.constant 0 : i32
    %c0_i32_1 = arith.constant 0 : i32
    %c0_i32_2 = arith.constant 0 : i32
    return %c0_i32, %c0_i32_0, %c0_i32_1 : i32, i32, i32
  }
  func.func @transform_16(%arg0: i32) -> (i32, i32) {
    %c0_i32 = arith.constant 0 : i32
    %c0_i32_0 = arith.constant 0 : i32
    %c0_i32_1 = arith.constant 0 : i32
    return %c0_i32, %c0_i32_0 : i32, i32
  }
  func.func @transform_17(%arg0: i32) -> (i32, i32) {
    %c0_i32 = arith.constant 0 : i32
    %c0_i32_0 = arith.constant 0 : i32
    %c0_i32_1 = arith.constant 0 : i32
    return %c0_i32, %c0_i32_0 : i32, i32
  }
  func.func @transform_18(%arg0: i32) -> (i32, i32) {
    %c0_i32 = arith.constant 0 : i32
    %c0_i32_0 = arith.constant 0 : i32
    %c0_i32_1 = arith.constant 0 : i32
    return %c0_i32, %c0_i32_0 : i32, i32
  }
  func.func @transform_19(%arg0: i32) -> (i32, i32) {
    %c0_i32 = arith.constant 0 : i32
    %c0_i32_0 = arith.constant 0 : i32
    %c0_i32_1 = arith.constant 0 : i32
    return %c0_i32, %c0_i32_0 : i32, i32
  }
  func.func @transform_20(%arg0: i32) -> (i32, i32) {
    %c0_i32 = arith.constant 0 : i32
    %c0_i32_0 = arith.constant 0 : i32
    return %arg0, %c0_i32 : i32, i32
  }
}

</mosaic_0001>

<bundles_post_ra>
// kernel: tpu_custom_call.1
= control target key start
LH: loop header
LB: loop body
LE: loop exit
PB: predicated region body
PF: predicated region fallthrough
CT: control target
= control target key end

     0   :  { %s6925_s0 = inlined_call_operand.vmem [shape: f32[80,32], index: 0, kind: input, shape index: {}]   ;;  %s6926_s1 = inlined_call_operand.vmem [shape: f32[40,32], index: 1, kind: input, shape index: {}]   ;;  %s6927_s2 = inlined_call_operand.vmem [shape: bf16[8,40], index: 2, kind: input, shape index: {}]   ;;  %s6928_s3 = inlined_call_operand.vmem [shape: f32[40,40], index: 3, kind: input, shape index: {}]   ;;  %s6929_s4 = inlined_call_operand.vmem [shape: bf16[2,32,96], index: 4, kind: input, shape index: {}]   ;;  %s6930_s5 = inlined_call_operand.vmem [shape: f32[2,1,96], index: 5, kind: input, shape index: {}]   ;;  %s6931_s6 = inlined_call_operand.vmem [shape: bf16[2,4,8,32], index: 6, kind: input, shape index: {}]   ;;  %s6932_s7 = inlined_call_operand.vmem [shape: f32[2,1,32], index: 7, kind: input, shape index: {}]   ;;  %s6933_s8 = inlined_call_operand.vmem [shape: bf16[2,32,64], index: 8, kind: input, shape index: {}]   ;;  %s6934_s9 = inlined_call_operand.vmem [shape: f32[2,1,64], index: 9, kind: input, shape index: {}]   ;;  %s6935_s10 = inlined_call_operand.vmem [shape: bf16[2,64,32], index: 10, kind: input, shape index: {}]   ;;  %s6936_s11 = inlined_call_operand.vmem [shape: f32[2,1,32], index: 11, kind: input, shape index: {}]   ;;  %s6937_s12 = inlined_call_operand.vmem [shape: f32[2,1,32], index: 12, kind: input, shape index: {}]   ;;  %s6938_s13 = inlined_call_operand.vmem [shape: f32[2,1,32], index: 13, kind: input, shape index: {}]   ;;  %s6939_s14 = inlined_call_operand.vmem [shape: f32[2,1,32], index: 14, kind: input, shape index: {}]   ;;  %s6940_s15 = inlined_call_operand.vmem [shape: f32[2,1,32], index: 15, kind: input, shape index: {}]   ;;  %s6941_s16 = inlined_call_operand.vmem [shape: f32[1,32], index: 16, kind: input, shape index: {}]   ;;  %s6942_s17 = inlined_call_operand.vmem [shape: f32[1,32], index: 17, kind: input, shape index: {}]   ;;  %s6943_s18 = inlined_call_operand.vmem [shape: bf16[32,128], index: 18, kind: input, shape index: {}]   ;;  %s6944_s19 = inlined_call_operand.vmem [shape: f32[1,128], index: 19, kind: input, shape index: {}]   ;;  %s6945_s20 = inlined_call_operand.hbm [shape: f32[16,128], index: 20, kind: output, shape index: {}]  }
   0x1   :  { %6971 = sst [smem:[#allocation12_spill]] %s6925_s0 }
   0x2   :  { %6972 = sst [smem:[#allocation13_spill]] %s6926_s1 }
   0x3   :  { %6973 = sst [smem:[#allocation14_spill]] %s6927_s2 }
   0x4   :  { %6974 = sst [smem:[#allocation15_spill]] %s6928_s3 }
   0x5   :  { %6975 = sst [smem:[#allocation16_spill]] %s6929_s4 }
   0x6   :  { %6976 = sst [smem:[#allocation17_spill]] %s6944_s19 }
   0x7   :  { %6977 = sst [smem:[#allocation18_spill]] %s6945_s20 }
   0x8   :  { %25 = vsyncpa [#allocation3], 0 }
   0x9   :  { %27 = vsyncpa [#allocation3 + $0x1], 0  ;;  %s5638_s1 = smov 0   ;;  %s5640_s22 = smov 0  }
   0xa   :  { %s5642_s23 = smov 0   ;;  %s5644_s24 = smov 0  }
   0xb LB: > { %6978 = sst [smem:[#allocation5_spill]] %s5505_s1  ;;  %s5659_s2 = sadd.s32 4294967295, %s5517_s24   ;;  %s5517_s24 = sphi %s5644_s24, %s7004_s24   ;;  %s5513_s23 = sphi %s5642_s23, %s7006_s23   ;;  %s5509_s22 = sphi %s5640_s22, %s7008_s22   ;;  %s5505_s1 = sphi %s5638_s1, %s7007_s1  }
   0xc   : > { %6979 = sst [smem:[#allocation6_spill]] %s5513_s23  ;;  %s4319_s25 = sadd.s32 4294967294, %s5517_s24  }
   0xd   : > { %6980 = sst [smem:[#allocation7_spill]] %s5517_s24  ;;  %s5663_s3 = sadd.s32 1, %s5517_s24  }
   0xe   : > { %6981 = sst [smem:[#allocation8_spill]] %s5663_s3  ;;  %s465_s26 = sadd.s32 1, %s5513_s23 }
   0xf   : > { %s462_s27 = ssub.s32 %s5517_s24, %s5663_s3  ;;  %p475_p0 = scmp.ne.s32.totalorder %s5513_s23, %s5509_s22 }
  0x10   : > { %p463_p1 = scmp.eq.s32.totalorder %s462_s27, 0  ;;  %p476_p2 = scmp.eq.s32.totalorder %s5659_s2, 1 }
  0x11   : > { %p481_p3 = scmp.ne.s32.totalorder %s5509_s22, %s5505_s1  ;;  %p482_p4 = scmp.eq.s32.totalorder %s4319_s25, 1 }
  0x12   : > { %s5674_s28 = scalar_select %p463_p1, %s5513_s23, %s465_s26  }
  0x13   : > { %p5676_p5 = por %p476_p2, %p475_p0  ;;  %p5680_p6 = por %p482_p4, %p481_p3 }
  0x14   : > { %6982 = sst [smem:[#allocation9_spill]] %s5674_s28  ;;  %p4322_p7 = scmp.ge.s32.totalorder %s5517_s24, 1 }
  0x15   : > { %s6983_s4 = scalar_select %p5676_p5, 1, 0 }
  0x16   : > { %s6985_s29 = scalar_select %p5680_p6, 1, 0 }
  0x17   : > { %6984 = sst [smem:[#allocation10_spill]] %s6983_s4  ;;  %p566_p8 = scmp.lt.s32.totalorder %s5517_s24, 3 }
  0x18   : > { %6986 = sst [smem:[#allocation11_spill]] %s6985_s29 }
  0x19   : > { %p567_p9 = pnand %p4322_p7, %p566_p8 }
  0x1a   : > { %s6987_s21 = sld [smem:[#allocation16_spill]] (!%p567_p9)  ;;  %s624_s27 = smul.u32 (!%p567_p9), 5, %s5659_s2 }
  0x1b   : > { %570 = sbr.rel (%p567_p9) target bundleno = 8103 (0x1fa7), region = 100  ;;  %s6988_s28 = sld [smem:[#allocation13_spill]] (!%p567_p9) }
  0x1c   : > { %p625_p10 = scmp.lt.s32.totalorder (!%p567_p9), %s624_s27, 9  ;;  %s6989_s1 = sld [smem:[#allocation12_spill]] (!%p567_p9) }
  0x1d   : > { %s5522_s3 = smov (!%p567_p9), 88   ;;  %s5523_s4 = smov (!%p567_p9), 120  }
  0x1e   : > { %s6990_s0 = sld [smem:[#allocation15_spill]] (!%p567_p9)  ;;  %s6968_s26 = smov (!%p567_p9), 112  }
  0x1f   : > { %s6966_s30 = smov (!%p567_p9), 80   ;;  %s6964_s29 = smov (!%p567_p9), 48  }
  0x20   : > { %v5232_v0 = vld [vmem:[%s6987_s21 + $0x8] sm:$0xff]   ;;  %v5519_v1 = vmov 0.0   ;;  %v5233_v2 = vld [vmem:[%s6987_s21] sm:$0xff]   ;;  %vm5520_vm0 = vmmov 0   ;;  %s7010_s27 = smov (!%p625_p10, %s624_s27), 9  ;;  %vm677_vm1 = vcmask 261120  }
  0x21   : > { %4658 = vmatprep.subr.bf16.mxu0 %v5519_v1  ;;  %4674 = vmatprep.subr.bf16.mxu1 %v5519_v1  ;;  %v641_v3 = vld [vmem:[%s6988_s28] sm:$0xff]  ;;  %s4324_s25 = sshll.u32 %s7010_s27, 3  ;;  %v642_v4 = vld [vmem:[%s6988_s28 + $0x8] sm:$0xff]  ;;  %v643_v7 = vld [vmem:[%s6988_s28 + $0x10] sm:$0xff]  ;;  %vm755_vm2 = vcmask 64512   ;;  %vm840_vm3 = vcmask 326656  }
  0x22   : > { %4659 = vmatpush3.bf16.msra.mxu0 %v5232_v0  ;;  %4662 = vmatprep.mubr.msk.bf16.mxu0 %vm5520_vm0, %v5519_v1  ;;  %s628_s24 = scalar_lea.vmem %s6989_s1, %s4324_s25  ;;  %v644_v8 = vld [vmem:[%s6988_s28 + $0x18] sm:$0xff]  ;;  %v645_v18 = vld [vmem:[%s6988_s28 + $0x20] sm:$0xff]  ;;  %s5524_s27 = smov 64   ;;  %vm916_vm4 = vcmask 1043456   ;;  %vm2212_vm5 = vcmask 523264  }
  0x23   : > { %4660 = vmatprep.subr.bf16.mxu0 %v5519_v1  ;;  %4680 = vmatprep.mubr.msk.bf16.mxu1 %vm5520_vm0, %v5519_v1  ;;  %v636_v5 = vld [vmem:[%s628_s24] sm:$0xff]  ;;  %v637_v6 = vld [vmem:[%s628_s24 + $0x8] sm:$0xff]  ;;  %v638_v11 = vld [vmem:[%s628_s24 + $0x10] sm:$0xff]  ;;  %s5525_s25 = smov 56   ;;  %s6962_s19 = smov 72  }
  0x24   : > { %v5716_v9 = vadd.f32 %v641_v3, %v636_v5  ;;  %v5718_v10 = vadd.f32 %v642_v4, %v637_v6  ;;  %v639_v12 = vld [vmem:[%s628_s24 + $0x18] sm:$0xff]  ;;  %v5723_v14 = vadd.f32 %v643_v7, %v638_v11  ;;  %v640_v17 = vld [vmem:[%s628_s24 + $0x20] sm:$0xff]  ;;  %s5521_s24 = smov 96   ;;  %v5815_v63 = vld [vmem:[%s6990_s0 + $0x8] sm:$0xff]  ;;  %s6960_s20 = smov 104  }
  0x25   : > { %v5725_v15 = vadd.f32 %v644_v8, %v639_v12  ;;  %v5735_v19 = vadd.f32 %v645_v18, %v640_v17  ;;  %v4325_v22 = vld [vmem:[%s6930_s5] ss:$0 sm:$0xff]  ;;  %v5825_v6 = vld [vmem:[%s6990_s0 + $0x10] sm:$0xff]  ;;  %s6958_s1 = smov 40  }
  0x26   : > { %4661 = vmatpush3.bf16.msra.mxu0 %v5233_v2  ;;  %v651_v13 = vpack.c.bf16 %v5718_v10, %v5716_v9  ;;  %v5807_v58 = vld [vmem:[%s6990_s0] sm:$0xff] }
  0x27   : > { %4692 = vmatprep.subr.bf16.mxu0 %v5519_v1  ;;  %v652_v16 = vpack.c.bf16 %v5725_v15, %v5723_v14  ;;  %v653_v20 = vpack.c.bf16 %v5735_v19, %v5735_v19 }
  0x29   : > { %4663 = vmatmul.mubr.msk.bf16.vlgmr.msra.gmra.mxu0 %vm677_vm1, %v651_v13 }
  0x2a   : > { %4666 = vmatprep.mubr.msk.bf16.mxu0 %vm5520_vm0, %v5519_v1 }
  0x31   : > { %4667 = vmatmul.mubr.msk.bf16.gmra.mxu0 %vm677_vm1, %v652_v16  ;;  %v5835_v16 = vld [vmem:[%s6990_s0 + $0x18] sm:$0xff] }
  0x32   : > { %4670 = vmatprep.mubr.msk.bf16.mxu0 %vm5520_vm0, %v5519_v1 }
  0x39   : > { %4671 = vmatmul.mubr.msk.bf16.gmra.mxu0 %vm677_vm1, %v653_v20 }
  0x3a   : > { %4698 = vmatprep.mubr.msk.bf16.mxu0 %vm5520_vm0, %v5519_v1 }
  0xe9   : > { %v721_v21 = vpop.f32.mrf.mxu0 }
  0xea   : > { %v722_v25 = vadd.f32 %v4325_v22, %v721_v21 }
  0xeb   : > { %v4664_v23 = vpop.f32.mrf.mxu0 }
  0xec   : > { %v5843_v23 = vld [vmem:[%s6990_s0 + $0x20] sm:$0xff] }
  0xed   : > { %v724_v24 = vpop.f32.mrf.mxu0 }
  0xee   : > { %v725_v26 = vadd.f32 %v4325_v22, %v724_v24 }
  0xef   : > { %v4665_v27 = vpop.f32.mrf.mxu0 }
  0xf0   : > { %v5747_v28 = vpack.c.bf16 %v725_v26, %v722_v25 }
  0xf1   : > { %v729_v29 = vpop.f32.mrf.mxu0 }
  0xf2   : > { %749 = vrot.lane.b32.xlu1 %v5747_v28, %s5521_s24  ;;  %v730_v39 = vadd.f32 %v4325_v22, %v729_v29 }
  0xf3   : > { %v4668_v30 = vpop.f32.mrf.mxu0 }
  0xf5   : > { %v732_v31 = vpop.f32.mrf.mxu0 }
  0xf6   : > { %v733_v36 = vadd.f32 %v4325_v22, %v732_v31 }
  0xf7   : > { %v4669_v32 = vpop.f32.mrf.mxu0 }
  0xf8   : > { %v5757_v41 = vpack.c.bf16 %v733_v36, %v730_v39 }
  0xf9   : > { %v737_v33 = vpop.f32.mrf.mxu0 }
  0xfa   : > { %v738_v34 = vadd.f32 %v4325_v22, %v737_v33 }
  0xfb   : > { %v4672_v35 = vpop.f32.mrf.mxu0 }
  0xfc   : > { %v5751_v37 = vpack.c.bf16 %v738_v34, %v738_v34 }
  0xfd   : > { %v740_v38 = vpop.f32.mrf.mxu0 }
  0xfe   : > { %990 = vrot.lane.b32.xlu1 %v5751_v37, %s5522_s3  ;;  %753 = vrot.lane.b32.xlu0 %v5751_v37, %s5521_s24 }
  0xff   : > { %v4673_v40 = vpop.f32.mrf.mxu0 }
 0x102   : > { %986 = vrot.lane.b32.xlu1 %v5747_v28, %s5522_s3  ;;  %751 = vrot.lane.b32.xlu0 %v5757_v41, %s5521_s24 }
 0x106   : > { %982 = vrot.lane.b32.xlu1 %v5757_v41, %s5523_s4  ;;  %988 = vrot.lane.b32.xlu0 %v5757_v41, %s5522_s3 }
 0x10a   : > { %980 = vrot.lane.b32.xlu0 %v5747_v28, %s5523_s4 }
 0x10e   : > { %984 = vrot.lane.b32.xlu0 %v5751_v37, %s5523_s4 }
 0x164   : > { %v750_v46 = vpop.permute.xlu1 %749 }
 0x165   : > { %v766_v47 = vsel %vm755_vm2, %v750_v46, 0 }
 0x170   : > { %v754_v42 = vpop.permute.xlu0 %753  ;;  %v991_v48 = vpop.permute.xlu1 %990 }
 0x171   : > { %v772_v43 = vsel %vm755_vm2, %v754_v42, 0  ;;  %v1008_v49 = vsel %vm755_vm2, %v991_v48, 0 }
 0x172   : > { %4675 = vmatpush3.bf16.xpose.msra.mxu1 %v772_v43 }
 0x173   : > { %4676 = vmatprep.subr.bf16.mxu1 %v5519_v1 }
 0x174   : > { %v752_v44 = vpop.permute.xlu0 %751  ;;  %v987_v52 = vpop.permute.xlu1 %986 }
 0x175   : > { %v769_v45 = vsel %vm755_vm2, %v752_v44, 0  ;;  %v1002_v53 = vsel %vm755_vm2, %v987_v52, 0 }
 0x178   : > { %v989_v50 = vpop.permute.xlu0 %988  ;;  %v983_v55 = vpop.permute.xlu1 %982 }
 0x179   : > { %v1005_v51 = vsel %vm755_vm2, %v989_v50, 0 }
 0x17a   : > { %4677 = vmatpush3.bf16.xpose.msra.mxu1 %v769_v45 }
 0x17b   : > { %4678 = vmatprep.subr.bf16.mxu1 %v5519_v1 }
 0x17c   : > { %v981_v54 = vpop.permute.xlu0 %980 }
 0x180   : > { %v985_v56 = vpop.permute.xlu0 %984 }
 0x182   : > { %4679 = vmatpush3.bf16.xpose.msra.mxu1 %v766_v47 }
 0x183   : > { %4710 = vmatprep.subr.bf16.mxu1 %v5519_v1 }
 0x189   : > { %4681 = vmatmul.mubr.msk.bf16.vlgmr.msra.gmra.mxu1 %vm755_vm2, %v5747_v28 }
 0x18a   : > { %4711 = vmatpush3.bf16.xpose.msra.mxu1 %v1008_v49  ;;  %4684 = vmatprep.mubr.msk.bf16.mxu1 %vm5520_vm0, %v5519_v1 }
 0x18b   : > { %4712 = vmatprep.subr.bf16.mxu1 %v5519_v1 }
 0x191   : > { %4685 = vmatmul.mubr.msk.bf16.gmra.mxu1 %vm755_vm2, %v5757_v41 }
 0x192   : > { %4713 = vmatpush3.bf16.xpose.msra.mxu1 %v1005_v51  ;;  %4688 = vmatprep.mubr.msk.bf16.mxu1 %vm5520_vm0, %v5519_v1 }
 0x193   : > { %4714 = vmatprep.subr.bf16.mxu1 %v5519_v1 }
 0x199   : > { %4689 = vmatmul.mubr.msk.bf16.gmra.mxu1 %vm755_vm2, %v5751_v37 }
 0x19a   : > { %4715 = vmatpush3.bf16.xpose.msra.mxu1 %v1002_v53  ;;  %4716 = vmatprep.mubr.msk.bf16.mxu1 %vm5520_vm0, %v5519_v1 }
 0x19b   : > { %4746 = vmatprep.subr.bf16.mxu1 %v5519_v1 }
 0x1a1   : > { %4717 = vmatmul.mubr.msk.bf16.vlgmr.msra.gmra.mxu1 %vm755_vm2, %v981_v54 }
 0x1a2   : > { %4720 = vmatprep.mubr.msk.bf16.mxu1 %vm5520_vm0, %v5519_v1 }
 0x1a9   : > { %4721 = vmatmul.mubr.msk.bf16.gmra.mxu1 %vm755_vm2, %v983_v55 }
 0x1aa   : > { %4724 = vmatprep.mubr.msk.bf16.mxu1 %vm5520_vm0, %v5519_v1 }
 0x1b1   : > { %4725 = vmatmul.mubr.msk.bf16.gmra.mxu1 %vm755_vm2, %v985_v56 }
 0x1b2   : > { %4748 = vmatprep.mubr.msk.bf16.mxu1 %vm5520_vm0, %v5519_v1 }
 0x249   : > { %v808_v57 = vpop.f32.mrf.mxu1 }
 0x24a   : > { %v830_v59 = vmul.f32 0.35355338, %v808_v57 }
 0x24b   : > { %v4682_v60 = vpop.f32.mrf.mxu1 }
 0x24c   : > { %v5810_v61 = vadd.f32 %v830_v59, %v5807_v58 }
 0x24d   : > { %v811_v62 = vpop.f32.mrf.mxu1 }
 0x24e   : > { %v831_v0 = vmul.f32 0.35355338, %v811_v62  ;;  %v841_v2 = vsel %vm840_vm3, %v5810_v61, -inf }
 0x24f   : > { %842 = vmax.xlane.f32.xlu1 %v841_v2  ;;  %v4683_v3 = vpop.f32.mrf.mxu1 }
 0x250   : > { %v5820_v4 = vadd.f32 %v831_v0, %v5815_v63 }
 0x251   : > { %v816_v5 = vpop.f32.mrf.mxu1 }
 0x252   : > { %v832_v7 = vmul.f32 0.35355338, %v816_v5  ;;  %v844_v8 = vsel %vm840_vm3, %v5820_v4, -inf }
 0x253   : > { %845 = vmax.xlane.f32.xlu0 %v844_v8  ;;  %v4686_v11 = vpop.f32.mrf.mxu1 }
 0x254   : > { %v5830_v12 = vadd.f32 %v832_v7, %v5825_v6 }
 0x255   : > { %v819_v13 = vpop.f32.mrf.mxu1 }
 0x256   : > { %v833_v17 = vmul.f32 0.35355338, %v819_v13  ;;  %v847_v18 = vsel %vm840_vm3, %v5830_v12, -inf }
 0x257   : > { %848 = vmax.xlane.f32.xlu0 %v847_v18  ;;  %v4687_v20 = vpop.f32.mrf.mxu1 }
 0x258   : > { %v838_v21 = vadd.f32 %v833_v17, %v5835_v16 }
 0x259   : > { %v824_v22 = vpop.f32.mrf.mxu1 }
 0x25a   : > { %v834_v24 = vmul.f32 0.35355338, %v824_v22  ;;  %v850_v25 = vsel %vm840_vm3, %v838_v21, -inf }
 0x25b   : > { %851 = vmax.xlane.f32.xlu1 %v850_v25  ;;  %v4690_v26 = vpop.f32.mrf.mxu1 }
 0x25c   : > { %v839_v27 = vadd.f32 %v834_v24, %v5843_v23 }
 0x25d   : > { %v827_v29 = vpop.f32.mrf.mxu1 }
 0x25e   : > { %v853_v30 = vsel %vm840_vm3, %v839_v27, -inf }
 0x25f   : > { %854 = vmax.xlane.f32.xlu0 %v853_v30  ;;  %v4691_v31 = vpop.f32.mrf.mxu1 }
 0x261   : > { %v1044_v32 = vpop.f32.mrf.mxu1 }
 0x262   : > { %v1066_v33 = vmul.f32 0.35355338, %v1044_v32 }
 0x263   : > { %v4718_v34 = vpop.f32.mrf.mxu1 }
 0x264   : > { %v1071_v35 = vadd.f32 %v1066_v33, %v5807_v58 }
 0x265   : > { %v1047_v36 = vpop.f32.mrf.mxu1 }
 0x266   : > { %v1067_v38 = vmul.f32 0.35355338, %v1047_v36  ;;  %v1076_v39 = vsel %vm840_vm3, %v1071_v35, -inf }
 0x267   : > { %1077 = vmax.xlane.f32.xlu1 %v1076_v39  ;;  %v4719_v40 = vpop.f32.mrf.mxu1 }
 0x268   : > { %v5851_v42 = vadd.f32 %v1067_v38, %v5815_v63 }
 0x269   : > { %v1052_v43 = vpop.f32.mrf.mxu1 }
 0x26a   : > { %v1068_v44 = vmul.f32 0.35355338, %v1052_v43  ;;  %v1079_v45 = vsel %vm840_vm3, %v5851_v42, -inf }
 0x26b   : > { %1080 = vmax.xlane.f32.xlu0 %v1079_v45  ;;  %v4722_v46 = vpop.f32.mrf.mxu1 }
 0x26c   : > { %v5856_v47 = vadd.f32 %v1068_v44, %v5825_v6 }
 0x26d   : > { %v1055_v48 = vpop.f32.mrf.mxu1 }
 0x26e   : > { %v1069_v49 = vmul.f32 0.35355338, %v1055_v48  ;;  %v1082_v50 = vsel %vm840_vm3, %v5856_v47, -inf }
 0x26f   : > { %1083 = vmax.xlane.f32.xlu1 %v1082_v50  ;;  %v4723_v51 = vpop.f32.mrf.mxu1 }
 0x270   : > { %v5861_v52 = vadd.f32 %v1069_v49, %v5835_v16 }
 0x271   : > { %v1060_v53 = vpop.f32.mrf.mxu1 }
 0x272   : > { %v1070_v54 = vmul.f32 0.35355338, %v1060_v53  ;;  %v1085_v55 = vsel %vm840_vm3, %v5861_v52, -inf }
 0x273   : > { %1086 = vmax.xlane.f32.xlu0 %v1085_v55  ;;  %v4726_v56 = vpop.f32.mrf.mxu1 }
 0x274   : > { %v5866_v57 = vadd.f32 %v1070_v54, %v5843_v23 }
 0x275   : > { %v1063_v59 = vpop.f32.mrf.mxu1 }
 0x276   : > { %v1088_v60 = vsel %vm840_vm3, %v5866_v57, -inf }
 0x277   : > { %1089 = vmax.xlane.f32.xlu1 %v1088_v60  ;;  %v4727_v62 = vpop.f32.mrf.mxu1 }
 0x288   : > { %903 = vrot.lane.b32.xlu1 %v5751_v37, %s5524_s27 }
 0x289   : > { %901 = vrot.lane.b32.xlu0 %v5757_v41, %s5524_s27 }
 0x2d8   : > { %v843_v0 = vpop.xlane.xlu1 %842 }
 0x2d9   : > { %v856_v2 = vsub.f32 %v5810_v61, %v843_v0 }
 0x2db   : > { %v861_v3 = vmul.f32 1.442695, %v856_v2 }
 0x2dc   : > { %v846_v5 = vpop.xlane.xlu0 %845 }
 0x2dd   : > { %5250 = vpow2.f32 %v861_v3  ;;  %v857_v7 = vsub.f32 %v5820_v4, %v846_v5 }
 0x2df   : > { %v863_v8 = vmul.f32 1.442695, %v857_v7 }
 0x2e0   : > { %v849_v11 = vpop.xlane.xlu0 %848 }
 0x2e1   : > { %5252 = vpow2.f32 %v863_v8  ;;  %v858_v13 = vsub.f32 %v5830_v12, %v849_v11 }
 0x2e3   : > { %v865_v17 = vmul.f32 1.442695, %v858_v13 }
 0x2e4   : > { %v852_v18 = vpop.xlane.xlu1 %851 }
 0x2e5   : > { %5254 = vpow2.f32 %v865_v17  ;;  %v859_v20 = vsub.f32 %v838_v21, %v852_v18 }
 0x2e7   : > { %v867_v22 = vmul.f32 1.442695, %v859_v20 }
 0x2e8   : > { %v855_v24 = vpop.xlane.xlu0 %854 }
 0x2e9   : > { %5256 = vpow2.f32 %v867_v22  ;;  %v860_v25 = vsub.f32 %v839_v27, %v855_v24 }
 0x2ea   : > { %v5877_v26 = vpop.eup %5250 }
 0x2eb   : > { %v869_v61 = vmul.f32 1.442695, %v860_v25  ;;  %v871_v29 = vsel %vm840_vm3, %v5877_v26, 0.0 }
 0x2ec   : > { %872 = vadd.xlane.f32.xlu0 %v871_v29 }
 0x2ed   : > { %5258 = vpow2.f32 %v869_v61 }
 0x2ee   : > { %v5881_v4 = vpop.eup %5252 }
 0x2ef   : > { %v874_v12 = vsel %vm840_vm3, %v5881_v4, 0.0 }
 0x2f0   : > { %v1078_v30 = vpop.xlane.xlu1 %1077  ;;  %875 = vadd.xlane.f32.xlu1 %v874_v12 }
 0x2f1   : > { %v1091_v21 = vsub.f32 %v1071_v35, %v1078_v30 }
 0x2f2   : > { %v5885_v31 = vpop.eup %5254 }
 0x2f3   : > { %v1096_v32 = vmul.f32 1.442695, %v1091_v21  ;;  %v877_v27 = vsel %vm840_vm3, %v5885_v31, 0.0 }
 0x2f4   : > { %878 = vadd.xlane.f32.xlu0 %v877_v27  ;;  %v1081_v39 = vpop.xlane.xlu0 %1080 }
 0x2f5   : > { %5260 = vpow2.f32 %v1096_v32  ;;  %v1092_v50 = vsub.f32 %v5851_v42, %v1081_v39 }
 0x2f6   : > { %v5889_v33 = vpop.eup %5256 }
 0x2f7   : > { %v880_v34 = vsel %vm840_vm3, %v5889_v33, 0.0  ;;  %v1098_v51 = vmul.f32 1.442695, %v1092_v50 }
 0x2f8   : > { %881 = vadd.xlane.f32.xlu1 %v880_v34  ;;  %v1084_v35 = vpop.xlane.xlu1 %1083 }
 0x2f9   : > { %v1093_v53 = vsub.f32 %v5856_v47, %v1084_v35  ;;  %5262 = vpow2.f32 %v1098_v51 }
 0x2fa   : > { %v5893_v36 = vpop.eup %5258 }
 0x2fb   : > { %v883_v38 = vsel %vm840_vm3, %v5893_v36, 0.0  ;;  %v1100_v55 = vmul.f32 1.442695, %v1093_v53 }
 0x2fc   : > { %884 = vadd.xlane.f32.xlu0 %v883_v38  ;;  %v1087_v44 = vpop.xlane.xlu0 %1086 }
 0x2fd   : > { %v1094_v54 = vsub.f32 %v5861_v52, %v1087_v44  ;;  %5264 = vpow2.f32 %v1100_v55 }
 0x2ff   : > { %v1102_v59 = vmul.f32 1.442695, %v1094_v54 }
 0x300   : > { %v1090_v40 = vpop.xlane.xlu1 %1089  ;;  %v902_v49 = vpop.permute.xlu0 %901 }
 0x301   : > { %v1095_v56 = vsub.f32 %v5866_v57, %v1090_v40  ;;  %5266 = vpow2.f32 %v1102_v59  ;;  %v979_v59 = vld [vmem:[%s6931_s6] sm:$0xf] }
 0x302   : > { %v5897_v43 = vpop.eup %5260 }
 0x303   : > { %v1106_v45 = vsel %vm840_vm3, %v5897_v43, 0.0  ;;  %v1104_v60 = vmul.f32 1.442695, %v1095_v56 }
 0x304   : > { %v904_v46 = vpop.permute.xlu1 %903  ;;  %1107 = vadd.xlane.f32.xlu1 %v1106_v45 }
 0x305   : > { %v918_v48 = vsel %vm916_vm4, %v904_v46, 0  ;;  %5268 = vpow2.f32 %v1104_v60  ;;  %v1293_v60 = vsel %vm916_vm4, %v979_v59, 0 }
 0x306   : > { %4693 = vmatpush3.bf16.msra.mxu0 %v918_v48  ;;  %v5912_v62 = vpop.eup %5262 }
 0x307   : > { %4694 = vmatprep.subr.bf16.mxu0 %v5519_v1  ;;  %v1109_v0 = vsel %vm840_vm3, %v5912_v62, 0.0 }
 0x30a   : > { %4695 = vmatpush3.bf16.msra.mxu0 %v902_v49  ;;  %v5916_v42 = vpop.eup %5264 }
 0x30b   : > { %4696 = vmatprep.subr.bf16.mxu0 %v5519_v1  ;;  %v1112_v52 = vsel %vm840_vm3, %v5916_v42, 0.0 }
 0x30e   : > { %v5918_v47 = vpop.eup %5266 }
 0x30f   : > { %v1115_v3 = vsel %vm840_vm3, %v5918_v47, 0.0 }
 0x312   : > { %1138 = vrot.lane.b32.xlu0 %v5751_v37, %s5525_s25  ;;  %v5922_v2 = vpop.eup %5268 }
 0x313   : > { %v1118_v57 = vsel %vm840_vm3, %v5922_v2, 0.0 }
 0x315   : > { %899 = vrot.lane.b32.xlu1 %v5747_v28, %s5524_s27 }
 0x331   : > { %1110 = vadd.xlane.f32.xlu0 %v1109_v0  ;;  %v4343_v0 = vld [vmem:[%s6931_s6 + $0x4] sm:$0xf] }
 0x335   : > { %1113 = vadd.xlane.f32.xlu0 %v1112_v52 }
 0x339   : > { %1119 = vadd.xlane.f32.xlu1 %v1118_v57  ;;  %1116 = vadd.xlane.f32.xlu0 %v1115_v3 }
 0x34a   : > { %1353 = vrot.lane.b32.xlu1 %v5757_v41, %s6968_s26 }
 0x34f   : > { %1136 = vrot.lane.b32.xlu0 %v5757_v41, %s5525_s25 }
 0x353   : > { %1134 = vrot.lane.b32.xlu0 %v5747_v28, %s5525_s25 }
 0x357   : > { %1361 = vrot.lane.b32.xlu0 %v5751_v37, %s6966_s30 }
 0x35b   : > { %1359 = vrot.lane.b32.xlu0 %v5757_v41, %s6966_s30 }
 0x35f   : > { %1357 = vrot.lane.b32.xlu0 %v5747_v28, %s6966_s30  ;;  %s6995_s30 = smov 104  }
 0x363   : > { %1351 = vrot.lane.b32.xlu0 %v5747_v28, %s6968_s26 }
 0x367   : > { %1355 = vrot.lane.b32.xlu0 %v5751_v37, %s6968_s26  ;;  %s6994_s26 = smov 72  }
 0x375   : > { %v873_v7 = vpop.xlane.xlu0 %872 }
 0x379   : > { %v876_v5 = vpop.xlane.xlu1 %875 }
 0x37a   : > { %5270 = vrcp.f32 %v876_v5 }
 0x37b   : > { %5272 = vrcp.f32 %v873_v7 }
 0x37d   : > { %v879_v11 = vpop.xlane.xlu0 %878 }
 0x381   : > { %v882_v8 = vpop.xlane.xlu1 %881 }
 0x382   : > { %5274 = vrcp.f32 %v882_v8 }
 0x383   : > { %5276 = vrcp.f32 %v879_v11 }
 0x385   : > { %v885_v17 = vpop.xlane.xlu0 %884 }
 0x386   : > { %5278 = vrcp.f32 %v885_v17 }
 0x387   : > { %v5271_v13 = vpop.eup %5270 }
 0x388   : > { %v5273_v20 = vpop.eup %5272  ;;  %v892_v22 = vmul.f32 %v5271_v13, %v5881_v4 }
 0x389   : > { %v891_v24 = vmul.f32 %v5273_v20, %v5877_v26  ;;  %v1139_v61 = vpop.permute.xlu0 %1138 }
 0x38a   : > { %v1152_v30 = vsel %vm916_vm4, %v1139_v61, 0 }
 0x38b   : > { %v896_v29 = vpack.c.bf16 %v892_v22, %v891_v24 }
 0x38d   : > { %v1108_v18 = vpop.xlane.xlu1 %1107 }
 0x38e   : > { %5280 = vrcp.f32 %v1108_v18 }
 0x38f   : > { %v5275_v12 = vpop.eup %5274 }
 0x390   : > { %v5277_v21 = vpop.eup %5276  ;;  %v894_v4 = vmul.f32 %v5275_v12, %v5889_v33 }
 0x391   : > { %v900_v25 = vpop.permute.xlu1 %899  ;;  %v893_v26 = vmul.f32 %v5277_v21, %v5885_v31 }
 0x392   : > { %4697 = vmatpush3.bf16.msra.mxu0 %v900_v25 }
 0x393   : > { %4728 = vmatprep.subr.bf16.mxu0 %v5519_v1  ;;  %v897_v32 = vpack.c.bf16 %v894_v4, %v893_v26  ;;  %v5279_v27 = vpop.eup %5278 }
 0x394   : > { %v895_v34 = vmul.f32 %v5279_v27, %v5893_v36 }
 0x395   : > { %4699 = vmatmul.mubr.msk.bf16.vlgmr.msra.gmra.mxu0 %vm840_vm3, %v896_v29 }
 0x396   : > { %4729 = vmatpush3.bf16.msra.mxu0 %v1152_v30  ;;  %4702 = vmatprep.mubr.msk.bf16.mxu0 %vm5520_vm0, %v5519_v1  ;;  %v898_v38 = vpack.c.bf16 %v895_v34, %v895_v34 }
 0x397   : > { %4730 = vmatprep.subr.bf16.mxu0 %v5519_v1 }
 0x39b   : > { %v5281_v40 = vpop.eup %5280 }
 0x39c   : > { %v1126_v36 = vmul.f32 %v5281_v40, %v5897_v43 }
 0x39d   : > { %4703 = vmatmul.mubr.msk.bf16.gmra.mxu0 %vm840_vm3, %v897_v32 }
 0x39e   : > { %4706 = vmatprep.mubr.msk.bf16.mxu0 %vm5520_vm0, %v5519_v1 }
 0x3a5   : > { %4707 = vmatmul.mubr.msk.bf16.gmra.mxu0 %vm840_vm3, %v898_v38 }
 0x3a6   : > { %4734 = vmatprep.mubr.msk.bf16.mxu0 %vm5520_vm0, %v5519_v1 }
 0x3ba   : > { %v1111_v33 = vpop.xlane.xlu0 %1110 }
 0x3bb   : > { %5282 = vrcp.f32 %v1111_v33 }
 0x3be   : > { %v1114_v35 = vpop.xlane.xlu0 %1113 }
 0x3bf   : > { %5284 = vrcp.f32 %v1114_v35 }
 0x3c2   : > { %v1117_v31 = vpop.xlane.xlu0 %1116  ;;  %v1120_v39 = vpop.xlane.xlu1 %1119 }
 0x3c3   : > { %5286 = vrcp.f32 %v1117_v31 }
 0x3c4   : > { %5288 = vrcp.f32 %v1120_v39 }
 0x3c6   : > { %v1137_v44 = vpop.permute.xlu0 %1136 }
 0x3c7   : > { %4731 = vmatpush3.bf16.msra.mxu0 %v1137_v44 }
 0x3c8   : > { %v5283_v45 = vpop.eup %5282  ;;  %4732 = vmatprep.subr.bf16.mxu0 %v5519_v1 }
 0x3c9   : > { %v1127_v46 = vmul.f32 %v5283_v45, %v5912_v62 }
 0x3ca   : > { %v1135_v48 = vpop.permute.xlu0 %1134 }
 0x3cb   : > { %4733 = vmatpush3.bf16.msra.mxu0 %v1135_v48  ;;  %v1131_v49 = vpack.c.bf16 %v1127_v46, %v1126_v36 }
 0x3cc   : > { %4760 = vmatprep.subr.bf16.mxu0 %v5519_v1  ;;  %v5285_v50 = vpop.eup %5284 }
 0x3cd   : > { %v1128_v53 = vmul.f32 %v5285_v50, %v5916_v42  ;;  %v1225_v42 = vsel %vm916_vm4, %v4343_v0, 0 }
 0x3ce   : > { %4735 = vmatmul.mubr.msk.bf16.vlgmr.msra.gmra.mxu0 %vm840_vm3, %v1131_v49  ;;  %4747 = vmatpush3.bf16.msra.mxu1 %v1225_v42  ;;  %v1362_v29 = vpop.permute.xlu0 %1361  ;;  %v1354_v49 = vpop.permute.xlu1 %1353 }
 0x3cf   : > { %4738 = vmatprep.mubr.msk.bf16.mxu0 %vm5520_vm0, %v5519_v1  ;;  %4761 = vmatpush3.bf16.msra.mxu0 %v1293_v60  ;;  %v1379_v4 = vsel %vm755_vm2, %v1362_v29, 0 }
 0x3d0   : > { %v5287_v51 = vpop.eup %5286  ;;  %4792 = vmatprep.subr.bf16.mxu0 %v5519_v1  ;;  %4774 = vmatprep.subr.bf16.mxu1 %v5519_v1 }
 0x3d1   : > { %v1129_v54 = vmul.f32 %v5287_v51, %v5918_v47  ;;  %v5289_v43 = vpop.eup %5288 }
 0x3d2   : > { %v1130_v56 = vmul.f32 %v5289_v43, %v5922_v2  ;;  %v1360_v27 = vpop.permute.xlu0 %1359 }
 0x3d3   : > { %v1132_v55 = vpack.c.bf16 %v1129_v54, %v1128_v53  ;;  %v1376_v35 = vsel %vm755_vm2, %v1360_v27, 0 }
 0x3d4   : > { %v1133_v62 = vpack.c.bf16 %v1130_v56, %v1130_v56 }
 0x3d6   : > { %4739 = vmatmul.mubr.msk.bf16.gmra.mxu0 %vm840_vm3, %v1132_v55  ;;  %v1358_v40 = vpop.permute.xlu0 %1357 }
 0x3d7   : > { %4742 = vmatprep.mubr.msk.bf16.mxu0 %vm5520_vm0, %v5519_v1  ;;  %v1373_v46 = vsel %vm755_vm2, %v1358_v40, 0 }
 0x3da   : > { %v1352_v48 = vpop.permute.xlu0 %1351 }
 0x3de   : > { %4743 = vmatmul.mubr.msk.bf16.gmra.mxu0 %vm840_vm3, %v1133_v62  ;;  %v1356_v50 = vpop.permute.xlu0 %1355 }
 0x3df   : > { %4762 = vmatprep.mubr.msk.bf16.mxu0 %vm5520_vm0, %v5519_v1 }
 0x455   : > { %v954_v47 = vpop.f32.mrf.mxu0 }
 0x457   : > { %v4700_v52 = vpop.f32.mrf.mxu0 }
 0x459   : > { %v957_v2 = vpop.f32.mrf.mxu0 }
 0x45a   : > { %v976_v57 = vpack.c.bf16 %v957_v2, %v954_v47 }
 0x45b   : > { %v4701_v3 = vpop.f32.mrf.mxu0 }
 0x45c   : > { %4763 = vmatmul.mubr.msk.bf16.vlgmr.msra.gmra.mxu0 %vm755_vm2, %v976_v57 }
 0x45d   : > { %v962_v5 = vpop.f32.mrf.mxu0  ;;  %4766 = vmatprep.mubr.msk.bf16.mxu0 %vm5520_vm0, %v5519_v1 }
 0x45f   : > { %v4704_v7 = vpop.f32.mrf.mxu0 }
 0x461   : > { %v965_v8 = vpop.f32.mrf.mxu0 }
 0x462   : > { %v977_v11 = vpack.c.bf16 %v965_v8, %v962_v5 }
 0x463   : > { %v4705_v13 = vpop.f32.mrf.mxu0 }
 0x464   : > { %4767 = vmatmul.mubr.msk.bf16.gmra.mxu0 %vm755_vm2, %v977_v11 }
 0x465   : > { %v970_v17 = vpop.f32.mrf.mxu0  ;;  %4770 = vmatprep.mubr.msk.bf16.mxu0 %vm5520_vm0, %v5519_v1 }
 0x466   : > { %v978_v22 = vpack.c.bf16 %v970_v17, %v970_v17 }
 0x467   : > { %v4708_v18 = vpop.f32.mrf.mxu0 }
 0x469   : > { %v973_v20 = vpop.f32.mrf.mxu0 }
 0x46b   : > { %v4709_v24 = vpop.f32.mrf.mxu0 }
 0x46c   : > { %4771 = vmatmul.mubr.msk.bf16.gmra.mxu0 %vm755_vm2, %v978_v22 }
 0x46d   : > { %4798 = vmatprep.mubr.msk.bf16.mxu0 %vm5520_vm0, %v5519_v1 }
 0x48e   : > { %v1188_v25 = vpop.f32.mrf.mxu0 }
 0x490   : > { %v4736_v61 = vpop.f32.mrf.mxu0 }
 0x492   : > { %v1191_v12 = vpop.f32.mrf.mxu0 }
 0x493   : > { %v1210_v30 = vpack.c.bf16 %v1191_v12, %v1188_v25 }
 0x494   : > { %v4737_v21 = vpop.f32.mrf.mxu0 }
 0x495   : > { %4749 = vmatmul.mubr.msk.bf16.vlgmr.msra.gmra.mxu1 %vm755_vm2, %v1210_v30 }
 0x496   : > { %4775 = vmatpush3.bf16.xpose.msra.mxu1 %v1379_v4  ;;  %v1196_v26 = vpop.f32.mrf.mxu0  ;;  %4752 = vmatprep.mubr.msk.bf16.mxu1 %vm5520_vm0, %v5519_v1 }
 0x497   : > { %4776 = vmatprep.subr.bf16.mxu1 %v5519_v1 }
 0x498   : > { %v4740_v32 = vpop.f32.mrf.mxu0 }
 0x49a   : > { %v1199_v34 = vpop.f32.mrf.mxu0 }
 0x49b   : > { %v1211_v38 = vpack.c.bf16 %v1199_v34, %v1196_v26 }
 0x49c   : > { %v4741_v33 = vpop.f32.mrf.mxu0 }
 0x49d   : > { %4753 = vmatmul.mubr.msk.bf16.gmra.mxu1 %vm755_vm2, %v1211_v38 }
 0x49e   : > { %4777 = vmatpush3.bf16.xpose.msra.mxu1 %v1376_v35  ;;  %v1204_v31 = vpop.f32.mrf.mxu0  ;;  %4756 = vmatprep.mubr.msk.bf16.mxu1 %vm5520_vm0, %v5519_v1 }
 0x49f   : > { %4778 = vmatprep.subr.bf16.mxu1 %v5519_v1  ;;  %v1212_v45 = vpack.c.bf16 %v1204_v31, %v1204_v31 }
 0x4a0   : > { %v4744_v39 = vpop.f32.mrf.mxu0 }
 0x4a2   : > { %v1207_v44 = vpop.f32.mrf.mxu0 }
 0x4a4   : > { %v4745_v36 = vpop.f32.mrf.mxu0 }
 0x4a5   : > { %4757 = vmatmul.mubr.msk.bf16.gmra.mxu1 %vm755_vm2, %v1212_v45 }
 0x4a6   : > { %4779 = vmatpush3.bf16.xpose.msra.mxu1 %v1373_v46  ;;  %4780 = vmatprep.mubr.msk.bf16.mxu1 %vm5520_vm0, %v5519_v1 }
 0x4a7   : > { %4810 = vmatprep.subr.bf16.mxu1 %v5519_v1 }
 0x4ad   : > { %4781 = vmatmul.mubr.msk.bf16.vlgmr.msra.gmra.mxu1 %vm755_vm2, %v1352_v48 }
 0x4ae   : > { %4784 = vmatprep.mubr.msk.bf16.mxu1 %vm5520_vm0, %v5519_v1 }
 0x4b5   : > { %4785 = vmatmul.mubr.msk.bf16.gmra.mxu1 %vm755_vm2, %v1354_v49 }
 0x4b6   : > { %4788 = vmatprep.mubr.msk.bf16.mxu1 %vm5520_vm0, %v5519_v1 }
 0x4bd   : > { %4789 = vmatmul.mubr.msk.bf16.gmra.mxu1 %vm755_vm2, %v1356_v50 }
 0x4be   : > { %4812 = vmatprep.mubr.msk.bf16.mxu1 %vm5520_vm0, %v5519_v1 }
 0x51c   : > { %v1329_v51 = vpop.f32.mrf.mxu0 }
 0x51e   : > { %v4764_v53 = vpop.f32.mrf.mxu0 }
 0x520   : > { %v1332_v54 = vpop.f32.mrf.mxu0 }
 0x522   : > { %v4765_v55 = vpop.f32.mrf.mxu0 }
 0x524   : > { %v1337_v43 = vpop.f32.mrf.mxu0 }
 0x526   : > { %v4768_v56 = vpop.f32.mrf.mxu0 }
 0x528   : > { %v1340_v59 = vpop.f32.mrf.mxu0 }
 0x52a   : > { %v4769_v60 = vpop.f32.mrf.mxu0 }
 0x52c   : > { %v1345_v62 = vpop.f32.mrf.mxu0 }
 0x52e   : > { %v4772_v0 = vpop.f32.mrf.mxu0 }
 0x530   : > { %v1348_v42 = vpop.f32.mrf.mxu0 }
 0x532   : > { %v4773_v47 = vpop.f32.mrf.mxu0 }
 0x555   : > { %v1261_v52 = vpop.f32.mrf.mxu1 }
 0x556   : > { %v6020_v2 = vadd.f32 %v1329_v51, %v1261_v52 }
 0x557   : > { %v4750_v57 = vpop.f32.mrf.mxu1 }
 0x559   : > { %v1264_v3 = vpop.f32.mrf.mxu1 }
 0x55a   : > { %v6022_v5 = vadd.f32 %v1332_v54, %v1264_v3 }
 0x55b   : > { %v4751_v7 = vpop.f32.mrf.mxu1 }
 0x55d   : > { %v1269_v8 = vpop.f32.mrf.mxu1 }
 0x55e   : > { %v6024_v11 = vadd.f32 %v1337_v43, %v1269_v8 }
 0x55f   : > { %v4754_v13 = vpop.f32.mrf.mxu1 }
 0x561   : > { %v1272_v17 = vpop.f32.mrf.mxu1 }
 0x562   : > { %v6026_v18 = vadd.f32 %v1340_v59, %v1272_v17 }
 0x563   : > { %v4755_v20 = vpop.f32.mrf.mxu1 }
 0x565   : > { %v1277_v22 = vpop.f32.mrf.mxu1 }
 0x566   : > { %v6028_v24 = vadd.f32 %v1345_v62, %v1277_v22 }
 0x567   : > { %v4758_v25 = vpop.f32.mrf.mxu1 }
 0x569   : > { %v1280_v61 = vpop.f32.mrf.mxu1 }
 0x56b   : > { %v4759_v29 = vpop.f32.mrf.mxu1 }
 0x56d   : > { %v1415_v12 = vpop.f32.mrf.mxu1 }
 0x56e   : > { %v1437_v30 = vmul.f32 0.35355338, %v1415_v12 }
 0x56f   : > { %v4782_v21 = vpop.f32.mrf.mxu1 }
 0x570   : > { %v1442_v4 = vadd.f32 %v1437_v30, %v5807_v58 }
 0x571   : > { %v1418_v26 = vpop.f32.mrf.mxu1 }
 0x572   : > { %v1438_v32 = vmul.f32 0.35355338, %v1418_v26  ;;  %v1447_v27 = vsel %vm840_vm3, %v1442_v4, -inf }
 0x573   : > { %1448 = vmax.xlane.f32.xlu0 %v1447_v27  ;;  %v4783_v34 = vpop.f32.mrf.mxu1 }
 0x574   : > { %v1443_v38 = vadd.f32 %v1438_v32, %v5815_v63 }
 0x575   : > { %v1423_v33 = vpop.f32.mrf.mxu1 }
 0x576   : > { %v1439_v35 = vmul.f32 0.35355338, %v1423_v33  ;;  %v1450_v31 = vsel %vm840_vm3, %v1443_v38, -inf }
 0x577   : > { %1451 = vmax.xlane.f32.xlu1 %v1450_v31  ;;  %v4786_v39 = vpop.f32.mrf.mxu1 }
 0x578   : > { %v1444_v40 = vadd.f32 %v1439_v35, %v5825_v6 }
 0x579   : > { %v1426_v44 = vpop.f32.mrf.mxu1 }
 0x57a   : > { %v1440_v45 = vmul.f32 0.35355338, %v1426_v44  ;;  %v1453_v36 = vsel %vm840_vm3, %v1444_v40, -inf }
 0x57b   : > { %1454 = vmax.xlane.f32.xlu0 %v1453_v36  ;;  %v4787_v46 = vpop.f32.mrf.mxu1 }
 0x57c   : > { %v1445_v48 = vadd.f32 %v1440_v45, %v5835_v16 }
 0x57d   : > { %v1431_v49 = vpop.f32.mrf.mxu1 }
 0x57e   : > { %v1441_v50 = vmul.f32 0.35355338, %v1431_v49  ;;  %v1456_v51 = vsel %vm840_vm3, %v1445_v48, -inf }
 0x57f   : > { %1457 = vmax.xlane.f32.xlu0 %v1456_v51  ;;  %v4790_v53 = vpop.f32.mrf.mxu1 }
 0x580   : > { %v1446_v54 = vadd.f32 %v1441_v50, %v5843_v23 }
 0x581   : > { %v1434_v55 = vpop.f32.mrf.mxu1 }
 0x582   : > { %v1459_v43 = vsel %vm840_vm3, %v1446_v54, -inf }
 0x583   : > { %1460 = vmax.xlane.f32.xlu0 %v1459_v43  ;;  %v4791_v56 = vpop.f32.mrf.mxu1 }
 0x588   : > { %1509 = vrot.lane.b32.xlu1 %v5751_v37, %s6964_s29 }
 0x58c   : > { %1505 = vrot.lane.b32.xlu1 %v5747_v28, %s6964_s29 }
 0x599   : > { %1507 = vrot.lane.b32.xlu0 %v5757_v41, %s6964_s29  ;;  %s4486_s29 = sshll.u32 %s5659_s2, 7  ;;  %s5532_s2 = smov [#allocation2]  }
 0x5fc   : > { %v1449_v59 = vpop.xlane.xlu0 %1448 }
 0x5fd   : > { %v1462_v60 = vsub.f32 %v1442_v4, %v1449_v59 }
 0x5ff   : > { %v1467_v62 = vmul.f32 1.442695, %v1462_v60 }
 0x600   : > { %v1452_v0 = vpop.xlane.xlu1 %1451 }
 0x601   : > { %5290 = vpow2.f32 %v1467_v62  ;;  %v1463_v42 = vsub.f32 %v1443_v38, %v1452_v0 }
 0x603   : > { %v1469_v47 = vmul.f32 1.442695, %v1463_v42 }
 0x604   : > { %v1510_v52 = vpop.permute.xlu1 %1509  ;;  %v1455_v57 = vpop.xlane.xlu0 %1454 }
 0x605   : > { %5292 = vpow2.f32 %v1469_v47  ;;  %v1523_v3 = vsel %vm916_vm4, %v1510_v52, 0  ;;  %v1464_v7 = vsub.f32 %v1444_v40, %v1455_v57 }
 0x606   : > { %4793 = vmatpush3.bf16.msra.mxu0 %v1523_v3 }
 0x607   : > { %v1471_v8 = vmul.f32 1.442695, %v1464_v7  ;;  %4794 = vmatprep.subr.bf16.mxu0 %v5519_v1 }
 0x608   : > { %v1458_v13 = vpop.xlane.xlu0 %1457  ;;  %v1506_v26 = vpop.permute.xlu1 %1505 }
 0x609   : > { %5294 = vpow2.f32 %v1471_v8  ;;  %v1465_v17 = vsub.f32 %v1445_v48, %v1458_v13  ;;  %v4356_v13 = vld [vmem:[%s6931_s6 + $0x8] sm:$0xf] }
 0x60b   : > { %v1473_v20 = vmul.f32 1.442695, %v1465_v17  ;;  %v1596_v17 = vsel %vm916_vm4, %v4356_v13, 0 }
 0x60c   : > { %v1461_v22 = vpop.xlane.xlu0 %1460  ;;  %4811 = vmatpush3.bf16.msra.mxu1 %v1596_v17 }
 0x60d   : > { %5296 = vpow2.f32 %v1473_v20  ;;  %v1466_v25 = vsub.f32 %v1446_v54, %v1461_v22  ;;  %4842 = vmatprep.subr.bf16.mxu1 %v5519_v1 }
 0x60e   : > { %v5291_v61 = vpop.eup %5290 }
 0x60f   : > { %v1475_v29 = vmul.f32 1.442695, %v1466_v25  ;;  %v1477_v12 = vsel %vm840_vm3, %v5291_v61, 0.0 }
 0x610   : > { %1478 = vadd.xlane.f32.xlu0 %v1477_v12  ;;  %v1508_v30 = vpop.permute.xlu0 %1507 }
 0x611   : > { %5298 = vpow2.f32 %v1475_v29  ;;  %4795 = vmatpush3.bf16.msra.mxu0 %v1508_v30 }
 0x612   : > { %v5293_v21 = vpop.eup %5292  ;;  %4796 = vmatprep.subr.bf16.mxu0 %v5519_v1 }
 0x613   : > { %v1480_v4 = vsel %vm840_vm3, %v5293_v21, 0.0 }
 0x614   : > { %1481 = vadd.xlane.f32.xlu1 %v1480_v4 }
 0x615   : > { %4797 = vmatpush3.bf16.msra.mxu0 %v1506_v26 }
 0x616   : > { %v5295_v32 = vpop.eup %5294  ;;  %4824 = vmatprep.subr.bf16.mxu0 %v5519_v1 }
 0x617   : > { %v1483_v27 = vsel %vm840_vm3, %v5295_v32, 0.0 }
 0x618   : > { %1484 = vadd.xlane.f32.xlu0 %v1483_v27 }
 0x61a   : > { %v5297_v34 = vpop.eup %5296 }
 0x61b   : > { %v1486_v38 = vsel %vm840_vm3, %v5297_v34, 0.0 }
 0x61c   : > { %1487 = vadd.xlane.f32.xlu1 %v1486_v38 }
 0x61e   : > { %v5299_v33 = vpop.eup %5298 }
 0x61f   : > { %v1489_v35 = vsel %vm840_vm3, %v5299_v33, 0.0 }
 0x620   : > { %1490 = vadd.xlane.f32.xlu0 %v1489_v35 }
 0x62d   : > { %1669 = vrot.lane.b32.xlu1 %v5751_v37, %s6962_s19 }
 0x631   : > { %1665 = vrot.lane.b32.xlu1 %v5747_v28, %s6962_s19 }
 0x635   : > { %1661 = vrot.lane.b32.xlu1 %v5757_v41, %s6960_s20 }
 0x636   : > { %1667 = vrot.lane.b32.xlu0 %v5757_v41, %s6962_s19 }
 0x63a   : > { %1659 = vrot.lane.b32.xlu0 %v5747_v28, %s6960_s20 }
 0x63e   : > { %1663 = vrot.lane.b32.xlu0 %v5751_v37, %s6960_s20  ;;  %s6996_s20 = smov 40  }
 0x699   : > { %v1479_v31 = vpop.xlane.xlu0 %1478 }
 0x69a   : > { %5300 = vrcp.f32 %v1479_v31 }
 0x69d   : > { %v1482_v39 = vpop.xlane.xlu1 %1481 }
 0x69e   : > { %5302 = vrcp.f32 %v1482_v39 }
 0x6a1   : > { %v1485_v40 = vpop.xlane.xlu0 %1484 }
 0x6a2   : > { %5304 = vrcp.f32 %v1485_v40 }
 0x6a5   : > { %v1488_v44 = vpop.xlane.xlu1 %1487 }
 0x6a6   : > { %5306 = vrcp.f32 %v1488_v44 }
 0x6a7   : > { %v5301_v45 = vpop.eup %5300 }
 0x6a8   : > { %v1497_v48 = vmul.f32 %v5301_v45, %v5291_v61 }
 0x6a9   : > { %v1491_v36 = vpop.xlane.xlu0 %1490  ;;  %v1670_v50 = vpop.permute.xlu1 %1669 }
 0x6aa   : > { %5308 = vrcp.f32 %v1491_v36  ;;  %v1687_v53 = vsel %vm755_vm2, %v1670_v50, 0 }
 0x6ab   : > { %v5303_v46 = vpop.eup %5302 }
 0x6ac   : > { %v1498_v49 = vmul.f32 %v5303_v46, %v5293_v21 }
 0x6ad   : > { %v1668_v59 = vpop.permute.xlu0 %1667  ;;  %v1666_v47 = vpop.permute.xlu1 %1665 }
 0x6ae   : > { %v1502_v51 = vpack.c.bf16 %v1498_v49, %v1497_v48  ;;  %v1684_v0 = vsel %vm755_vm2, %v1668_v59, 0  ;;  %v1681_v57 = vsel %vm755_vm2, %v1666_v47, 0 }
 0x6af   : > { %v5305_v54 = vpop.eup %5304 }
 0x6b0   : > { %4799 = vmatmul.mubr.msk.bf16.vlgmr.msra.gmra.mxu0 %vm840_vm3, %v1502_v51  ;;  %v1499_v43 = vmul.f32 %v5305_v54, %v5295_v32 }
 0x6b1   : > { %4825 = vmatpush3.bf16.xpose.msra.mxu0 %v1687_v53  ;;  %4802 = vmatprep.mubr.msk.bf16.mxu0 %vm5520_vm0, %v5519_v1  ;;  %v1660_v3 = vpop.permute.xlu0 %1659  ;;  %v1662_v7 = vpop.permute.xlu1 %1661 }
 0x6b2   : > { %4826 = vmatprep.subr.bf16.mxu0 %v5519_v1 }
 0x6b3   : > { %v5307_v55 = vpop.eup %5306 }
 0x6b4   : > { %v1500_v56 = vmul.f32 %v5307_v55, %v5297_v34 }
 0x6b5   : > { %v1664_v8 = vpop.permute.xlu0 %1663 }
 0x6b6   : > { %v1503_v60 = vpack.c.bf16 %v1500_v56, %v1499_v43 }
 0x6b7   : > { %v5309_v62 = vpop.eup %5308 }
 0x6b8   : > { %4803 = vmatmul.mubr.msk.bf16.gmra.mxu0 %vm840_vm3, %v1503_v60  ;;  %v1501_v42 = vmul.f32 %v5309_v62, %v5299_v33 }
 0x6b9   : > { %4827 = vmatpush3.bf16.xpose.msra.mxu0 %v1684_v0  ;;  %4806 = vmatprep.mubr.msk.bf16.mxu0 %vm5520_vm0, %v5519_v1 }
 0x6ba   : > { %4828 = vmatprep.subr.bf16.mxu0 %v5519_v1  ;;  %v1504_v52 = vpack.c.bf16 %v1501_v42, %v1501_v42 }
 0x6c0   : > { %4807 = vmatmul.mubr.msk.bf16.gmra.mxu0 %vm840_vm3, %v1504_v52 }
 0x6c1   : > { %4829 = vmatpush3.bf16.xpose.msra.mxu0 %v1681_v57  ;;  %4830 = vmatprep.mubr.msk.bf16.mxu0 %vm5520_vm0, %v5519_v1 }
 0x6c2   : > { %4860 = vmatprep.subr.bf16.mxu0 %v5519_v1 }
 0x6c8   : > { %4831 = vmatmul.mubr.msk.bf16.vlgmr.msra.gmra.mxu0 %vm755_vm2, %v1660_v3 }
 0x6c9   : > { %4834 = vmatprep.mubr.msk.bf16.mxu0 %vm5520_vm0, %v5519_v1 }
 0x6d0   : > { %4835 = vmatmul.mubr.msk.bf16.gmra.mxu0 %vm755_vm2, %v1662_v7 }
 0x6d1   : > { %4838 = vmatprep.mubr.msk.bf16.mxu0 %vm5520_vm0, %v5519_v1 }
 0x6d8   : > { %4839 = vmatmul.mubr.msk.bf16.gmra.mxu0 %vm755_vm2, %v1664_v8 }
 0x6d9   : > { %4862 = vmatprep.mubr.msk.bf16.mxu0 %vm5520_vm0, %v5519_v1 }
 0x770   : > { %v1559_v20 = vpop.f32.mrf.mxu0 }
 0x772   : > { %v4800_v22 = vpop.f32.mrf.mxu0 }
 0x774   : > { %v1562_v25 = vpop.f32.mrf.mxu0 }
 0x775   : > { %v1581_v61 = vpack.c.bf16 %v1562_v25, %v1559_v20 }
 0x776   : > { %v4801_v29 = vpop.f32.mrf.mxu0 }
 0x777   : > { %4813 = vmatmul.mubr.msk.bf16.vlgmr.msra.gmra.mxu1 %vm755_vm2, %v1581_v61 }
 0x778   : > { %v1567_v12 = vpop.f32.mrf.mxu0  ;;  %4816 = vmatprep.mubr.msk.bf16.mxu1 %vm5520_vm0, %v5519_v1 }
 0x77a   : > { %v4804_v30 = vpop.f32.mrf.mxu0 }
 0x77c   : > { %v1570_v21 = vpop.f32.mrf.mxu0 }
 0x77d   : > { %v1582_v4 = vpack.c.bf16 %v1570_v21, %v1567_v12 }
 0x77e   : > { %v4805_v26 = vpop.f32.mrf.mxu0 }
 0x77f   : > { %4817 = vmatmul.mubr.msk.bf16.gmra.mxu1 %vm755_vm2, %v1582_v4 }
 0x780   : > { %v1575_v32 = vpop.f32.mrf.mxu0  ;;  %4820 = vmatprep.mubr.msk.bf16.mxu1 %vm5520_vm0, %v5519_v1 }
 0x781   : > { %v1583_v38 = vpack.c.bf16 %v1575_v32, %v1575_v32 }
 0x782   : > { %v4808_v27 = vpop.f32.mrf.mxu0 }
 0x784   : > { %v1578_v34 = vpop.f32.mrf.mxu0 }
 0x786   : > { %v4809_v33 = vpop.f32.mrf.mxu0 }
 0x787   : > { %4821 = vmatmul.mubr.msk.bf16.gmra.mxu1 %vm755_vm2, %v1583_v38 }
 0x788   : > { %v1723_v35 = vpop.f32.mrf.mxu0  ;;  %4848 = vmatprep.mubr.msk.bf16.mxu1 %vm5520_vm0, %v5519_v1 }
 0x789   : > { %v1745_v31 = vmul.f32 0.35355338, %v1723_v35 }
 0x78a   : > { %v4832_v39 = vpop.f32.mrf.mxu0 }
 0x78b   : > { %v1750_v40 = vadd.f32 %v1745_v31, %v5807_v58 }
 0x78c   : > { %v1726_v44 = vpop.f32.mrf.mxu0 }
 0x78d   : > { %v1746_v45 = vmul.f32 0.35355338, %v1726_v44  ;;  %v1755_v36 = vsel %vm840_vm3, %v1750_v40, -inf }
 0x78e   : > { %1756 = vmax.xlane.f32.xlu1 %v1755_v36  ;;  %v4833_v46 = vpop.f32.mrf.mxu0 }
 0x78f   : > { %v1751_v48 = vadd.f32 %v1746_v45, %v5815_v63 }
 0x790   : > { %v1731_v49 = vpop.f32.mrf.mxu0 }
 0x791   : > { %v1747_v50 = vmul.f32 0.35355338, %v1731_v49  ;;  %v1758_v51 = vsel %vm840_vm3, %v1751_v48, -inf }
 0x792   : > { %1759 = vmax.xlane.f32.xlu0 %v1758_v51  ;;  %v4836_v53 = vpop.f32.mrf.mxu0 }
 0x793   : > { %v1752_v54 = vadd.f32 %v1747_v50, %v5825_v6 }
 0x794   : > { %v1734_v55 = vpop.f32.mrf.mxu0 }
 0x795   : > { %v1748_v43 = vmul.f32 0.35355338, %v1734_v55  ;;  %v1761_v58 = vsel %vm840_vm3, %v1752_v54, -inf }
 0x796   : > { %1762 = vmax.xlane.f32.xlu0 %v1761_v58  ;;  %v4837_v56 = vpop.f32.mrf.mxu0 }
 0x797   : > { %v1753_v59 = vadd.f32 %v1748_v43, %v5835_v16 }
 0x798   : > { %v1739_v60 = vpop.f32.mrf.mxu0 }
 0x799   : > { %v1749_v62 = vmul.f32 0.35355338, %v1739_v60  ;;  %v1764_v63 = vsel %vm840_vm3, %v1753_v59, -inf }
 0x79a   : > { %1765 = vmax.xlane.f32.xlu1 %v1764_v63  ;;  %v4840_v0 = vpop.f32.mrf.mxu0 }
 0x79b   : > { %v1754_v42 = vadd.f32 %v1749_v62, %v5843_v23 }
 0x79c   : > { %v1742_v47 = vpop.f32.mrf.mxu0 }
 0x79d   : > { %v1767_v52 = vsel %vm840_vm3, %v1754_v42, -inf }
 0x79e   : > { %1768 = vmax.xlane.f32.xlu0 %v1767_v52  ;;  %v4841_v6 = vpop.f32.mrf.mxu0 }
 0x7ab   : > { %1817 = vrot.lane.b32.xlu1 %v5751_v37, %s6958_s1 }
 0x817   : > { %v1757_v57 = vpop.xlane.xlu1 %1756 }
 0x818   : > { %v1770_v3 = vsub.f32 %v1750_v40, %v1757_v57 }
 0x81a   : > { %v1775_v16 = vmul.f32 1.442695, %v1770_v3 }
 0x81b   : > { %v1760_v7 = vpop.xlane.xlu0 %1759 }
 0x81c   : > { %5310 = vpow2.f32 %v1775_v16  ;;  %v1771_v8 = vsub.f32 %v1751_v48, %v1760_v7 }
 0x81e   : > { %v1777_v13 = vmul.f32 1.442695, %v1771_v8 }
 0x81f   : > { %v1763_v17 = vpop.xlane.xlu0 %1762 }
 0x820   : > { %5312 = vpow2.f32 %v1777_v13  ;;  %v1772_v20 = vsub.f32 %v1752_v54, %v1763_v17  ;;  %v4366_v17 = vld [vmem:[%s6931_s6 + $0xc] sm:$0xf] }
 0x822   : > { %v1779_v23 = vmul.f32 1.442695, %v1772_v20  ;;  %v1904_v20 = vsel %vm916_vm4, %v4366_v17, 0 }
 0x823   : > { %v1766_v22 = vpop.xlane.xlu1 %1765  ;;  %4861 = vmatpush3.bf16.msra.mxu0 %v1904_v20 }
 0x824   : > { %5314 = vpow2.f32 %v1779_v23  ;;  %v1773_v25 = vsub.f32 %v1753_v59, %v1766_v22  ;;  %4890 = vmatprep.subr.bf16.mxu0 %v5519_v1 }
 0x826   : > { %v1781_v61 = vmul.f32 1.442695, %v1773_v25 }
 0x827   : > { %v1818_v29 = vpop.permute.xlu1 %1817  ;;  %v1769_v53 = vpop.xlane.xlu0 %1768 }
 0x828   : > { %5316 = vpow2.f32 %v1781_v61  ;;  %v1831_v12 = vsel %vm916_vm4, %v1818_v29, 0 }
 0x829   : > { %v5311_v37 = vpop.eup %5310  ;;  %4843 = vmatpush3.bf16.msra.mxu1 %v1831_v12 }
 0x82a   : > { %v1785_v30 = vsel %vm840_vm3, %v5311_v37, 0.0  ;;  %4844 = vmatprep.subr.bf16.mxu1 %v5519_v1 }
 0x82b   : > { %1786 = vadd.xlane.f32.xlu1 %v1785_v30 }
 0x82d   : > { %v5313_v21 = vpop.eup %5312 }
 0x82e   : > { %v1788_v4 = vsel %vm840_vm3, %v5313_v21, 0.0 }
 0x82f   : > { %1789 = vadd.xlane.f32.xlu0 %v1788_v4 }
 0x831   : > { %v5315_v26 = vpop.eup %5314 }
 0x832   : > { %v1791_v32 = vsel %vm840_vm3, %v5315_v26, 0.0 }
 0x833   : > { %1792 = vadd.xlane.f32.xlu1 %v1791_v32 }
 0x835   : > { %v5317_v27 = vpop.eup %5316 }
 0x836   : > { %v1794_v34 = vsel %vm840_vm3, %v5317_v27, 0.0 }
 0x837   : > { %v1632_v38 = vpop.f32.mrf.mxu1  ;;  %1795 = vadd.xlane.f32.xlu0 %v1794_v34 }
 0x838   : > { %v6124_v33 = vadd.f32 %v1632_v38, %v6020_v2 }
 0x839   : > { %v4814_v35 = vpop.f32.mrf.mxu1 }
 0x83b   : > { %v1635_v31 = vpop.f32.mrf.mxu1 }
 0x83c   : > { %v6127_v39 = vadd.f32 %v1635_v31, %v6022_v5  ;;  %v4370_v31 = vld [vmem:[%s6932_s7] ss:$0 sm:$0xff] }
 0x83d   : > { %v4815_v40 = vpop.f32.mrf.mxu1 }
 0x83f   : > { %v1640_v44 = vpop.f32.mrf.mxu1 }
 0x840   : > { %v6130_v45 = vadd.f32 %v1640_v44, %v6024_v11  ;;  %v1774_v11 = vsub.f32 %v1754_v42, %v1769_v53 }
 0x841   : > { %v4818_v36 = vpop.f32.mrf.mxu1 }
 0x842   : > { %v1783_v55 = vmul.f32 1.442695, %v1774_v11 }
 0x843   : > { %v1643_v46 = vpop.f32.mrf.mxu1 }
 0x844   : > { %v6133_v48 = vadd.f32 %v1643_v46, %v6026_v18  ;;  %1813 = vrot.lane.b32.xlu1 %v5747_v28, %s6958_s1  ;;  %5318 = vpow2.f32 %v1783_v55 }
 0x845   : > { %v4819_v2 = vpop.f32.mrf.mxu1 }
 0x847   : > { %v1648_v49 = vpop.f32.mrf.mxu1 }
 0x848   : > { %v6138_v50 = vadd.f32 %v1648_v49, %v6028_v24 }
 0x849   : > { %v4822_v5 = vpop.f32.mrf.mxu1 }
 0x84b   : > { %v1651_v51 = vpop.f32.mrf.mxu1 }
 0x84d   : > { %v4823_v54 = vpop.f32.mrf.mxu1  ;;  %1815 = vrot.lane.b32.xlu0 %v5757_v41, %s6958_s1  ;;  %s6993_s1 = smov 48  }
 0x851   : > { %v5319_v18 = vpop.eup %5318 }
 0x852   : > { %v1797_v43 = vsel %vm840_vm3, %v5319_v18, 0.0 }
 0x868   : > { %1798 = vadd.xlane.f32.xlu1 %v1797_v43 }
 0x8b4   : > { %v1787_v28 = vpop.xlane.xlu1 %1786 }
 0x8b5   : > { %5320 = vrcp.f32 %v1787_v28 }
 0x8b8   : > { %v1790_v58 = vpop.xlane.xlu0 %1789 }
 0x8b9   : > { %5322 = vrcp.f32 %v1790_v58 }
 0x8bc   : > { %v1793_v24 = vpop.xlane.xlu1 %1792 }
 0x8bd   : > { %5324 = vrcp.f32 %v1793_v24 }
 0x8c0   : > { %v1796_v56 = vpop.xlane.xlu0 %1795  ;;  %v1814_v0 = vpop.permute.xlu1 %1813 }
 0x8c1   : > { %5326 = vrcp.f32 %v1796_v56 }
 0x8c2   : > { %v5321_v59 = vpop.eup %5320 }
 0x8c3   : > { %v1805_v41 = vmul.f32 %v5321_v59, %v5311_v37 }
 0x8c4   : > { %v1816_v60 = vpop.permute.xlu0 %1815 }
 0x8c5   : > { %4845 = vmatpush3.bf16.msra.mxu1 %v1816_v60 }
 0x8c6   : > { %v5323_v62 = vpop.eup %5322  ;;  %4846 = vmatprep.subr.bf16.mxu1 %v5519_v1 }
 0x8c7   : > { %v1806_v63 = vmul.f32 %v5323_v62, %v5313_v21 }
 0x8c9   : > { %4847 = vmatpush3.bf16.msra.mxu1 %v1814_v0  ;;  %v1810_v42 = vpack.c.bf16 %v1806_v63, %v1805_v41 }
 0x8ca   : > { %4874 = vmatprep.subr.bf16.mxu1 %v5519_v1  ;;  %v5325_v47 = vpop.eup %5324 }
 0x8cb   : > { %v1807_v6 = vmul.f32 %v5325_v47, %v5315_v26 }
 0x8cc   : > { %4849 = vmatmul.mubr.msk.bf16.vlgmr.msra.gmra.mxu1 %vm840_vm3, %v1810_v42 }
 0x8cd   : > { %4852 = vmatprep.mubr.msk.bf16.mxu1 %vm5520_vm0, %v5519_v1 }
 0x8ce   : > { %v5327_v52 = vpop.eup %5326 }
 0x8cf   : > { %v1808_v57 = vmul.f32 %v5327_v52, %v5317_v27 }
 0x8d1   : > { %v1811_v3 = vpack.c.bf16 %v1808_v57, %v1807_v6 }
 0x8d4   : > { %4853 = vmatmul.mubr.msk.bf16.gmra.mxu1 %vm840_vm3, %v1811_v3 }
 0x8d5   : > { %4856 = vmatprep.mubr.msk.bf16.mxu1 %vm5520_vm0, %v5519_v1 }
 0x8f1   : > { %v1799_v16 = vpop.xlane.xlu1 %1798 }
 0x8f2   : > { %5328 = vrcp.f32 %v1799_v16 }
 0x8ff   : > { %v5329_v7 = vpop.eup %5328 }
 0x900   : > { %v1809_v8 = vmul.f32 %v5329_v7, %v5319_v18 }
 0x902   : > { %v1812_v13 = vpack.c.bf16 %v1809_v8, %v1809_v8 }
 0x904   : > { %4857 = vmatmul.mubr.msk.bf16.gmra.mxu1 %vm840_vm3, %v1812_v13 }
 0x905   : > { %4878 = vmatprep.mubr.msk.bf16.mxu1 %vm5520_vm0, %v5519_v1 }
 0x98c   : > { %v1867_v23 = vpop.f32.mrf.mxu1 }
 0x98e   : > { %v4850_v22 = vpop.f32.mrf.mxu1 }
 0x990   : > { %v1870_v25 = vpop.f32.mrf.mxu1 }
 0x991   : > { %v1889_v61 = vpack.c.bf16 %v1870_v25, %v1867_v23 }
 0x992   : > { %v4851_v29 = vpop.f32.mrf.mxu1 }
 0x993   : > { %4863 = vmatmul.mubr.msk.bf16.vlgmr.msra.gmra.mxu0 %vm755_vm2, %v1889_v61 }
 0x994   : > { %v1875_v12 = vpop.f32.mrf.mxu1  ;;  %4866 = vmatprep.mubr.msk.bf16.mxu0 %vm5520_vm0, %v5519_v1 }
 0x996   : > { %v4854_v37 = vpop.f32.mrf.mxu1 }
 0x997   : > { %v5235_v37 = vld [vmem:[%s6933_s8] sm:$0xff]  }
 0x998   : > { %v1878_v30 = vpop.f32.mrf.mxu1 }
 0x999   : > { %v1890_v21 = vpack.c.bf16 %v1878_v30, %v1875_v12  ;;  %v5234_v12 = vld [vmem:[%s6933_s8 + $0x8] sm:$0xff]  }
 0x99a   : > { %v4855_v4 = vpop.f32.mrf.mxu1  ;;  %4875 = vmatpush3.bf16.msra.mxu1 %v5234_v12 }
 0x99b   : > { %4867 = vmatmul.mubr.msk.bf16.gmra.mxu0 %vm755_vm2, %v1890_v21  ;;  %4876 = vmatprep.subr.bf16.mxu1 %v5519_v1 }
 0x99c   : > { %4870 = vmatprep.mubr.msk.bf16.mxu0 %vm5520_vm0, %v5519_v1 }
 0x99e   : > { %4877 = vmatpush3.bf16.msra.mxu1 %v5235_v37 }
 0x99f   : > { %4910 = vmatprep.subr.bf16.mxu1 %v5519_v1 }
 0x9c4   : > { %v1883_v26 = vpop.f32.mrf.mxu1 }
 0x9c5   : > { %v1891_v32 = vpack.c.bf16 %v1883_v26, %v1883_v26 }
 0x9c6   : > { %v4858_v27 = vpop.f32.mrf.mxu1 }
 0x9c7   : > { %4871 = vmatmul.mubr.msk.bf16.gmra.mxu0 %vm755_vm2, %v1891_v32  ;;  %v5236_v27 = vld [vmem:[%s6935_s10 + $0x18] sm:$0xff]  }
 0x9c8   : > { %v1886_v34 = vpop.f32.mrf.mxu1  ;;  %4898 = vmatprep.mubr.msk.bf16.mxu0 %vm5520_vm0, %v5519_v1  ;;  %4891 = vmatpush3.bf16.msra.mxu0 %v5236_v27 }
 0x9c9   : > { %4892 = vmatprep.subr.bf16.mxu0 %v5519_v1 }
 0x9ca   : > { %v4859_v38 = vpop.f32.mrf.mxu1 }
 0xa53   : > { %v1940_v35 = vpop.f32.mrf.mxu0 }
 0xa54   : > { %v1962_v40 = vadd.f32 %v1940_v35, %v6124_v33 }
 0xa55   : > { %v4864_v44 = vpop.f32.mrf.mxu0 }
 0xa56   : > { %v1974_v36 = vadd.f32 %v4370_v31, %v1962_v40 }
 0xa57   : > { %v1943_v46 = vpop.f32.mrf.mxu0 }
 0xa58   : > { %v1963_v2 = vadd.f32 %v1943_v46, %v6127_v39  ;;  %v1979_v49 = vadd.f32 %v1974_v36, %v5716_v9 }
 0xa59   : > { %v4865_v5 = vpop.f32.mrf.mxu0 }
 0xa5a   : > { %v1975_v51 = vadd.f32 %v4370_v31, %v1963_v2  ;;  %v1986_v53 = vsel %vm677_vm1, %v1979_v49, 0.0 }
 0xa5b   : > { %1987 = vadd.xlane.f32.xlu0 %v1986_v53  ;;  %v1948_v54 = vpop.f32.mrf.mxu0 }
 0xa5c   : > { %v1964_v11 = vadd.f32 %v1948_v54, %v6130_v45  ;;  %v1980_v55 = vadd.f32 %v1975_v51, %v5718_v10 }
 0xa5d   : > { %v4868_v18 = vpop.f32.mrf.mxu0 }
 0xa5e   : > { %v1976_v43 = vadd.f32 %v4370_v31, %v1964_v11  ;;  %v1989_v33 = vsel %vm677_vm1, %v1980_v55, 0.0  ;;  %v4371_v11 = vld [vmem:[%s6937_s12] ss:$0 sm:$0xff] }
 0xa5f   : > { %1990 = vadd.xlane.f32.xlu0 %v1989_v33  ;;  %v1951_v28 = vpop.f32.mrf.mxu0  ;;  %v4372_v33 = vld [vmem:[%s6938_s13] ss:$0 sm:$0xff] }
 0xa60   : > { %v1965_v39 = vadd.f32 %v1951_v28, %v6133_v48  ;;  %v1981_v9 = vadd.f32 %v1976_v43, %v5723_v14 }
 0xa61   : > { %v4869_v58 = vpop.f32.mrf.mxu0 }
 0xa62   : > { %v1977_v24 = vadd.f32 %v4370_v31, %v1965_v39  ;;  %v1992_v56 = vsel %vm677_vm1, %v1981_v9, 0.0 }
 0xa63   : > { %1993 = vadd.xlane.f32.xlu1 %v1992_v56 }
 0xa64   : > { %v1982_v59 = vadd.f32 %v1977_v24, %v5725_v15 }
 0xa66   : > { %v1995_v45 = vsel %vm677_vm1, %v1982_v59, 0.0 }
 0xa67   : > { %1996 = vadd.xlane.f32.xlu0 %v1995_v45 }
 0xa87   : > { %v1956_v10 = vpop.f32.mrf.mxu0 }
 0xa88   : > { %v1966_v60 = vadd.f32 %v1956_v10, %v6138_v50 }
 0xa89   : > { %v4872_v62 = vpop.f32.mrf.mxu0 }
 0xa8a   : > { %v1978_v41 = vadd.f32 %v4370_v31, %v1966_v60 }
 0xa8b   : > { %v1959_v63 = vpop.f32.mrf.mxu0 }
 0xa8c   : > { %v1983_v48 = vadd.f32 %v1978_v41, %v5735_v19 }
 0xa8d   : > { %v4873_v0 = vpop.f32.mrf.mxu0 }
 0xa8e   : > { %v1998_v14 = vsel %vm677_vm1, %v1983_v48, 0.0 }
 0xa8f   : > { %1999 = vadd.xlane.f32.xlu1 %v1998_v14 }
 0xae4   : > { %v1988_v42 = vpop.xlane.xlu0 %1987 }
 0xae5   : > { %v2002_v47 = vmul.f32 0.03125, %v1988_v42 }
 0xae7   : > { %v2007_v52 = vsub.f32 %v1979_v49, %v2002_v47 }
 0xae8   : > { %v1991_v6 = vpop.xlane.xlu0 %1990 }
 0xae9   : > { %v2003_v15 = vmul.f32 0.03125, %v1991_v6  ;;  %v2012_v57 = vmul.f32 %v2007_v52, %v2007_v52 }
 0xaeb   : > { %v2008_v3 = vsub.f32 %v1980_v55, %v2003_v15  ;;  %v2017_v16 = vsel %vm677_vm1, %v2012_v57, 0.0  ;;  %v5237_v57 = vld [vmem:[%s6935_s10 + $0x10] sm:$0xff]  }
 0xaec   : > { %v1994_v7 = vpop.xlane.xlu1 %1993  ;;  %2018 = vadd.xlane.f32.xlu0 %v2017_v16  ;;  %4893 = vmatpush3.bf16.msra.mxu0 %v5237_v57  ;;  %v5239_v16 = vld [vmem:[%s6935_s10] sm:$0xff]  }
 0xaed   : > { %v2004_v50 = vmul.f32 0.03125, %v1994_v7  ;;  %v2013_v8 = vmul.f32 %v2008_v3, %v2008_v3  ;;  %4894 = vmatprep.subr.bf16.mxu0 %v5519_v1  ;;  %v4373_v7 = vld [vmem:[%s6934_s9] ss:$0 sm:$0xff] }
 0xaef   : > { %v2009_v13 = vsub.f32 %v1981_v9, %v2004_v50  ;;  %v2020_v19 = vsel %vm677_vm1, %v2013_v8, 0.0 }
 0xaf0   : > { %v1997_v17 = vpop.xlane.xlu0 %1996  ;;  %2021 = vadd.xlane.f32.xlu1 %v2020_v19 }
 0xaf1   : > { %v2005_v20 = vmul.f32 0.03125, %v1997_v17  ;;  %v2014_v23 = vmul.f32 %v2009_v13, %v2009_v13 }
 0xaf3   : > { %v2010_v22 = vsub.f32 %v1982_v59, %v2005_v20  ;;  %v2023_v25 = vsel %vm677_vm1, %v2014_v23, 0.0 }
 0xaf4   : > { %2024 = vadd.xlane.f32.xlu0 %v2023_v25 }
 0xaf5   : > { %v2015_v61 = vmul.f32 %v2010_v22, %v2010_v22 }
 0xaf7   : > { %v2026_v29 = vsel %vm677_vm1, %v2015_v61, 0.0 }
 0xaf8   : > { %2027 = vadd.xlane.f32.xlu1 %v2026_v29 }
 0xb18   : > { %v2000_v30 = vpop.xlane.xlu1 %1999 }
 0xb19   : > { %v2006_v21 = vmul.f32 0.03125, %v2000_v30 }
 0xb1b   : > { %v2011_v4 = vsub.f32 %v1983_v48, %v2006_v21 }
 0xb1d   : > { %v2016_v26 = vmul.f32 %v2011_v4, %v2011_v4 }
 0xb1f   : > { %v2029_v32 = vsel %vm677_vm1, %v2016_v26, 0.0 }
 0xb20   : > { %2030 = vadd.xlane.f32.xlu0 %v2029_v32 }
 0xb75   : > { %v2019_v34 = vpop.xlane.xlu0 %2018 }
 0xb76   : > { %v2032_v38 = vmul.f32 0.03125, %v2019_v34 }
 0xb78   : > { %v2037_v35 = vadd.f32 1e-05, %v2032_v38 }
 0xb79   : > { %v2022_v31 = vpop.xlane.xlu1 %2021 }
 0xb7a   : > { %5330 = vrsqrt.f32 %v2037_v35  ;;  %v2033_v40 = vmul.f32 0.03125, %v2022_v31 }
 0xb7c   : > { %v2038_v44 = vadd.f32 1e-05, %v2033_v40 }
 0xb7d   : > { %v2025_v36 = vpop.xlane.xlu0 %2024 }
 0xb7e   : > { %5332 = vrsqrt.f32 %v2038_v44  ;;  %v2034_v46 = vmul.f32 0.03125, %v2025_v36  ;;  %v4379_v36 = vld [vmem:[%s6936_s11] ss:$0 sm:$0xff] }
 0xb80   : > { %v2039_v2 = vadd.f32 1e-05, %v2034_v46 }
 0xb81   : > { %v2028_v49 = vpop.xlane.xlu1 %2027 }
 0xb82   : > { %5334 = vrsqrt.f32 %v2039_v2  ;;  %v2035_v5 = vmul.f32 0.03125, %v2028_v49 }
 0xb84   : > { %v2040_v51 = vadd.f32 1e-05, %v2035_v5 }
 0xb86   : > { %5336 = vrsqrt.f32 %v2040_v51 }
 0xb87   : > { %v5331_v53 = vpop.eup %5330 }
 0xb88   : > { %v2047_v54 = vmul.f32 %v5331_v53, %v2007_v52 }
 0xb8a   : > { %v2058_v18 = vmul.f32 %v4371_v11, %v2047_v54 }
 0xb8b   : > { %v5333_v55 = vpop.eup %5332 }
 0xb8c   : > { %v2048_v43 = vmul.f32 %v5333_v55, %v2008_v3  ;;  %v6209_v9 = vadd.f32 %v4372_v33, %v2058_v18  ;;  %v5238_v3 = vld [vmem:[%s6935_s10 + $0x8] sm:$0xff]  }
 0xb8d   : > { %4895 = vmatpush3.bf16.msra.mxu0 %v5238_v3 }
 0xb8e   : > { %v2059_v28 = vmul.f32 %v4371_v11, %v2048_v43  ;;  %4896 = vmatprep.subr.bf16.mxu0 %v5519_v1 }
 0xb8f   : > { %v5335_v39 = vpop.eup %5334 }
 0xb90   : > { %v6211_v58 = vadd.f32 %v4372_v33, %v2059_v28  ;;  %v2049_v24 = vmul.f32 %v5335_v39, %v2009_v13 }
 0xb91   : > { %4897 = vmatpush3.bf16.msra.mxu0 %v5239_v16 }
 0xb92   : > { %v2074_v56 = vpack.c.bf16 %v6211_v58, %v6209_v9  ;;  %v2060_v10 = vmul.f32 %v4371_v11, %v2049_v24  ;;  %4926 = vmatprep.subr.bf16.mxu0 %v5519_v1 }
 0xb93   : > { %v5337_v59 = vpop.eup %5336 }
 0xb94   : > { %4879 = vmatmul.mubr.msk.bf16.vlgmr.msra.gmra.mxu1 %vm677_vm1, %v2074_v56  ;;  %v2050_v45 = vmul.f32 %v5337_v59, %v2010_v22  ;;  %v6218_v62 = vadd.f32 %v4372_v33, %v2060_v10 }
 0xb95   : > { %4882 = vmatprep.mubr.msk.bf16.mxu1 %vm5520_vm0, %v5519_v1 }
 0xb96   : > { %v2061_v60 = vmul.f32 %v4371_v11, %v2050_v45 }
 0xb98   : > { %v6220_v41 = vadd.f32 %v4372_v33, %v2061_v60 }
 0xb9a   : > { %v2075_v63 = vpack.c.bf16 %v6220_v41, %v6218_v62 }
 0xb9c   : > { %4883 = vmatmul.mubr.msk.bf16.gmra.mxu1 %vm677_vm1, %v2075_v63 }
 0xb9d   : > { %4886 = vmatprep.mubr.msk.bf16.mxu1 %vm5520_vm0, %v5519_v1 }
 0xba9   : > { %v2031_v48 = vpop.xlane.xlu0 %2030 }
 0xbaa   : > { %v2036_v0 = vmul.f32 0.03125, %v2031_v48 }
 0xbac   : > { %v2041_v14 = vadd.f32 1e-05, %v2036_v0 }
 0xbae   : > { %5338 = vrsqrt.f32 %v2041_v14 }
 0xbbb   : > { %v5339_v42 = vpop.eup %5338 }
 0xbbc   : > { %v2051_v47 = vmul.f32 %v5339_v42, %v2011_v4 }
 0xbbe   : > { %v2062_v52 = vmul.f32 %v4371_v11, %v2051_v47 }
 0xbc0   : > { %v6227_v6 = vadd.f32 %v4372_v33, %v2062_v52 }
 0xbc2   : > { %v2076_v15 = vpack.c.bf16 %v6227_v6, %v6227_v6 }
 0xbc4   : > { %4887 = vmatmul.mubr.msk.bf16.gmra.mxu1 %vm677_vm1, %v2076_v15 }
 0xbc5   : > { %4914 = vmatprep.mubr.msk.bf16.mxu1 %vm5520_vm0, %v5519_v1 }
 0xc54   : > { %v2143_v50 = vpop.f32.mrf.mxu1 }
 0xc55   : > { %v2144_v13 = vadd.f32 %v4373_v7, %v2143_v50 }
 0xc56   : > { %v4880_v8 = vpop.f32.mrf.mxu1 }
 0xc57   : > { %v2165_v23 = vmax.f32 %v2144_v13, 0.0 }
 0xc58   : > { %v2146_v19 = vpop.f32.mrf.mxu1 }
 0xc59   : > { %v2147_v17 = vadd.f32 %v4373_v7, %v2146_v19 }
 0xc5a   : > { %v4881_v20 = vpop.f32.mrf.mxu1 }
 0xc5b   : > { %v2166_v22 = vmax.f32 %v2147_v17, 0.0 }
 0xc5c   : > { %v2151_v25 = vpop.f32.mrf.mxu1 }
 0xc5d   : > { %v2170_v61 = vpack.c.bf16 %v2166_v22, %v2165_v23  ;;  %v2152_v12 = vadd.f32 %v4373_v7, %v2151_v25 }
 0xc5e   : > { %v4884_v29 = vpop.f32.mrf.mxu1 }
 0xc5f   : > { %4899 = vmatmul.mubr.msk.bf16.vlgmr.msra.gmra.mxu0 %vm2212_vm5, %v2170_v61  ;;  %v2167_v4 = vmax.f32 %v2152_v12, 0.0  ;;  %v5240_v29 = vld [vmem:[%s6987_s21 + $0x18] sm:$0xff]   ;;  %v5241_v12 = vld [vmem:[%s6987_s21 + $0x10] sm:$0xff]  }
 0xc60   : > { %v2154_v37 = vpop.f32.mrf.mxu1  ;;  %4902 = vmatprep.mubr.msk.bf16.mxu0 %vm5520_vm0, %v5519_v1  ;;  %4911 = vmatpush3.bf16.msra.mxu1 %v5240_v29 }
 0xc61   : > { %v2155_v30 = vadd.f32 %v4373_v7, %v2154_v37  ;;  %4912 = vmatprep.subr.bf16.mxu1 %v5519_v1 }
 0xc62   : > { %v4885_v21 = vpop.f32.mrf.mxu1 }
 0xc63   : > { %v2168_v26 = vmax.f32 %v2155_v30, 0.0 }
 0xc64   : > { %4913 = vmatpush3.bf16.msra.mxu1 %v5241_v12 }
 0xc65   : > { %v2171_v32 = vpack.c.bf16 %v2168_v26, %v2167_v4  ;;  %4944 = vmatprep.subr.bf16.mxu1 %v5519_v1 }
 0xc67   : > { %4903 = vmatmul.mubr.msk.bf16.gmra.mxu0 %vm2212_vm5, %v2171_v32 }
 0xc68   : > { %4906 = vmatprep.mubr.msk.bf16.mxu0 %vm5520_vm0, %v5519_v1 }
 0xc84   : > { %v2159_v27 = vpop.f32.mrf.mxu1 }
 0xc85   : > { %v2160_v34 = vadd.f32 %v4373_v7, %v2159_v27 }
 0xc86   : > { %v4888_v38 = vpop.f32.mrf.mxu1 }
 0xc87   : > { %v2169_v35 = vmax.f32 %v2160_v34, 0.0 }
 0xc88   : > { %v2162_v31 = vpop.f32.mrf.mxu1 }
 0xc89   : > { %v2172_v40 = vpack.c.bf16 %v2169_v35, %v2169_v35 }
 0xc8a   : > { %v4889_v44 = vpop.f32.mrf.mxu1 }
 0xc8b   : > { %4907 = vmatmul.mubr.msk.bf16.gmra.mxu0 %vm2212_vm5, %v2172_v40 }
 0xc8c   : > { %4932 = vmatprep.mubr.msk.bf16.mxu0 %vm5520_vm0, %v5519_v1 }
 0xd1f   : > { %v2256_v46 = vpop.f32.mrf.mxu0 }
 0xd20   : > { %v2257_v2 = vadd.f32 %v4379_v36, %v2256_v46 }
 0xd21   : > { %v4900_v49 = vpop.f32.mrf.mxu0 }
 0xd22   : > { %v2278_v5 = vadd.f32 %v2257_v2, %v6209_v9 }
 0xd23   : > { %v2259_v51 = vpop.f32.mrf.mxu0 }
 0xd24   : > { %v2260_v53 = vadd.f32 %v4379_v36, %v2259_v51  ;;  %v2285_v54 = vsel %vm677_vm1, %v2278_v5, 0.0 }
 0xd25   : > { %2286 = vadd.xlane.f32.xlu1 %v2285_v54  ;;  %v4901_v11 = vpop.f32.mrf.mxu0 }
 0xd26   : > { %v2279_v55 = vadd.f32 %v2260_v53, %v6211_v58  ;;  %v4387_v53 = vld [vmem:[%s6939_s14] ss:$0 sm:$0xff] }
 0xd27   : > { %v2264_v18 = vpop.f32.mrf.mxu0 }
 0xd28   : > { %v2265_v43 = vadd.f32 %v4379_v36, %v2264_v18  ;;  %v2288_v33 = vsel %vm677_vm1, %v2279_v55, 0.0  ;;  %v4388_v18 = vld [vmem:[%s6940_s15] ss:$0 sm:$0xff] }
 0xd29   : > { %2289 = vadd.xlane.f32.xlu0 %v2288_v33  ;;  %v4904_v28 = vpop.f32.mrf.mxu0 }
 0xd2a   : > { %v2280_v39 = vadd.f32 %v2265_v43, %v6218_v62 }
 0xd2b   : > { %v2267_v24 = vpop.f32.mrf.mxu0 }
 0xd2c   : > { %v2268_v56 = vadd.f32 %v4379_v36, %v2267_v24  ;;  %v2291_v9 = vsel %vm677_vm1, %v2280_v39, 0.0 }
 0xd2d   : > { %2292 = vadd.xlane.f32.xlu1 %v2291_v9  ;;  %v4905_v59 = vpop.f32.mrf.mxu0 }
 0xd2e   : > { %v2281_v45 = vadd.f32 %v2268_v56, %v6220_v41 }
 0xd30   : > { %v2294_v10 = vsel %vm677_vm1, %v2281_v45, 0.0 }
 0xd31   : > { %2295 = vadd.xlane.f32.xlu0 %v2294_v10 }
 0xd4b   : > { %v2272_v58 = vpop.f32.mrf.mxu0 }
 0xd4c   : > { %v2273_v60 = vadd.f32 %v4379_v36, %v2272_v58 }
 0xd4d   : > { %v4908_v63 = vpop.f32.mrf.mxu0 }
 0xd4e   : > { %v2282_v48 = vadd.f32 %v2273_v60, %v6227_v6 }
 0xd4f   : > { %v2275_v0 = vpop.f32.mrf.mxu0 }
 0xd50   : > { %v2297_v14 = vsel %vm677_vm1, %v2282_v48, 0.0 }
 0xd51   : > { %2298 = vadd.xlane.f32.xlu1 %v2297_v14  ;;  %v4909_v62 = vpop.f32.mrf.mxu0 }
 0xdae   : > { %v2287_v42 = vpop.xlane.xlu1 %2286 }
 0xdaf   : > { %v2300_v47 = vmul.f32 0.03125, %v2287_v42 }
 0xdb1   : > { %v2305_v52 = vsub.f32 %v2278_v5, %v2300_v47 }
 0xdb2   : > { %v2290_v15 = vpop.xlane.xlu0 %2289 }
 0xdb3   : > { %v2301_v57 = vmul.f32 0.03125, %v2290_v15  ;;  %v2310_v3 = vmul.f32 %v2305_v52, %v2305_v52 }
 0xdb5   : > { %v2306_v41 = vsub.f32 %v2279_v55, %v2301_v57  ;;  %v2315_v16 = vsel %vm677_vm1, %v2310_v3, 0.0 }
 0xdb6   : > { %v2293_v7 = vpop.xlane.xlu1 %2292  ;;  %2316 = vadd.xlane.f32.xlu0 %v2315_v16 }
 0xdb7   : > { %v2302_v50 = vmul.f32 0.03125, %v2293_v7  ;;  %v2311_v8 = vmul.f32 %v2306_v41, %v2306_v41 }
 0xdb9   : > { %v2307_v13 = vsub.f32 %v2280_v39, %v2302_v50  ;;  %v2318_v6 = vsel %vm677_vm1, %v2311_v8, 0.0  ;;  %v4394_v8 = vld [vmem:[%s6930_s5 + $0x1] ss:$0 sm:$0xff] }
 0xdba   : > { %v2296_v19 = vpop.xlane.xlu0 %2295  ;;  %2319 = vadd.xlane.f32.xlu1 %v2318_v6 }
 0xdbb   : > { %v2303_v17 = vmul.f32 0.03125, %v2296_v19  ;;  %v2312_v20 = vmul.f32 %v2307_v13, %v2307_v13 }
 0xdbd   : > { %v2308_v23 = vsub.f32 %v2281_v45, %v2303_v17  ;;  %v2321_v22 = vsel %vm677_vm1, %v2312_v20, 0.0 }
 0xdbe   : > { %2322 = vadd.xlane.f32.xlu0 %v2321_v22 }
 0xdbf   : > { %v2313_v25 = vmul.f32 %v2308_v23, %v2308_v23 }
 0xdc1   : > { %v2324_v61 = vsel %vm677_vm1, %v2313_v25, 0.0 }
 0xdc2   : > { %2325 = vadd.xlane.f32.xlu1 %v2324_v61 }
 0xdda   : > { %v2299_v37 = vpop.xlane.xlu1 %2298 }
 0xddb   : > { %v2304_v30 = vmul.f32 0.03125, %v2299_v37 }
 0xddd   : > { %v2309_v21 = vsub.f32 %v2282_v48, %v2304_v30 }
 0xddf   : > { %v2314_v4 = vmul.f32 %v2309_v21, %v2309_v21 }
 0xde1   : > { %v2327_v26 = vsel %vm677_vm1, %v2314_v4, 0.0 }
 0xde2   : > { %2328 = vadd.xlane.f32.xlu0 %v2327_v26 }
 0xe3f   : > { %v2317_v32 = vpop.xlane.xlu0 %2316 }
 0xe40   : > { %v2330_v27 = vmul.f32 0.03125, %v2317_v32 }
 0xe42   : > { %v2335_v34 = vadd.f32 1e-05, %v2330_v27 }
 0xe43   : > { %v2320_v38 = vpop.xlane.xlu1 %2319 }
 0xe44   : > { %5340 = vrsqrt.f32 %v2335_v34  ;;  %v2331_v35 = vmul.f32 0.03125, %v2320_v38 }
 0xe46   : > { %v2336_v31 = vadd.f32 1e-05, %v2331_v35 }
 0xe47   : > { %v2323_v40 = vpop.xlane.xlu0 %2322 }
 0xe48   : > { %5342 = vrsqrt.f32 %v2336_v31  ;;  %v2332_v44 = vmul.f32 0.03125, %v2323_v40 }
 0xe4a   : > { %v2337_v36 = vadd.f32 1e-05, %v2332_v44 }
 0xe4b   : > { %v2326_v46 = vpop.xlane.xlu1 %2325 }
 0xe4c   : > { %5344 = vrsqrt.f32 %v2337_v36  ;;  %v2333_v2 = vmul.f32 0.03125, %v2326_v46 }
 0xe4e   : > { %v2338_v49 = vadd.f32 1e-05, %v2333_v2 }
 0xe50   : > { %5346 = vrsqrt.f32 %v2338_v49 }
 0xe51   : > { %v5341_v5 = vpop.eup %5340 }
 0xe52   : > { %v2345_v51 = vmul.f32 %v5341_v5, %v2305_v52 }
 0xe54   : > { %v2356_v11 = vmul.f32 %v4387_v53, %v2345_v51 }
 0xe55   : > { %v5343_v54 = vpop.eup %5342 }
 0xe56   : > { %v2346_v55 = vmul.f32 %v5343_v54, %v2306_v41  ;;  %v6290_v28 = vadd.f32 %v4388_v18, %v2356_v11  ;;  %v6378_v11 = vld [vmem:[%s6990_s0] sm:$0xff] }
 0xe58   : > { %v2357_v43 = vmul.f32 %v4387_v53, %v2346_v55 }
 0xe59   : > { %v5345_v33 = vpop.eup %5344 }
 0xe5a   : > { %v6292_v39 = vadd.f32 %v4388_v18, %v2357_v43  ;;  %v2347_v24 = vmul.f32 %v5345_v33, %v2307_v13 }
 0xe5c   : > { %v2372_v56 = vpack.c.bf16 %v6292_v39, %v6290_v28  ;;  %v2358_v45 = vmul.f32 %v4387_v53, %v2347_v24 }
 0xe5d   : > { %v5347_v9 = vpop.eup %5346 }
 0xe5e   : > { %4915 = vmatmul.mubr.msk.bf16.vlgmr.msra.gmra.mxu1 %vm677_vm1, %v2372_v56  ;;  %v2348_v59 = vmul.f32 %v5347_v9, %v2308_v23  ;;  %v6299_v58 = vadd.f32 %v4388_v18, %v2358_v45  ;;  %v6388_v56 = vld [vmem:[%s6990_s0 + $0x8] sm:$0xff] }
 0xe5f   : > { %4918 = vmatprep.mubr.msk.bf16.mxu1 %vm5520_vm0, %v5519_v1 }
 0xe60   : > { %v2359_v10 = vmul.f32 %v4387_v53, %v2348_v59 }
 0xe62   : > { %v6301_v60 = vadd.f32 %v4388_v18, %v2359_v10 }
 0xe64   : > { %v2373_v63 = vpack.c.bf16 %v6301_v60, %v6299_v58 }
 0xe66   : > { %4919 = vmatmul.mubr.msk.bf16.gmra.mxu1 %vm677_vm1, %v2373_v63 }
 0xe67   : > { %4922 = vmatprep.mubr.msk.bf16.mxu1 %vm5520_vm0, %v5519_v1 }
 0xe6b   : > { %v2329_v48 = vpop.xlane.xlu0 %2328 }
 0xe6c   : > { %v2334_v0 = vmul.f32 0.03125, %v2329_v48  ;;  %v6398_v48 = vld [vmem:[%s6990_s0 + $0x10] sm:$0xff] }
 0xe6e   : > { %v2339_v14 = vadd.f32 1e-05, %v2334_v0 }
 0xe70   : > { %5348 = vrsqrt.f32 %v2339_v14 }
 0xe7d   : > { %v5349_v62 = vpop.eup %5348 }
 0xe7e   : > { %v2349_v42 = vmul.f32 %v5349_v62, %v2309_v21 }
 0xe80   : > { %v2360_v47 = vmul.f32 %v4387_v53, %v2349_v42 }
 0xe82   : > { %v6308_v52 = vadd.f32 %v4388_v18, %v2360_v47 }
 0xe84   : > { %v2374_v15 = vpack.c.bf16 %v6308_v52, %v6308_v52 }
 0xe86   : > { %4923 = vmatmul.mubr.msk.bf16.gmra.mxu1 %vm677_vm1, %v2374_v15  ;;  %v6408_v15 = vld [vmem:[%s6990_s0 + $0x18] sm:$0xff] }
 0xe87   : > { %4950 = vmatprep.mubr.msk.bf16.mxu1 %vm5520_vm0, %v5519_v1 }
 0xf1e   : > { %v2443_v57 = vpop.f32.mrf.mxu1 }
 0xf1f   : > { %v2444_v22 = vadd.f32 %v4394_v8, %v2443_v57 }
 0xf20   : > { %v4916_v3 = vpop.f32.mrf.mxu1 }
 0xf22   : > { %v2446_v41 = vpop.f32.mrf.mxu1 }
 0xf23   : > { %v2447_v23 = vadd.f32 %v4394_v8, %v2446_v41 }
 0xf24   : > { %v4917_v16 = vpop.f32.mrf.mxu1 }
 0xf25   : > { %v6324_v25 = vpack.c.bf16 %v2447_v23, %v2444_v22 }
 0xf26   : > { %v2451_v7 = vpop.f32.mrf.mxu1 }
 0xf27   : > { %v2452_v6 = vadd.f32 %v4394_v8, %v2451_v7 }
 0xf28   : > { %v4920_v50 = vpop.f32.mrf.mxu1 }
 0xf29   : > { %v6415_v50 = vld [vmem:[%s6990_s0 + $0x20] sm:$0xff] }
 0xf2a   : > { %v2454_v13 = vpop.f32.mrf.mxu1 }
 0xf2b   : > { %v2455_v19 = vadd.f32 %v4394_v8, %v2454_v13 }
 0xf2c   : > { %v4921_v17 = vpop.f32.mrf.mxu1 }
 0xf2d   : > { %v6318_v20 = vpack.c.bf16 %v2455_v19, %v2452_v6 }
 0xf2f   : > { %2473 = vrot.lane.b32.xlu0 %v6318_v20, %s5521_s24 }
 0xf33   : > { %2708 = vrot.lane.b32.xlu0 %v6318_v20, %s5522_s3 }
 0xf37   : > { %2700 = vrot.lane.b32.xlu0 %v6324_v25, %s5523_s4 }
 0xf46   : > { %v2459_v61 = vpop.f32.mrf.mxu1 }
 0xf47   : > { %v2460_v29 = vadd.f32 %v4394_v8, %v2459_v61 }
 0xf48   : > { %v4924_v12 = vpop.f32.mrf.mxu1 }
 0xf49   : > { %v6328_v37 = vpack.c.bf16 %v2460_v29, %v2460_v29 }
 0xf4a   : > { %v2462_v30 = vpop.f32.mrf.mxu1 }
 0xf4b   : > { %2704 = vrot.lane.b32.xlu0 %v6328_v37, %s5523_s4  ;;  %2475 = vrot.lane.b32.xlu1 %v6328_v37, %s5521_s24 }
 0xf4c   : > { %v4925_v21 = vpop.f32.mrf.mxu1 }
 0xf4f   : > { %2471 = vrot.lane.b32.xlu1 %v6324_v25, %s5521_s24  ;;  %s6992_s24 = smov 80  }
 0xf53   : > { %2710 = vrot.lane.b32.xlu1 %v6328_v37, %s5522_s3 }
 0xf57   : > { %2706 = vrot.lane.b32.xlu1 %v6324_v25, %s5522_s3  ;;  %s621_s3 = sand.u32 1, %s5509_s22  }
 0xf58   : > { %s4323_s23 = sshll.u32 %s621_s3, 3 }
 0xf59   : > { %s623_s19 = scalar_lea.vmem [#allocation2], %s4323_s23  ;;  %s5461_s23 = sshll.u32 %s5532_s2, 4  ;;  %s5462_s23 = int_to_ptr.vmem [resolvable:$false] %s5461_s23 }
 0xf5b   : > { %2702 = vrot.lane.b32.xlu1 %v6318_v20, %s5523_s4 }
 0xfa1   : > { %v2474_v32 = vpop.permute.xlu0 %2473 }
 0xfa2   : > { %v2490_v27 = vsel %vm755_vm2, %v2474_v32, 0 }
 0xfa5   : > { %v2709_v40 = vpop.permute.xlu0 %2708 }
 0xfa6   : > { %v2725_v44 = vsel %vm755_vm2, %v2709_v40, 0 }
 0xfa9   : > { %v2701_v2 = vpop.permute.xlu0 %2700 }
 0xfbd   : > { %v2476_v4 = vpop.permute.xlu1 %2475  ;;  %v2705_v5 = vpop.permute.xlu0 %2704 }
 0xfbe   : > { %v2493_v26 = vsel %vm755_vm2, %v2476_v4, 0 }
 0xfbf   : > { %4927 = vmatpush3.bf16.xpose.msra.mxu0 %v2493_v26 }
 0xfc0   : > { %4928 = vmatprep.subr.bf16.mxu0 %v5519_v1 }
 0xfc1   : > { %v2472_v34 = vpop.permute.xlu1 %2471 }
 0xfc2   : > { %v2487_v38 = vsel %vm755_vm2, %v2472_v34, 0 }
 0xfc5   : > { %v2711_v35 = vpop.permute.xlu1 %2710 }
 0xfc6   : > { %v2728_v31 = vsel %vm755_vm2, %v2711_v35, 0 }
 0xfc7   : > { %4929 = vmatpush3.bf16.xpose.msra.mxu0 %v2490_v27 }
 0xfc8   : > { %4930 = vmatprep.subr.bf16.mxu0 %v5519_v1 }
 0xfc9   : > { %v2707_v36 = vpop.permute.xlu1 %2706 }
 0xfca   : > { %v2722_v46 = vsel %vm755_vm2, %v2707_v36, 0 }
 0xfcd   : > { %v2703_v49 = vpop.permute.xlu1 %2702 }
 0xfcf   : > { %4931 = vmatpush3.bf16.xpose.msra.mxu0 %v2487_v38 }
 0xfd0   : > { %4962 = vmatprep.subr.bf16.mxu0 %v5519_v1 }
 0xfd6   : > { %4933 = vmatmul.mubr.msk.bf16.vlgmr.msra.gmra.mxu0 %vm755_vm2, %v6324_v25 }
 0xfd7   : > { %4963 = vmatpush3.bf16.xpose.msra.mxu0 %v2728_v31  ;;  %4936 = vmatprep.mubr.msk.bf16.mxu0 %vm5520_vm0, %v5519_v1 }
 0xfd8   : > { %4964 = vmatprep.subr.bf16.mxu0 %v5519_v1 }
 0xfde   : > { %4937 = vmatmul.mubr.msk.bf16.gmra.mxu0 %vm755_vm2, %v6318_v20 }
 0xfdf   : > { %4965 = vmatpush3.bf16.xpose.msra.mxu0 %v2725_v44  ;;  %4940 = vmatprep.mubr.msk.bf16.mxu0 %vm5520_vm0, %v5519_v1 }
 0xfe0   : > { %4966 = vmatprep.subr.bf16.mxu0 %v5519_v1 }
 0xfe6   : > { %4941 = vmatmul.mubr.msk.bf16.gmra.mxu0 %vm755_vm2, %v6328_v37 }
 0xfe7   : > { %4967 = vmatpush3.bf16.xpose.msra.mxu0 %v2722_v46  ;;  %4968 = vmatprep.mubr.msk.bf16.mxu0 %vm5520_vm0, %v5519_v1 }
 0xfe8   : > { %4998 = vmatprep.subr.bf16.mxu0 %v5519_v1 }
 0xfee   : > { %4969 = vmatmul.mubr.msk.bf16.vlgmr.msra.gmra.mxu0 %vm755_vm2, %v2701_v2 }
 0xfef   : > { %4972 = vmatprep.mubr.msk.bf16.mxu0 %vm5520_vm0, %v5519_v1 }
 0xff6   : > { %4973 = vmatmul.mubr.msk.bf16.gmra.mxu0 %vm755_vm2, %v2703_v49 }
 0xff7   : > { %4976 = vmatprep.mubr.msk.bf16.mxu0 %vm5520_vm0, %v5519_v1 }
 0xffe   : > { %4977 = vmatmul.mubr.msk.bf16.gmra.mxu0 %vm755_vm2, %v2705_v5 }
 0xfff   : > { %5000 = vmatprep.mubr.msk.bf16.mxu0 %vm5520_vm0, %v5519_v1 }
0x1096   : > { %v2529_v51 = vpop.f32.mrf.mxu0 }
0x1097   : > { %v2551_v53 = vmul.f32 0.35355338, %v2529_v51 }
0x1098   : > { %v4934_v54 = vpop.f32.mrf.mxu0 }
0x1099   : > { %v6381_v55 = vadd.f32 %v6378_v11, %v2551_v53 }
0x109a   : > { %v2532_v18 = vpop.f32.mrf.mxu0 }
0x109b   : > { %v2552_v43 = vmul.f32 0.35355338, %v2532_v18  ;;  %v2561_v33 = vsel %vm840_vm3, %v6381_v55, -inf }
0x109c   : > { %2562 = vmax.xlane.f32.xlu1 %v2561_v33  ;;  %v4935_v24 = vpop.f32.mrf.mxu0 }
0x109d   : > { %v6391_v9 = vadd.f32 %v6388_v56, %v2552_v43 }
0x109e   : > { %v2537_v59 = vpop.f32.mrf.mxu0 }
0x109f   : > { %v2553_v45 = vmul.f32 0.35355338, %v2537_v59  ;;  %v2564_v10 = vsel %vm840_vm3, %v6391_v9, -inf }
0x10a0   : > { %2565 = vmax.xlane.f32.xlu0 %v2564_v10  ;;  %v4938_v63 = vpop.f32.mrf.mxu0 }
0x10a1   : > { %v6401_v0 = vadd.f32 %v6398_v48, %v2553_v45 }
0x10a2   : > { %v2540_v14 = vpop.f32.mrf.mxu0 }
0x10a3   : > { %v2554_v62 = vmul.f32 0.35355338, %v2540_v14  ;;  %v2567_v42 = vsel %vm840_vm3, %v6401_v0, -inf }
0x10a4   : > { %2568 = vmax.xlane.f32.xlu0 %v2567_v42  ;;  %v4939_v47 = vpop.f32.mrf.mxu0 }
0x10a5   : > { %v2559_v57 = vadd.f32 %v6408_v15, %v2554_v62 }
0x10a6   : > { %v2545_v3 = vpop.f32.mrf.mxu0 }
0x10a7   : > { %v2555_v41 = vmul.f32 0.35355338, %v2545_v3  ;;  %v2570_v16 = vsel %vm840_vm3, %v2559_v57, -inf }
0x10a8   : > { %2571 = vmax.xlane.f32.xlu1 %v2570_v16  ;;  %v4942_v7 = vpop.f32.mrf.mxu0 }
0x10a9   : > { %v2560_v8 = vadd.f32 %v6415_v50, %v2555_v41 }
0x10aa   : > { %v2548_v13 = vpop.f32.mrf.mxu0 }
0x10ab   : > { %v2573_v6 = vsel %vm840_vm3, %v2560_v8, -inf }
0x10ac   : > { %2574 = vmax.xlane.f32.xlu0 %v2573_v6  ;;  %v4943_v19 = vpop.f32.mrf.mxu0 }
0x10ae   : > { %v2764_v17 = vpop.f32.mrf.mxu0 }
0x10af   : > { %v2786_v23 = vmul.f32 0.35355338, %v2764_v17 }
0x10b0   : > { %v4970_v22 = vpop.f32.mrf.mxu0 }
0x10b1   : > { %v2791_v61 = vadd.f32 %v6378_v11, %v2786_v23 }
0x10b2   : > { %v2767_v29 = vpop.f32.mrf.mxu0 }
0x10b3   : > { %v2787_v12 = vmul.f32 0.35355338, %v2767_v29  ;;  %v2796_v30 = vsel %vm840_vm3, %v2791_v61, -inf }
0x10b4   : > { %2797 = vmax.xlane.f32.xlu1 %v2796_v30  ;;  %v4971_v21 = vpop.f32.mrf.mxu0 }
0x10b5   : > { %v6422_v4 = vadd.f32 %v6388_v56, %v2787_v12 }
0x10b6   : > { %v2772_v26 = vpop.f32.mrf.mxu0 }
0x10b7   : > { %v2788_v32 = vmul.f32 0.35355338, %v2772_v26  ;;  %v2799_v27 = vsel %vm840_vm3, %v6422_v4, -inf }
0x10b8   : > { %2800 = vmax.xlane.f32.xlu0 %v2799_v27  ;;  %v4974_v34 = vpop.f32.mrf.mxu0 }
0x10b9   : > { %v6427_v38 = vadd.f32 %v6398_v48, %v2788_v32 }
0x10ba   : > { %v2775_v35 = vpop.f32.mrf.mxu0 }
0x10bb   : > { %v2789_v31 = vmul.f32 0.35355338, %v2775_v35  ;;  %v2802_v40 = vsel %vm840_vm3, %v6427_v38, -inf }
0x10bc   : > { %2803 = vmax.xlane.f32.xlu1 %v2802_v40  ;;  %v4975_v44 = vpop.f32.mrf.mxu0 }
0x10bd   : > { %v6432_v36 = vadd.f32 %v6408_v15, %v2789_v31 }
0x10be   : > { %v2780_v46 = vpop.f32.mrf.mxu0 }
0x10bf   : > { %v2790_v2 = vmul.f32 0.35355338, %v2780_v46  ;;  %v2805_v49 = vsel %vm840_vm3, %v6432_v36, -inf }
0x10c0   : > { %2806 = vmax.xlane.f32.xlu0 %v2805_v49  ;;  %v4978_v5 = vpop.f32.mrf.mxu0 }
0x10c1   : > { %v6437_v51 = vadd.f32 %v6415_v50, %v2790_v2 }
0x10c2   : > { %v2783_v53 = vpop.f32.mrf.mxu0 }
0x10c3   : > { %v2808_v54 = vsel %vm840_vm3, %v6437_v51, -inf }
0x10c4   : > { %2809 = vmax.xlane.f32.xlu1 %v2808_v54  ;;  %v4979_v18 = vpop.f32.mrf.mxu0 }
0x10d5   : > { %2623 = vrot.lane.b32.xlu1 %v6328_v37, %s5524_s27 }
0x10d6   : > { %2621 = vrot.lane.b32.xlu0 %v6318_v20, %s5524_s27 }
0x1125   : > { %v2563_v43 = vpop.xlane.xlu1 %2562 }
0x1126   : > { %v2576_v33 = vsub.f32 %v6381_v55, %v2563_v43 }
0x1128   : > { %v2581_v24 = vmul.f32 1.442695, %v2576_v33 }
0x1129   : > { %v2566_v59 = vpop.xlane.xlu0 %2565 }
0x112a   : > { %5350 = vpow2.f32 %v2581_v24  ;;  %v2577_v45 = vsub.f32 %v6391_v9, %v2566_v59 }
0x112c   : > { %v2583_v10 = vmul.f32 1.442695, %v2577_v45 }
0x112d   : > { %v2569_v63 = vpop.xlane.xlu0 %2568 }
0x112e   : > { %5352 = vpow2.f32 %v2583_v10  ;;  %v2578_v14 = vsub.f32 %v6401_v0, %v2569_v63 }
0x1130   : > { %v2585_v62 = vmul.f32 1.442695, %v2578_v14 }
0x1131   : > { %v2572_v42 = vpop.xlane.xlu1 %2571 }
0x1132   : > { %5354 = vpow2.f32 %v2585_v62  ;;  %v2579_v47 = vsub.f32 %v2559_v57, %v2572_v42 }
0x1134   : > { %v2587_v3 = vmul.f32 1.442695, %v2579_v47 }
0x1135   : > { %v2575_v41 = vpop.xlane.xlu0 %2574 }
0x1136   : > { %5356 = vpow2.f32 %v2587_v3  ;;  %v2580_v16 = vsub.f32 %v2560_v8, %v2575_v41 }
0x1137   : > { %v6448_v7 = vpop.eup %5350 }
0x1138   : > { %v2589_v55 = vmul.f32 1.442695, %v2580_v16  ;;  %v2591_v13 = vsel %vm840_vm3, %v6448_v7, 0.0 }
0x1139   : > { %2592 = vadd.xlane.f32.xlu0 %v2591_v13 }
0x113a   : > { %5358 = vpow2.f32 %v2589_v55 }
0x113b   : > { %v6452_v9 = vpop.eup %5352 }
0x113c   : > { %v2594_v0 = vsel %vm840_vm3, %v6452_v9, 0.0 }
0x113d   : > { %v2798_v6 = vpop.xlane.xlu1 %2797  ;;  %2595 = vadd.xlane.f32.xlu1 %v2594_v0 }
0x113e   : > { %v2811_v57 = vsub.f32 %v2791_v61, %v2798_v6 }
0x113f   : > { %v6456_v19 = vpop.eup %5354 }
0x1140   : > { %v2816_v17 = vmul.f32 1.442695, %v2811_v57  ;;  %v2597_v8 = vsel %vm840_vm3, %v6456_v19, 0.0 }
0x1141   : > { %2598 = vadd.xlane.f32.xlu0 %v2597_v8  ;;  %v2801_v30 = vpop.xlane.xlu0 %2800 }
0x1142   : > { %5360 = vpow2.f32 %v2816_v17  ;;  %v2812_v40 = vsub.f32 %v6422_v4, %v2801_v30 }
0x1143   : > { %v6460_v23 = vpop.eup %5356 }
0x1144   : > { %v2600_v22 = vsel %vm840_vm3, %v6460_v23, 0.0  ;;  %v2818_v44 = vmul.f32 1.442695, %v2812_v40 }
0x1145   : > { %2601 = vadd.xlane.f32.xlu1 %v2600_v22  ;;  %v2804_v61 = vpop.xlane.xlu1 %2803 }
0x1146   : > { %v2813_v46 = vsub.f32 %v6427_v38, %v2804_v61  ;;  %5362 = vpow2.f32 %v2818_v44 }
0x1147   : > { %v6464_v29 = vpop.eup %5358 }
0x1148   : > { %v2603_v12 = vsel %vm840_vm3, %v6464_v29, 0.0  ;;  %v2820_v49 = vmul.f32 1.442695, %v2813_v46 }
0x1149   : > { %2604 = vadd.xlane.f32.xlu0 %v2603_v12  ;;  %v2807_v32 = vpop.xlane.xlu0 %2806 }
0x114a   : > { %v2814_v2 = vsub.f32 %v6432_v36, %v2807_v32  ;;  %5364 = vpow2.f32 %v2820_v49 }
0x114c   : > { %v2822_v53 = vmul.f32 1.442695, %v2814_v2 }
0x114d   : > { %v2810_v21 = vpop.xlane.xlu1 %2809  ;;  %v2622_v31 = vpop.permute.xlu0 %2621 }
0x114e   : > { %v2815_v5 = vsub.f32 %v6437_v51, %v2810_v21  ;;  %5366 = vpow2.f32 %v2822_v53  ;;  %v4406_v53 = vld [vmem:[%s6931_s6 + $0x10] sm:$0xf] }
0x114f   : > { %v6468_v26 = vpop.eup %5360 }
0x1150   : > { %v2826_v27 = vsel %vm840_vm3, %v6468_v26, 0.0  ;;  %v2824_v54 = vmul.f32 1.442695, %v2815_v5 }
0x1151   : > { %2827 = vadd.xlane.f32.xlu1 %v2826_v27  ;;  %v2624_v34 = vpop.permute.xlu1 %2623 }
0x1152   : > { %v2637_v35 = vsel %vm916_vm4, %v2624_v34, 0  ;;  %5368 = vpow2.f32 %v2824_v54  ;;  %v3013_v54 = vsel %vm916_vm4, %v4406_v53, 0 }
0x1153   : > { %4945 = vmatpush3.bf16.msra.mxu1 %v2637_v35  ;;  %v6483_v18 = vpop.eup %5362 }
0x1154   : > { %4946 = vmatprep.subr.bf16.mxu1 %v5519_v1  ;;  %v2829_v43 = vsel %vm840_vm3, %v6483_v18, 0.0 }
0x1157   : > { %4947 = vmatpush3.bf16.msra.mxu1 %v2622_v31  ;;  %v6487_v4 = vpop.eup %5364 }
0x1158   : > { %4948 = vmatprep.subr.bf16.mxu1 %v5519_v1  ;;  %v2832_v36 = vsel %vm840_vm3, %v6487_v4, 0.0 }
0x115b   : > { %v6489_v38 = vpop.eup %5366 }
0x115c   : > { %v2835_v51 = vsel %vm840_vm3, %v6489_v38, 0.0 }
0x115f   : > { %2858 = vrot.lane.b32.xlu0 %v6328_v37, %s5525_s25  ;;  %v6493_v33 = vpop.eup %5368 }
0x1160   : > { %v2838_v24 = vsel %vm840_vm3, %v6493_v33, 0.0 }
0x1162   : > { %2619 = vrot.lane.b32.xlu1 %v6324_v25, %s5524_s27  ;;  %s6991_s27 = smov 112  }
0x117e   : > { %2830 = vadd.xlane.f32.xlu0 %v2829_v43  ;;  %v4413_v43 = vld [vmem:[%s6931_s6 + $0x14] sm:$0xf] }
0x1182   : > { %2833 = vadd.xlane.f32.xlu0 %v2832_v36 }
0x1186   : > { %2836 = vadd.xlane.f32.xlu0 %v2835_v51  ;;  %2839 = vadd.xlane.f32.xlu1 %v2838_v24 }
0x1197   : > { %3073 = vrot.lane.b32.xlu1 %v6318_v20, %s6991_s27 }
0x119c   : > { %2856 = vrot.lane.b32.xlu0 %v6318_v20, %s5525_s25 }
0x11a0   : > { %2854 = vrot.lane.b32.xlu0 %v6324_v25, %s5525_s25  ;;  %s7000_s25 = sld [smem:[#allocation18_spill]] }
0x11a4   : > { %3081 = vrot.lane.b32.xlu0 %v6328_v37, %s6992_s24 }
0x11a6   : > { %s6884_s0 = scalar_lea.hbm %s7000_s25, %s4486_s29 }
0x11a8   : > { %3079 = vrot.lane.b32.xlu0 %v6318_v20, %s6992_s24 }
0x11ac   : > { %3077 = vrot.lane.b32.xlu0 %v6324_v25, %s6992_s24 }
0x11b0   : > { %3071 = vrot.lane.b32.xlu0 %v6324_v25, %s6991_s27 }
0x11b4   : > { %3075 = vrot.lane.b32.xlu0 %v6328_v37, %s6991_s27 }
0x11c2   : > { %v2593_v45 = vpop.xlane.xlu0 %2592 }
0x11c6   : > { %v2596_v59 = vpop.xlane.xlu1 %2595 }
0x11c7   : > { %5370 = vrcp.f32 %v2596_v59 }
0x11c8   : > { %5372 = vrcp.f32 %v2593_v45 }
0x11ca   : > { %v2599_v63 = vpop.xlane.xlu0 %2598 }
0x11ce   : > { %v2602_v10 = vpop.xlane.xlu1 %2601 }
0x11cf   : > { %5374 = vrcp.f32 %v2602_v10 }
0x11d0   : > { %5376 = vrcp.f32 %v2599_v63 }
0x11d2   : > { %v2605_v62 = vpop.xlane.xlu0 %2604 }
0x11d3   : > { %5378 = vrcp.f32 %v2605_v62 }
0x11d4   : > { %v5371_v14 = vpop.eup %5370 }
0x11d5   : > { %v5373_v47 = vpop.eup %5372  ;;  %v2612_v3 = vmul.f32 %v5371_v14, %v6452_v9 }
0x11d6   : > { %v2611_v41 = vmul.f32 %v5373_v47, %v6448_v7  ;;  %v2859_v55 = vpop.permute.xlu0 %2858 }
0x11d7   : > { %v2872_v6 = vsel %vm916_vm4, %v2859_v55, 0 }
0x11d8   : > { %v2616_v13 = vpack.c.bf16 %v2612_v3, %v2611_v41 }
0x11da   : > { %v2828_v42 = vpop.xlane.xlu1 %2827 }
0x11db   : > { %5380 = vrcp.f32 %v2828_v42 }
0x11dc   : > { %v5375_v0 = vpop.eup %5374 }
0x11dd   : > { %v5377_v57 = vpop.eup %5376  ;;  %v2614_v9 = vmul.f32 %v5375_v0, %v6460_v23 }
0x11de   : > { %v2620_v16 = vpop.permute.xlu1 %2619  ;;  %v2613_v7 = vmul.f32 %v5377_v57, %v6456_v19 }
0x11df   : > { %4949 = vmatpush3.bf16.msra.mxu1 %v2620_v16 }
0x11e0   : > { %4980 = vmatprep.subr.bf16.mxu1 %v5519_v1  ;;  %v2617_v17 = vpack.c.bf16 %v2614_v9, %v2613_v7  ;;  %v5379_v8 = vpop.eup %5378 }
0x11e1   : > { %v2615_v22 = vmul.f32 %v5379_v8, %v6464_v29 }
0x11e2   : > { %4951 = vmatmul.mubr.msk.bf16.vlgmr.msra.gmra.mxu1 %vm840_vm3, %v2616_v13 }
0x11e3   : > { %4981 = vmatpush3.bf16.msra.mxu1 %v2872_v6  ;;  %4954 = vmatprep.mubr.msk.bf16.mxu1 %vm5520_vm0, %v5519_v1  ;;  %v2618_v12 = vpack.c.bf16 %v2615_v22, %v2615_v22 }
0x11e4   : > { %4982 = vmatprep.subr.bf16.mxu1 %v5519_v1 }
0x11e8   : > { %v5381_v21 = vpop.eup %5380 }
0x11e9   : > { %v2846_v29 = vmul.f32 %v5381_v21, %v6468_v26 }
0x11ea   : > { %4955 = vmatmul.mubr.msk.bf16.gmra.mxu1 %vm840_vm3, %v2617_v17 }
0x11eb   : > { %4958 = vmatprep.mubr.msk.bf16.mxu1 %vm5520_vm0, %v5519_v1 }
0x11f2   : > { %4959 = vmatmul.mubr.msk.bf16.gmra.mxu1 %vm840_vm3, %v2618_v12 }
0x11f3   : > { %4986 = vmatprep.mubr.msk.bf16.mxu1 %vm5520_vm0, %v5519_v1 }
0x1207   : > { %v2831_v23 = vpop.xlane.xlu0 %2830 }
0x1208   : > { %5382 = vrcp.f32 %v2831_v23 }
0x120b   : > { %v2834_v61 = vpop.xlane.xlu0 %2833 }
0x120c   : > { %5384 = vrcp.f32 %v2834_v61 }
0x120f   : > { %v2837_v19 = vpop.xlane.xlu0 %2836  ;;  %v2840_v30 = vpop.xlane.xlu1 %2839 }
0x1210   : > { %5386 = vrcp.f32 %v2837_v19 }
0x1211   : > { %5388 = vrcp.f32 %v2840_v30 }
0x1213   : > { %v2857_v32 = vpop.permute.xlu0 %2856 }
0x1214   : > { %4983 = vmatpush3.bf16.msra.mxu1 %v2857_v32 }
0x1215   : > { %v5383_v27 = vpop.eup %5382  ;;  %4984 = vmatprep.subr.bf16.mxu1 %v5519_v1 }
0x1216   : > { %v2847_v34 = vmul.f32 %v5383_v27, %v6483_v18 }
0x1217   : > { %v2855_v35 = vpop.permute.xlu0 %2854 }
0x1218   : > { %v2851_v31 = vpack.c.bf16 %v2847_v34, %v2846_v29  ;;  %4985 = vmatpush3.bf16.msra.mxu1 %v2855_v35 }
0x1219   : > { %5012 = vmatprep.subr.bf16.mxu1 %v5519_v1  ;;  %v5385_v40 = vpop.eup %5384 }
0x121a   : > { %v2848_v46 = vmul.f32 %v5385_v40, %v6487_v4  ;;  %v2945_v4 = vsel %vm916_vm4, %v4413_v43, 0 }
0x121b   : > { %4987 = vmatmul.mubr.msk.bf16.vlgmr.msra.gmra.mxu1 %vm840_vm3, %v2851_v31  ;;  %4999 = vmatpush3.bf16.msra.mxu0 %v2945_v4  ;;  %v3082_v13 = vpop.permute.xlu0 %3081  ;;  %v3074_v31 = vpop.permute.xlu1 %3073 }
0x121c   : > { %4990 = vmatprep.mubr.msk.bf16.mxu1 %vm5520_vm0, %v5519_v1  ;;  %5013 = vmatpush3.bf16.msra.mxu1 %v3013_v54  ;;  %v3099_v9 = vsel %vm755_vm2, %v3082_v13, 0 }
0x121d   : > { %v5387_v44 = vpop.eup %5386  ;;  %5044 = vmatprep.subr.bf16.mxu1 %v5519_v1  ;;  %5026 = vmatprep.subr.bf16.mxu0 %v5519_v1 }
0x121e   : > { %v2849_v2 = vmul.f32 %v5387_v44, %v6489_v38  ;;  %v5389_v26 = vpop.eup %5388 }
0x121f   : > { %v2850_v5 = vmul.f32 %v5389_v26, %v6493_v33  ;;  %v3080_v8 = vpop.permute.xlu0 %3079 }
0x1220   : > { %v2852_v49 = vpack.c.bf16 %v2849_v2, %v2848_v46  ;;  %v3096_v61 = vsel %vm755_vm2, %v3080_v8, 0 }
0x1221   : > { %v2853_v18 = vpack.c.bf16 %v2850_v5, %v2850_v5 }
0x1223   : > { %4991 = vmatmul.mubr.msk.bf16.gmra.mxu1 %vm840_vm3, %v2852_v49  ;;  %v3078_v21 = vpop.permute.xlu0 %3077 }
0x1224   : > { %4994 = vmatprep.mubr.msk.bf16.mxu1 %vm5520_vm0, %v5519_v1  ;;  %v3093_v34 = vsel %vm755_vm2, %v3078_v21, 0 }
0x1227   : > { %v3072_v35 = vpop.permute.xlu0 %3071 }
0x122b   : > { %4995 = vmatmul.mubr.msk.bf16.gmra.mxu1 %vm840_vm3, %v2853_v18  ;;  %v3076_v40 = vpop.permute.xlu0 %3075 }
0x122c   : > { %5014 = vmatprep.mubr.msk.bf16.mxu1 %vm5520_vm0, %v5519_v1 }
0x12a2   : > { %v2673_v38 = vpop.f32.mrf.mxu1 }
0x12a4   : > { %v4952_v36 = vpop.f32.mrf.mxu1 }
0x12a6   : > { %v2676_v33 = vpop.f32.mrf.mxu1 }
0x12a7   : > { %v2695_v51 = vpack.c.bf16 %v2676_v33, %v2673_v38 }
0x12a8   : > { %v4953_v24 = vpop.f32.mrf.mxu1 }
0x12a9   : > { %5015 = vmatmul.mubr.msk.bf16.vlgmr.msra.gmra.mxu1 %vm755_vm2, %v2695_v51 }
0x12aa   : > { %v2681_v59 = vpop.f32.mrf.mxu1  ;;  %5018 = vmatprep.mubr.msk.bf16.mxu1 %vm5520_vm0, %v5519_v1 }
0x12ac   : > { %v4956_v45 = vpop.f32.mrf.mxu1 }
0x12ae   : > { %v2684_v10 = vpop.f32.mrf.mxu1 }
0x12af   : > { %v2696_v63 = vpack.c.bf16 %v2684_v10, %v2681_v59 }
0x12b0   : > { %v4957_v14 = vpop.f32.mrf.mxu1 }
0x12b1   : > { %5019 = vmatmul.mubr.msk.bf16.gmra.mxu1 %vm755_vm2, %v2696_v63 }
0x12b2   : > { %v2689_v62 = vpop.f32.mrf.mxu1  ;;  %5022 = vmatprep.mubr.msk.bf16.mxu1 %vm5520_vm0, %v5519_v1 }
0x12b3   : > { %v2697_v3 = vpack.c.bf16 %v2689_v62, %v2689_v62 }
0x12b4   : > { %v4960_v42 = vpop.f32.mrf.mxu1 }
0x12b6   : > { %v2692_v47 = vpop.f32.mrf.mxu1 }
0x12b8   : > { %v4961_v41 = vpop.f32.mrf.mxu1 }
0x12b9   : > { %5023 = vmatmul.mubr.msk.bf16.gmra.mxu1 %vm755_vm2, %v2697_v3 }
0x12ba   : > { %5050 = vmatprep.mubr.msk.bf16.mxu1 %vm5520_vm0, %v5519_v1 }
0x12db   : > { %v2908_v16 = vpop.f32.mrf.mxu1 }
0x12dd   : > { %v4988_v55 = vpop.f32.mrf.mxu1 }
0x12df   : > { %v2911_v0 = vpop.f32.mrf.mxu1 }
0x12e0   : > { %v2930_v6 = vpack.c.bf16 %v2911_v0, %v2908_v16 }
0x12e1   : > { %v4989_v57 = vpop.f32.mrf.mxu1 }
0x12e2   : > { %5001 = vmatmul.mubr.msk.bf16.vlgmr.msra.gmra.mxu0 %vm755_vm2, %v2930_v6 }
0x12e3   : > { %5027 = vmatpush3.bf16.xpose.msra.mxu0 %v3099_v9  ;;  %v2916_v7 = vpop.f32.mrf.mxu1  ;;  %5004 = vmatprep.mubr.msk.bf16.mxu0 %vm5520_vm0, %v5519_v1 }
0x12e4   : > { %5028 = vmatprep.subr.bf16.mxu0 %v5519_v1 }
0x12e5   : > { %v4992_v17 = vpop.f32.mrf.mxu1 }
0x12e7   : > { %v2919_v22 = vpop.f32.mrf.mxu1 }
0x12e8   : > { %v2931_v12 = vpack.c.bf16 %v2919_v22, %v2916_v7 }
0x12e9   : > { %v4993_v23 = vpop.f32.mrf.mxu1 }
0x12ea   : > { %5005 = vmatmul.mubr.msk.bf16.gmra.mxu0 %vm755_vm2, %v2931_v12 }
0x12eb   : > { %5029 = vmatpush3.bf16.xpose.msra.mxu0 %v3096_v61  ;;  %v2924_v19 = vpop.f32.mrf.mxu1  ;;  %5008 = vmatprep.mubr.msk.bf16.mxu0 %vm5520_vm0, %v5519_v1 }
0x12ec   : > { %5030 = vmatprep.subr.bf16.mxu0 %v5519_v1  ;;  %v2932_v27 = vpack.c.bf16 %v2924_v19, %v2924_v19 }
0x12ed   : > { %v4996_v30 = vpop.f32.mrf.mxu1 }
0x12ef   : > { %v2927_v32 = vpop.f32.mrf.mxu1 }
0x12f1   : > { %v4997_v29 = vpop.f32.mrf.mxu1 }
0x12f2   : > { %5009 = vmatmul.mubr.msk.bf16.gmra.mxu0 %vm755_vm2, %v2932_v27 }
0x12f3   : > { %5031 = vmatpush3.bf16.xpose.msra.mxu0 %v3093_v34  ;;  %5032 = vmatprep.mubr.msk.bf16.mxu0 %vm5520_vm0, %v5519_v1 }
0x12f4   : > { %5062 = vmatprep.subr.bf16.mxu0 %v5519_v1 }
0x12fa   : > { %5033 = vmatmul.mubr.msk.bf16.vlgmr.msra.gmra.mxu0 %vm755_vm2, %v3072_v35 }
0x12fb   : > { %5036 = vmatprep.mubr.msk.bf16.mxu0 %vm5520_vm0, %v5519_v1 }
0x1302   : > { %5037 = vmatmul.mubr.msk.bf16.gmra.mxu0 %vm755_vm2, %v3074_v31 }
0x1303   : > { %5040 = vmatprep.mubr.msk.bf16.mxu0 %vm5520_vm0, %v5519_v1 }
0x130a   : > { %5041 = vmatmul.mubr.msk.bf16.gmra.mxu0 %vm755_vm2, %v3076_v40 }
0x130b   : > { %5064 = vmatprep.mubr.msk.bf16.mxu0 %vm5520_vm0, %v5519_v1 }
0x1369   : > { %v3049_v44 = vpop.f32.mrf.mxu1 }
0x136b   : > { %v5016_v46 = vpop.f32.mrf.mxu1 }
0x136d   : > { %v3052_v2 = vpop.f32.mrf.mxu1 }
0x136f   : > { %v5017_v49 = vpop.f32.mrf.mxu1 }
0x1371   : > { %v3057_v26 = vpop.f32.mrf.mxu1 }
0x1373   : > { %v5020_v5 = vpop.f32.mrf.mxu1 }
0x1375   : > { %v3060_v53 = vpop.f32.mrf.mxu1 }
0x1377   : > { %v5021_v54 = vpop.f32.mrf.mxu1 }
0x1379   : > { %v3065_v18 = vpop.f32.mrf.mxu1 }
0x137b   : > { %v5024_v43 = vpop.f32.mrf.mxu1 }
0x137d   : > { %v3068_v4 = vpop.f32.mrf.mxu1 }
0x137f   : > { %v5025_v38 = vpop.f32.mrf.mxu1 }
0x13a2   : > { %v2981_v36 = vpop.f32.mrf.mxu0 }
0x13a3   : > { %v6591_v33 = vadd.f32 %v3049_v44, %v2981_v36 }
0x13a4   : > { %v5002_v51 = vpop.f32.mrf.mxu0 }
0x13a6   : > { %v2984_v24 = vpop.f32.mrf.mxu0 }
0x13a7   : > { %v6593_v59 = vadd.f32 %v3052_v2, %v2984_v24 }
0x13a8   : > { %v5003_v45 = vpop.f32.mrf.mxu0 }
0x13aa   : > { %v2989_v10 = vpop.f32.mrf.mxu0 }
0x13ab   : > { %v6595_v63 = vadd.f32 %v3057_v26, %v2989_v10 }
0x13ac   : > { %v5006_v14 = vpop.f32.mrf.mxu0 }
0x13ae   : > { %v2992_v62 = vpop.f32.mrf.mxu0 }
0x13af   : > { %v6597_v42 = vadd.f32 %v3060_v53, %v2992_v62 }
0x13b0   : > { %v5007_v47 = vpop.f32.mrf.mxu0 }
0x13b2   : > { %v2997_v3 = vpop.f32.mrf.mxu0 }
0x13b3   : > { %v6599_v41 = vadd.f32 %v3065_v18, %v2997_v3 }
0x13b4   : > { %v5010_v16 = vpop.f32.mrf.mxu0 }
0x13b6   : > { %v3000_v55 = vpop.f32.mrf.mxu0 }
0x13b8   : > { %v5011_v13 = vpop.f32.mrf.mxu0 }
0x13ba   : > { %v3135_v0 = vpop.f32.mrf.mxu0 }
0x13bb   : > { %v3157_v6 = vmul.f32 0.35355338, %v3135_v0 }
0x13bc   : > { %v5034_v57 = vpop.f32.mrf.mxu0 }
0x13bd   : > { %v3162_v9 = vadd.f32 %v6378_v11, %v3157_v6 }
0x13be   : > { %v3138_v7 = vpop.f32.mrf.mxu0 }
0x13bf   : > { %v3158_v17 = vmul.f32 0.35355338, %v3138_v7  ;;  %v3167_v8 = vsel %vm840_vm3, %v3162_v9, -inf }
0x13c0   : > { %3168 = vmax.xlane.f32.xlu0 %v3167_v8  ;;  %v5035_v22 = vpop.f32.mrf.mxu0 }
0x13c1   : > { %v3163_v12 = vadd.f32 %v6388_v56, %v3158_v17 }
0x13c2   : > { %v3143_v23 = vpop.f32.mrf.mxu0 }
0x13c3   : > { %v3159_v61 = vmul.f32 0.35355338, %v3143_v23  ;;  %v3170_v19 = vsel %vm840_vm3, %v3163_v12, -inf }
0x13c4   : > { %3171 = vmax.xlane.f32.xlu1 %v3170_v19  ;;  %v5038_v30 = vpop.f32.mrf.mxu0 }
0x13c5   : > { %v3164_v21 = vadd.f32 %v6398_v48, %v3159_v61 }
0x13c6   : > { %v3146_v32 = vpop.f32.mrf.mxu0 }
0x13c7   : > { %v3160_v27 = vmul.f32 0.35355338, %v3146_v32  ;;  %v3173_v29 = vsel %vm840_vm3, %v3164_v21, -inf }
0x13c8   : > { %3174 = vmax.xlane.f32.xlu0 %v3173_v29  ;;  %v5039_v34 = vpop.f32.mrf.mxu0 }
0x13c9   : > { %v3165_v35 = vadd.f32 %v6408_v15, %v3160_v27 }
0x13ca   : > { %v3151_v31 = vpop.f32.mrf.mxu0 }
0x13cb   : > { %v3161_v40 = vmul.f32 0.35355338, %v3151_v31  ;;  %v3176_v44 = vsel %vm840_vm3, %v3165_v35, -inf }
0x13cc   : > { %3177 = vmax.xlane.f32.xlu0 %v3176_v44  ;;  %v5042_v46 = vpop.f32.mrf.mxu0 }
0x13cd   : > { %v3166_v2 = vadd.f32 %v6415_v50, %v3161_v40 }
0x13ce   : > { %v3154_v49 = vpop.f32.mrf.mxu0 }
0x13cf   : > { %v3179_v26 = vsel %vm840_vm3, %v3166_v2, -inf }
0x13d0   : > { %3180 = vmax.xlane.f32.xlu0 %v3179_v26  ;;  %v5043_v5 = vpop.f32.mrf.mxu0 }
0x13d5   : > { %3229 = vrot.lane.b32.xlu1 %v6328_v37, %s6993_s1 }
0x13d9   : > { %3225 = vrot.lane.b32.xlu1 %v6324_v25, %s6993_s1 }
0x13e6   : > { %3227 = vrot.lane.b32.xlu0 %v6318_v20, %s6993_s1  ;;  %s6997_s1 = sld [smem:[#allocation14_spill]] }
0x1449   : > { %v3169_v53 = vpop.xlane.xlu0 %3168 }
0x144a   : > { %v3182_v54 = vsub.f32 %v3162_v9, %v3169_v53 }
0x144c   : > { %v3187_v18 = vmul.f32 1.442695, %v3182_v54 }
0x144d   : > { %v3172_v43 = vpop.xlane.xlu1 %3171 }
0x144e   : > { %5390 = vpow2.f32 %v3187_v18  ;;  %v3183_v4 = vsub.f32 %v3163_v12, %v3172_v43 }
0x1450   : > { %v3189_v38 = vmul.f32 1.442695, %v3183_v4 }
0x1451   : > { %v3230_v36 = vpop.permute.xlu1 %3229  ;;  %v3175_v51 = vpop.xlane.xlu0 %3174 }
0x1452   : > { %5392 = vpow2.f32 %v3189_v38  ;;  %v3243_v24 = vsel %vm916_vm4, %v3230_v36, 0  ;;  %v3184_v45 = vsub.f32 %v3164_v21, %v3175_v51 }
0x1453   : > { %5045 = vmatpush3.bf16.msra.mxu1 %v3243_v24 }
0x1454   : > { %v3191_v10 = vmul.f32 1.442695, %v3184_v45  ;;  %5046 = vmatprep.subr.bf16.mxu1 %v5519_v1 }
0x1455   : > { %v3178_v14 = vpop.xlane.xlu0 %3177  ;;  %v3226_v7 = vpop.permute.xlu1 %3225 }
0x1456   : > { %5394 = vpow2.f32 %v3191_v10  ;;  %v3185_v62 = vsub.f32 %v3165_v35, %v3178_v14  ;;  %v4426_v14 = vld [vmem:[%s6931_s6 + $0x18] sm:$0xf] }
0x1458   : > { %v3193_v47 = vmul.f32 1.442695, %v3185_v62  ;;  %v3316_v62 = vsel %vm916_vm4, %v4426_v14, 0 }
0x1459   : > { %v3181_v3 = vpop.xlane.xlu0 %3180  ;;  %5063 = vmatpush3.bf16.msra.mxu0 %v3316_v62 }
0x145a   : > { %5396 = vpow2.f32 %v3193_v47  ;;  %v3186_v16 = vsub.f32 %v3166_v2, %v3181_v3  ;;  %5094 = vmatprep.subr.bf16.mxu0 %v5519_v1 }
0x145b   : > { %v5391_v55 = vpop.eup %5390 }
0x145c   : > { %v3195_v13 = vmul.f32 1.442695, %v3186_v16  ;;  %v3197_v0 = vsel %vm840_vm3, %v5391_v55, 0.0 }
0x145d   : > { %3198 = vadd.xlane.f32.xlu0 %v3197_v0  ;;  %v3228_v6 = vpop.permute.xlu0 %3227 }
0x145e   : > { %5398 = vpow2.f32 %v3195_v13  ;;  %5047 = vmatpush3.bf16.msra.mxu1 %v3228_v6 }
0x145f   : > { %v5393_v57 = vpop.eup %5392  ;;  %5048 = vmatprep.subr.bf16.mxu1 %v5519_v1 }
0x1460   : > { %v3200_v9 = vsel %vm840_vm3, %v5393_v57, 0.0 }
0x1461   : > { %3201 = vadd.xlane.f32.xlu1 %v3200_v9 }
0x1462   : > { %5049 = vmatpush3.bf16.msra.mxu1 %v3226_v7 }
0x1463   : > { %v5395_v17 = vpop.eup %5394  ;;  %5076 = vmatprep.subr.bf16.mxu1 %v5519_v1 }
0x1464   : > { %v3203_v8 = vsel %vm840_vm3, %v5395_v17, 0.0 }
0x1465   : > { %3204 = vadd.xlane.f32.xlu0 %v3203_v8 }
0x1467   : > { %v5397_v22 = vpop.eup %5396 }
0x1468   : > { %v3206_v12 = vsel %vm840_vm3, %v5397_v22, 0.0 }
0x1469   : > { %3207 = vadd.xlane.f32.xlu1 %v3206_v12 }
0x146b   : > { %v5399_v23 = vpop.eup %5398 }
0x146c   : > { %v3209_v61 = vsel %vm840_vm3, %v5399_v23, 0.0 }
0x146d   : > { %3210 = vadd.xlane.f32.xlu0 %v3209_v61 }
0x147a   : > { %3389 = vrot.lane.b32.xlu1 %v6328_v37, %s6994_s26 }
0x147e   : > { %3385 = vrot.lane.b32.xlu1 %v6324_v25, %s6994_s26 }
0x1482   : > { %3381 = vrot.lane.b32.xlu1 %v6318_v20, %s6995_s30 }
0x1483   : > { %3387 = vrot.lane.b32.xlu0 %v6318_v20, %s6994_s26 }
0x1487   : > { %3379 = vrot.lane.b32.xlu0 %v6324_v25, %s6995_s30 }
0x148b   : > { %3383 = vrot.lane.b32.xlu0 %v6328_v37, %s6995_s30  ;;  %s6999_s30 = sld [smem:[#allocation17_spill]] }
0x14e6   : > { %v3199_v19 = vpop.xlane.xlu0 %3198 }
0x14e7   : > { %5400 = vrcp.f32 %v3199_v19 }
0x14ea   : > { %v3202_v30 = vpop.xlane.xlu1 %3201 }
0x14eb   : > { %5402 = vrcp.f32 %v3202_v30 }
0x14ee   : > { %v3205_v21 = vpop.xlane.xlu0 %3204 }
0x14ef   : > { %5404 = vrcp.f32 %v3205_v21 }
0x14f2   : > { %v3208_v32 = vpop.xlane.xlu1 %3207 }
0x14f3   : > { %5406 = vrcp.f32 %v3208_v32 }
0x14f4   : > { %v5401_v27 = vpop.eup %5400 }
0x14f5   : > { %v3217_v35 = vmul.f32 %v5401_v27, %v5391_v55 }
0x14f6   : > { %v3211_v29 = vpop.xlane.xlu0 %3210  ;;  %v3390_v40 = vpop.permute.xlu1 %3389 }
0x14f7   : > { %5408 = vrcp.f32 %v3211_v29  ;;  %v3407_v46 = vsel %vm755_vm2, %v3390_v40, 0 }
0x14f8   : > { %v5403_v34 = vpop.eup %5402 }
0x14f9   : > { %v3218_v31 = vmul.f32 %v5403_v34, %v5393_v57 }
0x14fa   : > { %v3388_v53 = vpop.permute.xlu0 %3387  ;;  %v3386_v38 = vpop.permute.xlu1 %3385 }
0x14fb   : > { %v3222_v44 = vpack.c.bf16 %v3218_v31, %v3217_v35  ;;  %v3404_v43 = vsel %vm755_vm2, %v3388_v53, 0  ;;  %v3401_v51 = vsel %vm755_vm2, %v3386_v38, 0 }
0x14fc   : > { %v5405_v2 = vpop.eup %5404 }
0x14fd   : > { %5051 = vmatmul.mubr.msk.bf16.vlgmr.msra.gmra.mxu1 %vm840_vm3, %v3222_v44  ;;  %v3219_v26 = vmul.f32 %v5405_v2, %v5395_v17 }
0x14fe   : > { %5077 = vmatpush3.bf16.xpose.msra.mxu1 %v3407_v46  ;;  %5054 = vmatprep.mubr.msk.bf16.mxu1 %vm5520_vm0, %v5519_v1  ;;  %v3380_v24 = vpop.permute.xlu0 %3379  ;;  %v3382_v45 = vpop.permute.xlu1 %3381 }
0x14ff   : > { %5078 = vmatprep.subr.bf16.mxu1 %v5519_v1 }
0x1500   : > { %v5407_v49 = vpop.eup %5406 }
0x1501   : > { %v3220_v5 = vmul.f32 %v5407_v49, %v5397_v22 }
0x1502   : > { %v3384_v10 = vpop.permute.xlu0 %3383 }
0x1503   : > { %v3223_v54 = vpack.c.bf16 %v3220_v5, %v3219_v26 }
0x1504   : > { %v5409_v18 = vpop.eup %5408 }
0x1505   : > { %5055 = vmatmul.mubr.msk.bf16.gmra.mxu1 %vm840_vm3, %v3223_v54  ;;  %v3221_v4 = vmul.f32 %v5409_v18, %v5399_v23 }
0x1506   : > { %5079 = vmatpush3.bf16.xpose.msra.mxu1 %v3404_v43  ;;  %5058 = vmatprep.mubr.msk.bf16.mxu1 %vm5520_vm0, %v5519_v1 }
0x1507   : > { %5080 = vmatprep.subr.bf16.mxu1 %v5519_v1  ;;  %v3224_v36 = vpack.c.bf16 %v3221_v4, %v3221_v4 }
0x150d   : > { %5059 = vmatmul.mubr.msk.bf16.gmra.mxu1 %vm840_vm3, %v3224_v36 }
0x150e   : > { %5081 = vmatpush3.bf16.xpose.msra.mxu1 %v3401_v51  ;;  %5082 = vmatprep.mubr.msk.bf16.mxu1 %vm5520_vm0, %v5519_v1 }
0x150f   : > { %5112 = vmatprep.subr.bf16.mxu1 %v5519_v1 }
0x1515   : > { %5083 = vmatmul.mubr.msk.bf16.vlgmr.msra.gmra.mxu1 %vm755_vm2, %v3380_v24 }
0x1516   : > { %5086 = vmatprep.mubr.msk.bf16.mxu1 %vm5520_vm0, %v5519_v1 }
0x151d   : > { %5087 = vmatmul.mubr.msk.bf16.gmra.mxu1 %vm755_vm2, %v3382_v45 }
0x151e   : > { %5090 = vmatprep.mubr.msk.bf16.mxu1 %vm5520_vm0, %v5519_v1 }
0x1525   : > { %5091 = vmatmul.mubr.msk.bf16.gmra.mxu1 %vm755_vm2, %v3384_v10 }
0x1526   : > { %5114 = vmatprep.mubr.msk.bf16.mxu1 %vm5520_vm0, %v5519_v1 }
0x15bd   : > { %v3279_v47 = vpop.f32.mrf.mxu1 }
0x15bf   : > { %v5052_v3 = vpop.f32.mrf.mxu1 }
0x15c1   : > { %v3282_v16 = vpop.f32.mrf.mxu1 }
0x15c2   : > { %v3301_v55 = vpack.c.bf16 %v3282_v16, %v3279_v47 }
0x15c3   : > { %v5053_v13 = vpop.f32.mrf.mxu1 }
0x15c4   : > { %5065 = vmatmul.mubr.msk.bf16.vlgmr.msra.gmra.mxu0 %vm755_vm2, %v3301_v55 }
0x15c5   : > { %v3287_v0 = vpop.f32.mrf.mxu1  ;;  %5068 = vmatprep.mubr.msk.bf16.mxu0 %vm5520_vm0, %v5519_v1 }
0x15c7   : > { %v5056_v6 = vpop.f32.mrf.mxu1 }
0x15c9   : > { %v3290_v57 = vpop.f32.mrf.mxu1 }
0x15ca   : > { %v3302_v9 = vpack.c.bf16 %v3290_v57, %v3287_v0 }
0x15cb   : > { %v5057_v7 = vpop.f32.mrf.mxu1 }
0x15cc   : > { %5069 = vmatmul.mubr.msk.bf16.gmra.mxu0 %vm755_vm2, %v3302_v9 }
0x15cd   : > { %v3295_v17 = vpop.f32.mrf.mxu1  ;;  %5072 = vmatprep.mubr.msk.bf16.mxu0 %vm5520_vm0, %v5519_v1 }
0x15ce   : > { %v3303_v12 = vpack.c.bf16 %v3295_v17, %v3295_v17 }
0x15cf   : > { %v5060_v8 = vpop.f32.mrf.mxu1 }
0x15d1   : > { %v3298_v22 = vpop.f32.mrf.mxu1 }
0x15d3   : > { %v5061_v23 = vpop.f32.mrf.mxu1 }
0x15d4   : > { %5073 = vmatmul.mubr.msk.bf16.gmra.mxu0 %vm755_vm2, %v3303_v12 }
0x15d5   : > { %v3443_v61 = vpop.f32.mrf.mxu1  ;;  %5100 = vmatprep.mubr.msk.bf16.mxu0 %vm5520_vm0, %v5519_v1 }
0x15d6   : > { %v3465_v19 = vmul.f32 0.35355338, %v3443_v61 }
0x15d7   : > { %v5084_v30 = vpop.f32.mrf.mxu1 }
0x15d8   : > { %v3470_v21 = vadd.f32 %v6378_v11, %v3465_v19 }
0x15d9   : > { %v3446_v32 = vpop.f32.mrf.mxu1 }
0x15da   : > { %v3466_v27 = vmul.f32 0.35355338, %v3446_v32  ;;  %v3475_v29 = vsel %vm840_vm3, %v3470_v21, -inf }
0x15db   : > { %3476 = vmax.xlane.f32.xlu1 %v3475_v29  ;;  %v5085_v34 = vpop.f32.mrf.mxu1 }
0x15dc   : > { %v3471_v35 = vadd.f32 %v6388_v56, %v3466_v27 }
0x15dd   : > { %v3451_v31 = vpop.f32.mrf.mxu1 }
0x15de   : > { %v3467_v40 = vmul.f32 0.35355338, %v3451_v31  ;;  %v3478_v44 = vsel %vm840_vm3, %v3471_v35, -inf }
0x15df   : > { %3479 = vmax.xlane.f32.xlu0 %v3478_v44  ;;  %v5088_v46 = vpop.f32.mrf.mxu1 }
0x15e0   : > { %v3472_v2 = vadd.f32 %v6398_v48, %v3467_v40 }
0x15e1   : > { %v3454_v49 = vpop.f32.mrf.mxu1 }
0x15e2   : > { %v3468_v26 = vmul.f32 0.35355338, %v3454_v49  ;;  %v3481_v11 = vsel %vm840_vm3, %v3472_v2, -inf }
0x15e3   : > { %3482 = vmax.xlane.f32.xlu0 %v3481_v11  ;;  %v5089_v5 = vpop.f32.mrf.mxu1 }
0x15e4   : > { %v3473_v53 = vadd.f32 %v6408_v15, %v3468_v26 }
0x15e5   : > { %v3459_v54 = vpop.f32.mrf.mxu1 }
0x15e6   : > { %v3469_v18 = vmul.f32 0.35355338, %v3459_v54  ;;  %v3484_v56 = vsel %vm840_vm3, %v3473_v53, -inf }
0x15e7   : > { %3485 = vmax.xlane.f32.xlu1 %v3484_v56  ;;  %v5092_v43 = vpop.f32.mrf.mxu1 }
0x15e8   : > { %v3474_v4 = vadd.f32 %v6415_v50, %v3469_v18 }
0x15e9   : > { %v3462_v38 = vpop.f32.mrf.mxu1 }
0x15ea   : > { %v3487_v36 = vsel %vm840_vm3, %v3474_v4, -inf }
0x15eb   : > { %3488 = vmax.xlane.f32.xlu0 %v3487_v36  ;;  %v5093_v48 = vpop.f32.mrf.mxu1 }
0x15f8   : > { %3537 = vrot.lane.b32.xlu1 %v6328_v37, %s6996_s20 }
0x1664   : > { %v3477_v51 = vpop.xlane.xlu1 %3476 }
0x1665   : > { %v3490_v24 = vsub.f32 %v3470_v21, %v3477_v51 }
0x1667   : > { %v3495_v45 = vmul.f32 1.442695, %v3490_v24 }
0x1668   : > { %v3480_v15 = vpop.xlane.xlu0 %3479 }
0x1669   : > { %5410 = vpow2.f32 %v3495_v45  ;;  %v3491_v10 = vsub.f32 %v3471_v35, %v3480_v15 }
0x166b   : > { %v3497_v14 = vmul.f32 1.442695, %v3491_v10 }
0x166c   : > { %v3483_v62 = vpop.xlane.xlu0 %3482 }
0x166d   : > { %5412 = vpow2.f32 %v3497_v14  ;;  %v3492_v47 = vsub.f32 %v3472_v2, %v3483_v62  ;;  %v4436_v62 = vld [vmem:[%s6931_s6 + $0x1c] sm:$0xf] }
0x166f   : > { %v3499_v3 = vmul.f32 1.442695, %v3492_v47  ;;  %v3624_v47 = vsel %vm916_vm4, %v4436_v62, 0 }
0x1670   : > { %v3486_v50 = vpop.xlane.xlu1 %3485  ;;  %5113 = vmatpush3.bf16.msra.mxu1 %v3624_v47 }
0x1671   : > { %5414 = vpow2.f32 %v3499_v3  ;;  %v3493_v16 = vsub.f32 %v3473_v53, %v3486_v50  ;;  %5142 = vmatprep.subr.bf16.mxu1 %v5519_v1 }
0x1673   : > { %v3501_v55 = vmul.f32 1.442695, %v3493_v16 }
0x1674   : > { %v3538_v13 = vpop.permute.xlu1 %3537  ;;  %v3489_v46 = vpop.xlane.xlu0 %3488 }
0x1675   : > { %5416 = vpow2.f32 %v3501_v55  ;;  %v3551_v0 = vsel %vm916_vm4, %v3538_v13, 0  ;;  %v3494_v2 = vsub.f32 %v3474_v4, %v3489_v46 }
0x1676   : > { %v5411_v37 = vpop.eup %5410  ;;  %5095 = vmatpush3.bf16.msra.mxu0 %v3551_v0 }
0x1677   : > { %v3505_v6 = vsel %vm840_vm3, %v5411_v37, 0.0  ;;  %5096 = vmatprep.subr.bf16.mxu0 %v5519_v1  ;;  %v3503_v49 = vmul.f32 1.442695, %v3494_v2 }
0x1678   : > { %3506 = vadd.xlane.f32.xlu1 %v3505_v6 }
0x1679   : > { %5418 = vpow2.f32 %v3503_v49 }
0x167a   : > { %v5413_v57 = vpop.eup %5412 }
0x167b   : > { %v3508_v9 = vsel %vm840_vm3, %v5413_v57, 0.0 }
0x167c   : > { %3509 = vadd.xlane.f32.xlu0 %v3508_v9 }
0x167e   : > { %v5415_v7 = vpop.eup %5414 }
0x167f   : > { %v3511_v17 = vsel %vm840_vm3, %v5415_v7, 0.0 }
0x1680   : > { %3512 = vadd.xlane.f32.xlu1 %v3511_v17 }
0x1682   : > { %v5417_v8 = vpop.eup %5416 }
0x1683   : > { %v3514_v22 = vsel %vm840_vm3, %v5417_v8, 0.0 }
0x1684   : > { %3515 = vadd.xlane.f32.xlu0 %v3514_v22  ;;  %v3352_v12 = vpop.f32.mrf.mxu0 }
0x1685   : > { %v6695_v23 = vadd.f32 %v3352_v12, %v6591_v33 }
0x1686   : > { %v5066_v61 = vpop.f32.mrf.mxu0 }
0x1688   : > { %v3355_v19 = vpop.f32.mrf.mxu0 }
0x1689   : > { %v6698_v30 = vadd.f32 %v3355_v19, %v6593_v59  ;;  %v4441_v19 = vld [vmem:[%s6932_s7 + $0x1] ss:$0 sm:$0xff] }
0x168a   : > { %v5067_v21 = vpop.f32.mrf.mxu0 }
0x168c   : > { %v3360_v32 = vpop.f32.mrf.mxu0 }
0x168d   : > { %v6701_v27 = vadd.f32 %v3360_v32, %v6595_v63 }
0x168e   : > { %v5070_v29 = vpop.f32.mrf.mxu0 }
0x1690   : > { %v3363_v34 = vpop.f32.mrf.mxu0 }
0x1691   : > { %v6704_v35 = vadd.f32 %v3363_v34, %v6597_v42  ;;  %3533 = vrot.lane.b32.xlu1 %v6324_v25, %s6996_s20  ;;  %v5419_v42 = vpop.eup %5418 }
0x1692   : > { %v5071_v33 = vpop.f32.mrf.mxu0  ;;  %v3517_v26 = vsel %vm840_vm3, %v5419_v42, 0.0 }
0x1694   : > { %v3368_v31 = vpop.f32.mrf.mxu0 }
0x1695   : > { %v6709_v40 = vadd.f32 %v3368_v31, %v6599_v41 }
0x1696   : > { %v5074_v59 = vpop.f32.mrf.mxu0 }
0x1698   : > { %v3371_v44 = vpop.f32.mrf.mxu0 }
0x169a   : > { %3535 = vrot.lane.b32.xlu0 %v6318_v20, %s6996_s20  ;;  %v5075_v63 = vpop.f32.mrf.mxu0  ;;  %s4260_s20 = sshll.u32 %s623_s19, 4  ;;  %s6886_s20 = int_to_ptr.vmem [resolvable:$true] %s4260_s20 }
0x169b   : > { %s5457_s26 = scalar_lea.vmem %s6886_s20, 128  ;;  %p5464_p0 = scmp.lt.s32.totalorder %s6886_s20, %s5462_s23 }
0x169c   : > { %p5458_p11 = scmp.ne.s32.totalorder %s6886_s20, %s5457_s26 }
0x169e   : > { %p5459_p12 = pnand %p5458_p11, %p5676_p5 }
0x16a0   : > { %p5460_p13 = pneg %p5459_p12 }
0x16b5   : > { %3518 = vadd.xlane.f32.xlu1 %v3517_v26 }
0x1701   : > { %v3507_v25 = vpop.xlane.xlu1 %3506 }
0x1702   : > { %5420 = vrcp.f32 %v3507_v25 }
0x1705   : > { %v3510_v11 = vpop.xlane.xlu0 %3509 }
0x1706   : > { %5422 = vrcp.f32 %v3510_v11 }
0x1709   : > { %v3513_v41 = vpop.xlane.xlu1 %3512 }
0x170a   : > { %5424 = vrcp.f32 %v3513_v41 }
0x170d   : > { %v3516_v5 = vpop.xlane.xlu0 %3515  ;;  %v3534_v43 = vpop.permute.xlu1 %3533 }
0x170e   : > { %5426 = vrcp.f32 %v3516_v5 }
0x170f   : > { %v5421_v53 = vpop.eup %5420 }
0x1710   : > { %v3525_v18 = vmul.f32 %v5421_v53, %v5411_v37 }
0x1711   : > { %v3536_v54 = vpop.permute.xlu0 %3535 }
0x1712   : > { %5097 = vmatpush3.bf16.msra.mxu0 %v3536_v54 }
0x1713   : > { %v5423_v20 = vpop.eup %5422  ;;  %5098 = vmatprep.subr.bf16.mxu0 %v5519_v1 }
0x1714   : > { %v3526_v56 = vmul.f32 %v5423_v20, %v5413_v57 }
0x1716   : > { %v3530_v4 = vpack.c.bf16 %v3526_v56, %v3525_v18  ;;  %5099 = vmatpush3.bf16.msra.mxu0 %v3534_v43 }
0x1717   : > { %5126 = vmatprep.subr.bf16.mxu0 %v5519_v1  ;;  %v5425_v38 = vpop.eup %5424 }
0x1718   : > { %v3527_v48 = vmul.f32 %v5425_v38, %v5415_v7 }
0x1719   : > { %5101 = vmatmul.mubr.msk.bf16.vlgmr.msra.gmra.mxu0 %vm840_vm3, %v3530_v4 }
0x171a   : > { %5104 = vmatprep.mubr.msk.bf16.mxu0 %vm5520_vm0, %v5519_v1 }
0x171b   : > { %v5427_v36 = vpop.eup %5426 }
0x171c   : > { %v3528_v51 = vmul.f32 %v5427_v36, %v5417_v8 }
0x171e   : > { %v3531_v24 = vpack.c.bf16 %v3528_v51, %v3527_v48 }
0x1721   : > { %5105 = vmatmul.mubr.msk.bf16.gmra.mxu0 %vm840_vm3, %v3531_v24 }
0x1722   : > { %5108 = vmatprep.mubr.msk.bf16.mxu0 %vm5520_vm0, %v5519_v1 }
0x173e   : > { %v3519_v45 = vpop.xlane.xlu1 %3518 }
0x173f   : > { %5428 = vrcp.f32 %v3519_v45 }
0x174c   : > { %v5429_v15 = vpop.eup %5428 }
0x174d   : > { %v3529_v10 = vmul.f32 %v5429_v15, %v5419_v42 }
0x174f   : > { %v3532_v14 = vpack.c.bf16 %v3529_v10, %v3529_v10 }
0x1751   : > { %5109 = vmatmul.mubr.msk.bf16.gmra.mxu0 %vm840_vm3, %v3532_v14 }
0x1752   : > { %5130 = vmatprep.mubr.msk.bf16.mxu0 %vm5520_vm0, %v5519_v1 }
0x17d9   : > { %v3587_v3 = vpop.f32.mrf.mxu0 }
0x17db   : > { %v5102_v50 = vpop.f32.mrf.mxu0 }
0x17dd   : > { %v3590_v16 = vpop.f32.mrf.mxu0 }
0x17de   : > { %v3609_v55 = vpack.c.bf16 %v3590_v16, %v3587_v3 }
0x17df   : > { %v5103_v13 = vpop.f32.mrf.mxu0 }
0x17e0   : > { %5115 = vmatmul.mubr.msk.bf16.vlgmr.msra.gmra.mxu1 %vm755_vm2, %v3609_v55 }
0x17e1   : > { %v3595_v0 = vpop.f32.mrf.mxu0  ;;  %5118 = vmatprep.mubr.msk.bf16.mxu1 %vm5520_vm0, %v5519_v1 }
0x17e3   : > { %v5106_v37 = vpop.f32.mrf.mxu0 }
0x17e4   : > { %v5243_v37 = vld [vmem:[%s6933_s8 + $0x10] sm:$0xff]  }
0x17e5   : > { %v3598_v6 = vpop.f32.mrf.mxu0 }
0x17e6   : > { %v3610_v57 = vpack.c.bf16 %v3598_v6, %v3595_v0  ;;  %v5242_v0 = vld [vmem:[%s6933_s8 + $0x18] sm:$0xff]  }
0x17e7   : > { %v5107_v9 = vpop.f32.mrf.mxu0  ;;  %5127 = vmatpush3.bf16.msra.mxu0 %v5242_v0 }
0x17e8   : > { %5119 = vmatmul.mubr.msk.bf16.gmra.mxu1 %vm755_vm2, %v3610_v57  ;;  %5128 = vmatprep.subr.bf16.mxu0 %v5519_v1 }
0x17e9   : > { %5122 = vmatprep.mubr.msk.bf16.mxu1 %vm5520_vm0, %v5519_v1 }
0x17eb   : > { %5129 = vmatpush3.bf16.msra.mxu0 %v5243_v37 }
0x17ec   : > { %5162 = vmatprep.subr.bf16.mxu0 %v5519_v1 }
0x1811   : > { %v3603_v7 = vpop.f32.mrf.mxu0 }
0x1812   : > { %v3611_v17 = vpack.c.bf16 %v3603_v7, %v3603_v7 }
0x1813   : > { %v5110_v8 = vpop.f32.mrf.mxu0 }
0x1814   : > { %5123 = vmatmul.mubr.msk.bf16.gmra.mxu1 %vm755_vm2, %v3611_v17  ;;  %v5244_v8 = vld [vmem:[%s6935_s10 + $0x38] sm:$0xff]  }
0x1815   : > { %v3606_v22 = vpop.f32.mrf.mxu0  ;;  %5150 = vmatprep.mubr.msk.bf16.mxu1 %vm5520_vm0, %v5519_v1  ;;  %5143 = vmatpush3.bf16.msra.mxu1 %v5244_v8 }
0x1816   : > { %5144 = vmatprep.subr.bf16.mxu1 %v5519_v1 }
0x1817   : > { %v5111_v12 = vpop.f32.mrf.mxu0 }
0x18a0   : > { %v3660_v61 = vpop.f32.mrf.mxu1 }
0x18a1   : > { %v3682_v21 = vadd.f32 %v3660_v61, %v6695_v23 }
0x18a2   : > { %v5116_v32 = vpop.f32.mrf.mxu1 }
0x18a3   : > { %v3695_v29 = vadd.f32 %v4441_v19, %v3682_v21 }
0x18a4   : > { %v3663_v34 = vpop.f32.mrf.mxu1 }
0x18a5   : > { %v3683_v33 = vadd.f32 %v3663_v34, %v6698_v30  ;;  %v3700_v31 = vadd.f32 %v3695_v29, %v6290_v28 }
0x18a6   : > { %v5117_v59 = vpop.f32.mrf.mxu1 }
0x18a7   : > { %v3696_v44 = vadd.f32 %v4441_v19, %v3683_v33  ;;  %v3709_v46 = vsel %vm677_vm1, %v3700_v31, 0.0 }
0x18a8   : > { %3710 = vadd.xlane.f32.xlu0 %v3709_v46  ;;  %v3668_v63 = vpop.f32.mrf.mxu1 }
0x18a9   : > { %v3684_v2 = vadd.f32 %v3668_v63, %v6701_v27  ;;  %v3701_v49 = vadd.f32 %v3696_v44, %v6292_v39 }
0x18aa   : > { %v5120_v42 = vpop.f32.mrf.mxu1 }
0x18ab   : > { %v3697_v26 = vadd.f32 %v4441_v19, %v3684_v2  ;;  %v3712_v23 = vsel %vm677_vm1, %v3701_v49, 0.0  ;;  %v4444_v2 = vld [vmem:[%s6937_s12 + $0x1] ss:$0 sm:$0xff] }
0x18ac   : > { %3713 = vadd.xlane.f32.xlu0 %v3712_v23  ;;  %v3671_v25 = vpop.f32.mrf.mxu1  ;;  %v4445_v23 = vld [vmem:[%s6938_s13 + $0x1] ss:$0 sm:$0xff] }
0x18ad   : > { %v3685_v30 = vadd.f32 %v3671_v25, %v6704_v35  ;;  %v3702_v28 = vadd.f32 %v3697_v26, %v6299_v58 }
0x18ae   : > { %v5121_v11 = vpop.f32.mrf.mxu1 }
0x18af   : > { %v3698_v41 = vadd.f32 %v4441_v19, %v3685_v30  ;;  %v3715_v5 = vsel %vm677_vm1, %v3702_v28, 0.0 }
0x18b0   : > { %3716 = vadd.xlane.f32.xlu1 %v3715_v5 }
0x18b1   : > { %v3703_v53 = vadd.f32 %v3698_v41, %v6301_v60 }
0x18b3   : > { %v3718_v27 = vsel %vm677_vm1, %v3703_v53, 0.0 }
0x18b4   : > { %3719 = vadd.xlane.f32.xlu0 %v3718_v27 }
0x18d4   : > { %v3676_v39 = vpop.f32.mrf.mxu1 }
0x18d5   : > { %v3686_v54 = vadd.f32 %v3676_v39, %v6709_v40 }
0x18d6   : > { %v5124_v20 = vpop.f32.mrf.mxu1 }
0x18d7   : > { %v3699_v18 = vadd.f32 %v4441_v19, %v3686_v54 }
0x18d8   : > { %v3679_v56 = vpop.f32.mrf.mxu1 }
0x18d9   : > { %v3704_v35 = vadd.f32 %v3699_v18, %v6308_v52 }
0x18da   : > { %v5125_v43 = vpop.f32.mrf.mxu1 }
0x18db   : > { %v3721_v58 = vsel %vm677_vm1, %v3704_v35, 0.0 }
0x18dc   : > { %3722 = vadd.xlane.f32.xlu1 %v3721_v58 }
0x1931   : > { %v3711_v4 = vpop.xlane.xlu0 %3710 }
0x1932   : > { %v3724_v38 = vmul.f32 0.03125, %v3711_v4 }
0x1934   : > { %v3729_v36 = vsub.f32 %v3700_v31, %v3724_v38 }
0x1935   : > { %v3714_v48 = vpop.xlane.xlu0 %3713 }
0x1936   : > { %v3725_v60 = vmul.f32 0.03125, %v3714_v48  ;;  %v3734_v51 = vmul.f32 %v3729_v36, %v3729_v36 }
0x1938   : > { %v3730_v24 = vsub.f32 %v3701_v49, %v3725_v60  ;;  %v3739_v45 = vsel %vm677_vm1, %v3734_v51, 0.0  ;;  %v5245_v51 = vld [vmem:[%s6935_s10 + $0x30] sm:$0xff]  }
0x1939   : > { %v3717_v15 = vpop.xlane.xlu1 %3716  ;;  %3740 = vadd.xlane.f32.xlu0 %v3739_v45  ;;  %5145 = vmatpush3.bf16.msra.mxu1 %v5245_v51  ;;  %v5247_v45 = vld [vmem:[%s6935_s10 + $0x20] sm:$0xff]  }
0x193a   : > { %v3726_v40 = vmul.f32 0.03125, %v3717_v15  ;;  %v3735_v10 = vmul.f32 %v3730_v24, %v3730_v24  ;;  %5146 = vmatprep.subr.bf16.mxu1 %v5519_v1  ;;  %v4451_v15 = vld [vmem:[%s6934_s9 + $0x1] ss:$0 sm:$0xff] }
0x193c   : > { %v3731_v14 = vsub.f32 %v3702_v28, %v3726_v40  ;;  %v3742_v52 = vsel %vm677_vm1, %v3735_v10, 0.0 }
0x193d   : > { %v3720_v62 = vpop.xlane.xlu0 %3719  ;;  %3743 = vadd.xlane.f32.xlu1 %v3742_v52 }
0x193e   : > { %v3727_v47 = vmul.f32 0.03125, %v3720_v62  ;;  %v3736_v3 = vmul.f32 %v3731_v14, %v3731_v14 }
0x1940   : > { %v3732_v50 = vsub.f32 %v3703_v53, %v3727_v47  ;;  %v3745_v16 = vsel %vm677_vm1, %v3736_v3, 0.0 }
0x1941   : > { %3746 = vadd.xlane.f32.xlu0 %v3745_v16 }
0x1942   : > { %v3737_v55 = vmul.f32 %v3732_v50, %v3732_v50 }
0x1944   : > { %v3748_v13 = vsel %vm677_vm1, %v3737_v55, 0.0 }
0x1945   : > { %3749 = vadd.xlane.f32.xlu1 %v3748_v13 }
0x1965   : > { %v3723_v6 = vpop.xlane.xlu1 %3722 }
0x1966   : > { %v3728_v57 = vmul.f32 0.03125, %v3723_v6 }
0x1968   : > { %v3733_v9 = vsub.f32 %v3704_v35, %v3728_v57 }
0x196a   : > { %v3738_v7 = vmul.f32 %v3733_v9, %v3733_v9 }
0x196c   : > { %v3751_v17 = vsel %vm677_vm1, %v3738_v7, 0.0 }
0x196d   : > { %3752 = vadd.xlane.f32.xlu0 %v3751_v17 }
0x19c2   : > { %v3741_v22 = vpop.xlane.xlu0 %3740 }
0x19c3   : > { %v3754_v12 = vmul.f32 0.03125, %v3741_v22 }
0x19c5   : > { %v3759_v61 = vadd.f32 1e-05, %v3754_v12 }
0x19c6   : > { %v3744_v19 = vpop.xlane.xlu1 %3743 }
0x19c7   : > { %5430 = vrsqrt.f32 %v3759_v61  ;;  %v3755_v21 = vmul.f32 0.03125, %v3744_v19 }
0x19c9   : > { %v3760_v32 = vadd.f32 1e-05, %v3755_v21 }
0x19ca   : > { %v3747_v29 = vpop.xlane.xlu0 %3746 }
0x19cb   : > { %5432 = vrsqrt.f32 %v3760_v32  ;;  %v3756_v34 = vmul.f32 0.03125, %v3747_v29 }
0x19cd   : > { %v3761_v33 = vadd.f32 1e-05, %v3756_v34 }
0x19ce   : > { %v3750_v31 = vpop.xlane.xlu1 %3749 }
0x19cf   : > { %5434 = vrsqrt.f32 %v3761_v33  ;;  %v3757_v59 = vmul.f32 0.03125, %v3750_v31  ;;  %v4466_v31 = vld [vmem:[%s6936_s11 + $0x1] ss:$0 sm:$0xff] }
0x19d1   : > { %v3762_v44 = vadd.f32 1e-05, %v3757_v59 }
0x19d3   : > { %5436 = vrsqrt.f32 %v3762_v44 }
0x19d4   : > { %v5431_v46 = vpop.eup %5430 }
0x19d5   : > { %v3769_v63 = vmul.f32 %v5431_v46, %v3729_v36 }
0x19d7   : > { %v3780_v42 = vmul.f32 %v4444_v2, %v3769_v63 }
0x19d8   : > { %v5433_v49 = vpop.eup %5432 }
0x19d9   : > { %v3770_v26 = vmul.f32 %v5433_v49, %v3730_v24  ;;  %v6780_v28 = vadd.f32 %v4445_v23, %v3780_v42  ;;  %v5246_v24 = vld [vmem:[%s6935_s10 + $0x28] sm:$0xff]  }
0x19da   : > { %5147 = vmatpush3.bf16.msra.mxu1 %v5246_v24 }
0x19db   : > { %v3781_v25 = vmul.f32 %v4444_v2, %v3770_v26  ;;  %5148 = vmatprep.subr.bf16.mxu1 %v5519_v1 }
0x19dc   : > { %v5435_v30 = vpop.eup %5434 }
0x19dd   : > { %v6782_v11 = vadd.f32 %v4445_v23, %v3781_v25  ;;  %v3771_v41 = vmul.f32 %v5435_v30, %v3731_v14 }
0x19de   : > { %5149 = vmatpush3.bf16.msra.mxu1 %v5247_v45 }
0x19df   : > { %v3796_v5 = vpack.c.bf16 %v6782_v11, %v6780_v28  ;;  %v3782_v39 = vmul.f32 %v4444_v2, %v3771_v41 }
0x19e0   : > { %v5437_v53 = vpop.eup %5436 }
0x19e1   : > { %v3772_v27 = vmul.f32 %v5437_v53, %v3732_v50  ;;  %5131 = vmatmul.mubr.msk.bf16.vlgmr.msra.gmra.mxu0 %vm677_vm1, %v3796_v5  ;;  %v6789_v20 = vadd.f32 %v4445_v23, %v3782_v39 }
0x19e2   : > { %5134 = vmatprep.mubr.msk.bf16.mxu0 %vm5520_vm0, %v5519_v1 }
0x19e3   : > { %v3783_v54 = vmul.f32 %v4444_v2, %v3772_v27 }
0x19e5   : > { %v6791_v18 = vadd.f32 %v4445_v23, %v3783_v54 }
0x19e7   : > { %v3797_v56 = vpack.c.bf16 %v6791_v18, %v6789_v20 }
0x19e9   : > { %5135 = vmatmul.mubr.msk.bf16.gmra.mxu0 %vm677_vm1, %v3797_v56 }
0x19ea   : > { %5138 = vmatprep.mubr.msk.bf16.mxu0 %vm5520_vm0, %v5519_v1 }
0x19f6   : > { %v3753_v35 = vpop.xlane.xlu0 %3752 }
0x19f7   : > { %v3758_v43 = vmul.f32 0.03125, %v3753_v35 }
0x19f9   : > { %v3763_v58 = vadd.f32 1e-05, %v3758_v43 }
0x19fb   : > { %5438 = vrsqrt.f32 %v3763_v58 }
0x1a08   : > { %v5439_v4 = vpop.eup %5438 }
0x1a09   : > { %v3773_v38 = vmul.f32 %v5439_v4, %v3733_v9 }
0x1a0b   : > { %v3784_v36 = vmul.f32 %v4444_v2, %v3773_v38 }
0x1a0d   : > { %v6798_v48 = vadd.f32 %v4445_v23, %v3784_v36 }
0x1a0f   : > { %v3798_v60 = vpack.c.bf16 %v6798_v48, %v6798_v48 }
0x1a11   : > { %5139 = vmatmul.mubr.msk.bf16.gmra.mxu0 %vm677_vm1, %v3798_v60 }
0x1a12   : > { %5168 = vmatprep.mubr.msk.bf16.mxu0 %vm5520_vm0, %v5519_v1 }
0x1aa1   : > { %v3867_v40 = vpop.f32.mrf.mxu0 }
0x1aa2   : > { %v3868_v14 = vadd.f32 %v4451_v15, %v3867_v40 }
0x1aa3   : > { %v5132_v10 = vpop.f32.mrf.mxu0 }
0x1aa4   : > { %v3889_v3 = vmax.f32 %v3868_v14, 0.0 }
0x1aa5   : > { %v3870_v52 = vpop.f32.mrf.mxu0 }
0x1aa6   : > { %v3871_v62 = vadd.f32 %v4451_v15, %v3870_v52 }
0x1aa7   : > { %v5133_v47 = vpop.f32.mrf.mxu0 }
0x1aa8   : > { %v3890_v50 = vmax.f32 %v3871_v62, 0.0 }
0x1aa9   : > { %v3875_v16 = vpop.f32.mrf.mxu0 }
0x1aaa   : > { %v3894_v55 = vpack.c.bf16 %v3890_v50, %v3889_v3  ;;  %v3876_v0 = vadd.f32 %v4451_v15, %v3875_v16 }
0x1aab   : > { %v5136_v13 = vpop.f32.mrf.mxu0 }
0x1aac   : > { %5151 = vmatmul.mubr.msk.bf16.vlgmr.msra.gmra.mxu1 %vm2212_vm5, %v3894_v55  ;;  %v3891_v9 = vmax.f32 %v3876_v0, 0.0 }
0x1aad   : > { %v3878_v37 = vpop.f32.mrf.mxu0  ;;  %5154 = vmatprep.mubr.msk.bf16.mxu1 %vm5520_vm0, %v5519_v1 }
0x1aae   : > { %v3879_v6 = vadd.f32 %v4451_v15, %v3878_v37 }
0x1aaf   : > { %v5137_v57 = vpop.f32.mrf.mxu0 }
0x1ab0   : > { %v3892_v7 = vmax.f32 %v3879_v6, 0.0 }
0x1ab2   : > { %v3895_v17 = vpack.c.bf16 %v3892_v7, %v3891_v9 }
0x1ab4   : > { %5155 = vmatmul.mubr.msk.bf16.gmra.mxu1 %vm2212_vm5, %v3895_v17 }
0x1ab5   : > { %5158 = vmatprep.mubr.msk.bf16.mxu1 %vm5520_vm0, %v5519_v1 }
0x1ad1   : > { %v3883_v8 = vpop.f32.mrf.mxu0 }
0x1ad2   : > { %v3884_v22 = vadd.f32 %v4451_v15, %v3883_v8 }
0x1ad3   : > { %v5140_v12 = vpop.f32.mrf.mxu0 }
0x1ad4   : > { %v3893_v61 = vmax.f32 %v3884_v22, 0.0 }
0x1ad5   : > { %v3886_v19 = vpop.f32.mrf.mxu0 }
0x1ad6   : > { %v3896_v21 = vpack.c.bf16 %v3893_v61, %v3893_v61 }
0x1ad7   : > { %v5141_v32 = vpop.f32.mrf.mxu0 }
0x1ad8   : > { %5159 = vmatmul.mubr.msk.bf16.gmra.mxu1 %vm2212_vm5, %v3896_v21 }
0x1b6c   : > { %v3981_v29 = vpop.f32.mrf.mxu1 }
0x1b6d   : > { %v3982_v46 = vadd.f32 %v4466_v31, %v3981_v29 }
0x1b6e   : > { %v5152_v34 = vpop.f32.mrf.mxu1 }
0x1b6f   : > { %v4003_v26 = vadd.f32 %v3982_v46, %v6780_v28 }
0x1b70   : > { %v3984_v33 = vpop.f32.mrf.mxu1 }
0x1b71   : > { %v4012_v30 = vsel %vm677_vm1, %v4003_v26, 0.0  ;;  %v3985_v56 = vadd.f32 %v4466_v31, %v3984_v33 }
0x1b72   : > { %v5153_v59 = vpop.f32.mrf.mxu1 }
0x1b73   : > { %v4004_v43 = vadd.f32 %v3985_v56, %v6782_v11 }
0x1b74   : > { %v3989_v44 = vpop.f32.mrf.mxu1 }
0x1b75   : > { %v3990_v63 = vadd.f32 %v4466_v31, %v3989_v44  ;;  %v4015_v4 = vsel %vm677_vm1, %v4004_v43, 0.0 }
0x1b76   : > { %v5156_v2 = vpop.f32.mrf.mxu1 }
0x1b77   : > { %v4005_v49 = vadd.f32 %v3990_v63, %v6789_v20  ;;  %v4476_v2 = vld [vmem:[%s6939_s14 + $0x1] ss:$0 sm:$0xff] }
0x1b78   : > { %v3992_v42 = vpop.f32.mrf.mxu1 }
0x1b79   : > { %v4018_v23 = vsel %vm677_vm1, %v4005_v49, 0.0  ;;  %v3993_v5 = vadd.f32 %v4466_v31, %v3992_v42 }
0x1b7a   : > { %4019 = vadd.xlane.f32.xlu0 %v4018_v23  ;;  %v5157_v25 = vpop.f32.mrf.mxu1 }
0x1b7b   : > { %v4006_v20 = vadd.f32 %v3993_v5, %v6791_v18  ;;  %v4477_v25 = vld [vmem:[%s6940_s15 + $0x1] ss:$0 sm:$0xff] }
0x1b7d   : > { %v4021_v58 = vsel %vm677_vm1, %v4006_v20, 0.0 }
0x1b7e   : > { %4013 = vadd.xlane.f32.xlu0 %v4012_v30 }
0x1b98   : > { %v3997_v41 = vpop.f32.mrf.mxu1 }
0x1b99   : > { %v3998_v53 = vadd.f32 %v4466_v31, %v3997_v41 }
0x1b9a   : > { %v5160_v27 = vpop.f32.mrf.mxu1 }
0x1b9b   : > { %v4007_v39 = vadd.f32 %v3998_v53, %v6798_v48 }
0x1b9c   : > { %v4000_v54 = vpop.f32.mrf.mxu1 }
0x1b9d   : > { %v4024_v35 = vsel %vm677_vm1, %v4007_v39, 0.0 }
0x1b9e   : > { %4025 = vadd.xlane.f32.xlu1 %v4024_v35  ;;  %v5161_v28 = vpop.f32.mrf.mxu1 }
0x1ba2   : > { %4022 = vadd.xlane.f32.xlu1 %v4021_v58 }
0x1ba6   : > { %4016 = vadd.xlane.f32.xlu1 %v4015_v4 }
0x1c03   : > { %v4020_v38 = vpop.xlane.xlu0 %4019 }
0x1c04   : > { %v4029_v36 = vmul.f32 0.03125, %v4020_v38 }
0x1c06   : > { %v4034_v60 = vsub.f32 %v4005_v49, %v4029_v36 }
0x1c07   : > { %v4014_v48 = vpop.xlane.xlu0 %4013 }
0x1c08   : > { %v4027_v51 = vmul.f32 0.03125, %v4014_v48  ;;  %v4039_v24 = vmul.f32 %v4034_v60, %v4034_v60  ;;  %v4099_v48 = vld [vmem:[%s6997_s1] sm:$0xf]  ;;  %s4247_s1 = scalar_lea.sflag [#allocation3], %s621_s3 }
0x1c0a   : > { %v4032_v45 = vsub.f32 %v4003_v26, %v4027_v51  ;;  %v4048_v18 = vsel %vm677_vm1, %v4039_v24, 0.0 }
0x1c0b   : > { %4049 = vadd.xlane.f32.xlu1 %v4048_v18 }
0x1c0c   : > { %v4037_v15 = vmul.f32 %v4032_v45, %v4032_v45 }
0x1c0e   : > { %v4042_v40 = vsel %vm677_vm1, %v4037_v15, 0.0 }
0x1c0f   : > { %4043 = vadd.xlane.f32.xlu1 %v4042_v40 }
0x1c27   : > { %v4026_v11 = vpop.xlane.xlu1 %4025 }
0x1c28   : > { %v4031_v10 = vmul.f32 0.03125, %v4026_v11 }
0x1c2a   : > { %v4036_v14 = vsub.f32 %v4007_v39, %v4031_v10 }
0x1c2b   : > { %v4023_v52 = vpop.xlane.xlu1 %4022 }
0x1c2c   : > { %v4030_v62 = vmul.f32 0.03125, %v4023_v52  ;;  %v4041_v47 = vmul.f32 %v4036_v14, %v4036_v14 }
0x1c2e   : > { %v4035_v3 = vsub.f32 %v4006_v20, %v4030_v62  ;;  %v4054_v50 = vsel %vm677_vm1, %v4041_v47, 0.0  ;;  %v5248_v62 = vld [vmem:[%s6943_s18 + $0x8] sm:$0xff]   ;;  %v5249_v47 = vld [vmem:[%s6943_s18] sm:$0xff]  }
0x1c2f   : > { %4055 = vadd.xlane.f32.xlu0 %v4054_v50  ;;  %v4017_v16 = vpop.xlane.xlu1 %4016 }
0x1c30   : > { %v4028_v55 = vmul.f32 0.03125, %v4017_v16  ;;  %v4040_v13 = vmul.f32 %v4035_v3, %v4035_v3 }
0x1c32   : > { %v4033_v0 = vsub.f32 %v4004_v43, %v4028_v55  ;;  %v4051_v37 = vsel %vm677_vm1, %v4040_v13, 0.0  ;;  %v4479_v13 = vld [vmem:[%s6941_s16] ss:$0 sm:$0xff] }
0x1c33   : > { %4052 = vadd.xlane.f32.xlu0 %v4051_v37  ;;  %v4480_v37 = vld [vmem:[%s6942_s17] ss:$0 sm:$0xff] }
0x1c34   : > { %v4038_v6 = vmul.f32 %v4033_v0, %v4033_v0 }
0x1c36   : > { %v4045_v57 = vsel %vm677_vm1, %v4038_v6, 0.0 }
0x1c37   : > { %4046 = vadd.xlane.f32.xlu0 %v4045_v57 }
0x1c94   : > { %v4050_v9 = vpop.xlane.xlu1 %4049 }
0x1c95   : > { %v4059_v7 = vmul.f32 0.03125, %v4050_v9 }
0x1c97   : > { %v4064_v8 = vadd.f32 1e-05, %v4059_v7 }
0x1c98   : > { %v4044_v17 = vpop.xlane.xlu1 %4043 }
0x1c99   : > { %v4057_v22 = vmul.f32 0.03125, %v4044_v17  ;;  %5440 = vrsqrt.f32 %v4064_v8 }
0x1c9b   : > { %v4062_v19 = vadd.f32 1e-05, %v4057_v22 }
0x1ca6   : > { %v5441_v44 = vpop.eup %5440 }
0x1ca7   : > { %v4074_v63 = vmul.f32 %v5441_v44, %v4034_v60 }
0x1ca9   : > { %v4085_v30 = vmul.f32 %v4476_v2, %v4074_v63 }
0x1cab   : > { %v4096_v56 = vadd.f32 %v4477_v25, %v4085_v30 }
0x1cb8   : > { %v4056_v12 = vpop.xlane.xlu0 %4055 }
0x1cb9   : > { %v4061_v61 = vmul.f32 0.03125, %v4056_v12 }
0x1cbb   : > { %v4066_v21 = vadd.f32 1e-05, %v4061_v61 }
0x1cbc   : > { %v4053_v32 = vpop.xlane.xlu0 %4052 }
0x1cbd   : > { %5442 = vrsqrt.f32 %v4066_v21  ;;  %v4060_v29 = vmul.f32 0.03125, %v4053_v32 }
0x1cbe   : > { %5444 = vrsqrt.f32 %v4062_v19 }
0x1cbf   : > { %v4065_v34 = vadd.f32 1e-05, %v4060_v29 }
0x1cc0   : > { %v4047_v33 = vpop.xlane.xlu0 %4046 }
0x1cc1   : > { %5446 = vrsqrt.f32 %v4065_v34  ;;  %v4058_v31 = vmul.f32 0.03125, %v4047_v33 }
0x1cc3   : > { %v4063_v59 = vadd.f32 1e-05, %v4058_v31 }
0x1cc5   : > { %5448 = vrsqrt.f32 %v4063_v59 }
0x1cca   : > { %v5443_v46 = vpop.eup %5442 }
0x1ccb   : > { %v4076_v49 = vmul.f32 %v5443_v46, %v4036_v14  ;;  %v5445_v42 = vpop.eup %5444 }
0x1ccc   : > { %v4072_v53 = vmul.f32 %v5445_v42, %v4032_v45 }
0x1ccd   : > { %v4087_v26 = vmul.f32 %v4476_v2, %v4076_v49 }
0x1cce   : > { %v5447_v23 = vpop.eup %5446  ;;  %v4083_v43 = vmul.f32 %v4476_v2, %v4072_v53 }
0x1ccf   : > { %v4098_v41 = vadd.f32 %v4477_v25, %v4087_v26  ;;  %v4075_v5 = vmul.f32 %v5447_v23, %v4035_v3 }
0x1cd0   : > { %v4094_v38 = vadd.f32 %v4477_v25, %v4083_v43 }
0x1cd1   : > { %v4102_v27 = vpack.c.bf16 %v4098_v41, %v4098_v41  ;;  %v4086_v39 = vmul.f32 %v4476_v2, %v4075_v5 }
0x1cd2   : > { %v5449_v54 = vpop.eup %5448 }
0x1cd3   : > { %v4107_v20 = vsel %vm916_vm4, %v4102_v27, 0  ;;  %v4097_v35 = vadd.f32 %v4477_v25, %v4086_v39  ;;  %v4073_v28 = vmul.f32 %v5449_v54, %v4033_v0 }
0x1cd4   : > { %5163 = vmatpush3.bf16.msra.mxu0 %v4107_v20 }
0x1cd5   : > { %5164 = vmatprep.subr.bf16.mxu0 %v5519_v1  ;;  %v4101_v58 = vpack.c.bf16 %v4097_v35, %v4096_v56  ;;  %v4084_v4 = vmul.f32 %v4476_v2, %v4073_v28 }
0x1cd7   : > { %v4095_v36 = vadd.f32 %v4477_v25, %v4084_v4 }
0x1cd8   : > { %5165 = vmatpush3.bf16.msra.mxu0 %v4101_v58 }
0x1cd9   : > { %5166 = vmatprep.subr.bf16.mxu0 %v5519_v1  ;;  %v4100_v60 = vpack.c.bf16 %v4095_v36, %v4094_v38 }
0x1cdc   : > { %5167 = vmatpush3.bf16.msra.mxu0 %v4100_v60 }
0x1cdd   : > { %5172 = vmatprep.subr.bf16.mxu0 %v5519_v1 }
0x1cdf   : > { %5169 = vmatmul.mubr.msk.bf16.vlgmr.msra.gmra.mxu0 %vm840_vm3, %v4099_v48 }
0x1ce0   : > { %5176 = vmatprep.mubr.msk.bf16.mxu0 %vm5520_vm0, %v5519_v1  ;;  %5173 = vmatpush3.bf16.msra.mxu0 %v5248_v62 }
0x1ce1   : > { %5174 = vmatprep.subr.bf16.mxu0 %v5519_v1  ;;  %v4481_v1 = vld [vmem:[%s6999_s30] ss:$0 sm:$0xff]  ;;  %s5463_s30 = scalar_lea.vmem %s5462_s23, 256 }
0x1ce2   : > { %p5465_p1 = scmp.lt.s32.totalorder %s5463_s30, %s5457_s26 }
0x1ce4   : > { %5175 = vmatpush3.bf16.msra.mxu0 %v5249_v47  ;;  %p5466_p2 = por %p5465_p1, %p5464_p0 }
0x1ce6   : > { %p5467_p3 = pnand %p5466_p2, %p5460_p13 }
0x1d9f   : > { %v4143_v51 = vpop.f32.mrf.mxu0 }
0x1da0   : > { %v4151_v24 = vsel %vm677_vm1, %v4143_v51, 0.0 }
0x1da1   : > { %4152 = vadd.xlane.f32.xlu1 %v4151_v24  ;;  %v5170_v45 = vpop.f32.mrf.mxu0 }
0x1da3   : > { %v4146_v18 = vpop.f32.mrf.mxu0 }
0x1da5   : > { %v5171_v15 = vpop.f32.mrf.mxu0 }
0x1e2a   : > { %v4153_v40 = vpop.xlane.xlu1 %4152 }
0x1e2b   : > { %v4154_v11 = vmul.f32 0.03125, %v4153_v40 }
0x1e2d   : > { %v4155_v10 = vsub.f32 %v4143_v51, %v4154_v11 }
0x1e2f   : > { %v4156_v14 = vmul.f32 %v4155_v10, %v4155_v10 }
0x1e31   : > { %v4157_v52 = vsel %vm677_vm1, %v4156_v14, 0.0 }
0x1e32   : > { %4158 = vadd.xlane.f32.xlu0 %v4157_v52 }
0x1ebb   : > { %v4159_v3 = vpop.xlane.xlu0 %4158 }
0x1ebc   : > { %v4160_v50 = vmul.f32 0.03125, %v4159_v3 }
0x1ebe   : > { %v4161_v16 = vadd.f32 1e-05, %v4160_v50 }
0x1ec0   : > { %5450 = vrsqrt.f32 %v4161_v16 }
0x1ecd   : > { %v5451_v55 = vpop.eup %5450 }
0x1ece   : > { %v4163_v0 = vmul.f32 %v5451_v55, %v4155_v10 }
0x1ed0   : > { %v4170_v6 = vmul.f32 %v4479_v13, %v4163_v0 }
0x1ed2   : > { %v4177_v57 = vadd.f32 %v4480_v37, %v4170_v6 }
0x1ed4   : > { %v4178_v9 = vpack.c.bf16 %v4177_v57, %v4177_v57 }
0x1ed6   : > { %5177 = vmatmul.mubr.msk.bf16.vlgmr.msra.gmra.mxu0 %vm677_vm1, %v4178_v9 }
0x1f96   : > { %v4239_v7 = vpop.f32.mrf.mxu0 }
0x1f97   : > { %v4240_v17 = vadd.f32 %v4481_v1, %v4239_v7 }
0x1f98   : > { %v5178_v8 = vpop.f32.mrf.mxu0 }
0x1f99   : > { %4245 = vst [vmem:[%s623_s19] sm:$0xff] %v4240_v17 }
0x1f9a   : > { %v4242_v22 = vpop.f32.mrf.mxu0 }
0x1f9b   : > { %5470 = shalt.err (!%p5467_p3)
}
0x1f9c   : > { %s5471_s29 = scalar_lea.hbm %s6884_s0, 128  ;;  %s5475_s27 = scalar_lea.hbm %s7000_s25, 256 }
0x1f9d   : > { %p5472_p4 = scmp.ne.s32.totalorder %s6884_s0, %s5471_s29  ;;  %p5476_p9 = scmp.lt.s32.totalorder %s6884_s0, %s7000_s25 }
0x1f9e   : > { %p5477_p10 = scmp.lt.s32.totalorder %s5475_s27, %s5471_s29 }
0x1f9f   : > { %p5473_p7 = pnand %p5472_p4, %p5676_p5 }
0x1fa0   : > { %p5478_p11 = por %p5477_p10, %p5476_p9 }
0x1fa1   : > { %p5474_p8 = pneg %p5473_p7 }
0x1fa3   : > { %p5479_p12 = pnand %p5478_p11, %p5474_p8 }
0x1fa5   : > { %5482 = shalt.err (!%p5479_p12)
}
0x1fa6   : > { %5180 = dma.vmem_to_hbm [thread:$0]  (%p5676_p5), %s6886_s20, 128, %s6884_s0, %s4247_s1   ;;  %v5179_v12 = vpop.f32.mrf.mxu0 }
0x1fa7 PF: > { %s7001_s26 = sld [smem:[#allocation7_spill]] }
0x1fa8   : > { %s7002_s23 = sld [smem:[#allocation5_spill]] }
0x1fad   : > { %p5186_p13 = scmp.ge.s32.totalorder %s7001_s26, 2 }
0x1fae   : > { %s4272_s3 = sand.u32 1, %s7002_s23  }
0x1faf   : > { %p5183_p0 = pnand %p5186_p13, %p5680_p6  ;;  %s4273_s19 = scalar_lea.sflag [#allocation3], %s4272_s3 }
0x1fb1   : > { %p5184_p1 = pneg %p5183_p0 }
0x1fb3   : > { %5500 = dma.done.wait (%p5184_p1), %s4273_s19, 128  }
0x1fb4   : > { %5502 = vsyncadd (%p5184_p1), %s4273_s19, 4294967168  ;;  %s7004_s24 = sld [smem:[#allocation8_spill]]  ;;  %s7007_s1 = smov %s5509_s22 }
0x1fb5   : > { %s7005_s29 = sld [smem:[#allocation6_spill]] }
0x1fb6   : > { %s7006_s23 = sld [smem:[#allocation9_spill]] }
0x1fba   : > { %p30_p2 = scmp.ge.s32.totalorder %s7004_s24, 4  }
0x1fbb   : > { %s7008_s22 = smov %s7005_s29 }
0x1fbc   :  { %32 = sbr.rel (!%p30_p2) target bundleno = 11 (0xb), region = 153 }
0x1fc1   :  { %4278 = vsyncpa [#allocation3], 1 }
0x1fc2   :  { %4280 = vsyncpa [#allocation3 + $0x1], 1 }

</bundles_post_ra>
